<compile_context>
chip_gen: v5e
topology: v5e:2x2
jax: 0.10.0
libtpu: 0.0.40
codegen_flags: <defaults>
</compile_context>

<pallas_src>
import functools

import numpy as np

import jax
import jax.numpy as jnp
from jax import lax
from jax.experimental import pallas as pl
from jax.experimental.pallas import tpu as pltpu


_EPS = 1e-5
_INV_SQRT2 = 0.7071067811865476


# ----------------------------------------------------------------------------
# In-kernel exact GELU (erf via Abramowitz & Stegun 7.1.26, ~1.5e-7 max err).
# Exact divide: the approximate EUP reciprocal costs ~1e-3 relative on erf.
# ----------------------------------------------------------------------------
def _erf_approx(x):
    p = 0.3275911
    a1, a2, a3, a4, a5 = (0.254829592, -0.284496736, 1.421413741,
                          -1.453152027, 1.061405429)
    sgn = jnp.where(x >= 0.0, 1.0, -1.0)
    ax = jnp.abs(x)
    t = 1.0 / (1.0 + p * ax)
    poly = ((((a5 * t + a4) * t + a3) * t + a2) * t + a1) * t
    return sgn * (1.0 - poly * jnp.exp(-ax * ax))


def _gelu_exact(x):
    return 0.5 * x * (1.0 + _erf_approx(x * _INV_SQRT2))


def _vmem_limit_bytes(need_bytes):
    # 2x headroom, clamp to [32 MiB, 64 MiB] (v7x-physical safe; v5e scoped
    # default of 16 MiB is too small for the resident slab + weights).
    return int(min(max(2 * need_bytes + (8 << 20), 32 << 20), 64 << 20))


# ----------------------------------------------------------------------------
# Host-side weight transform: banded im2col matrix.
# lhs column ((kd*3+kh)*W + wi)*C + ci  x  wmat row -> output column wo*C + co,
# with wi = wo - 1 + kw (missing taps == zero padding along W).
# ----------------------------------------------------------------------------
def build_banded_weight(w, width):
    # w: (Cout, Cin, 3, 3, 3) numpy
    cout, cin = int(w.shape[0]), int(w.shape[1])
    wt = np.transpose(np.asarray(w, np.float32), (2, 3, 4, 1, 0))  # (kd,kh,kw,ci,co)
    wm = np.zeros((3, 3, width, cin, width, cout), np.float32)
    for kw in range(3):
        for wo in range(width):
            wi = wo - 1 + kw
            if 0 <= wi < width:
                wm[:, :, wi, :, wo, :] = wt[:, :, kw, :, :]
    return wm.reshape(9 * width * cin, width * cout)


# ----------------------------------------------------------------------------
# Kernel A: fused [optional BN-affine+GELU on input] -> 3x3x3 conv (+bias)
#           -> per-channel sum / sum-of-squares partials for BatchNorm.
# Grid: (N, D//D_blk); both axes "parallel" (stats are per-block partials).
# ----------------------------------------------------------------------------
def _conv_bn_kernel(x_ref, scale_ref, shift_ref, w_ref, b_ref,
                    y_ref, sum_ref, ssq_ref, *, apply_input_act, d_blk):
    # x_ref:   (D, H, W*C)  full volume for this batch element (resident).
    # scale/shift_ref: (1, W*C) previous-layer BN affine (conv2 path only).
    # w_ref:   (9*W*C, W*C) banded bf16 weights (constant index map).
    # b_ref:   (1, W*C)     bias tiled over W.
    # y_ref:   (d_blk, H, W*C) conv output block.
    # sum_ref/ssq_ref: (1, W*C) per-(n, d-block) partial stats.
    D, H, WC = x_ref.shape
    db = pl.program_id(1)
    d0 = pl.multiple_of(db * d_blk, d_blk)

    def _act(rows):
        rows = rows.astype(jnp.float32)
        if apply_input_act:
            # norm1 + act1 fused into conv2's input path.
            rows = _gelu_exact(rows * scale_ref[...] + shift_ref[...])
        return rows

    # Activate each needed input row exactly once (core + 2-deep depth halo);
    # halo is zeroed at the volume boundary (PyTorch zero-pads the activated
    # tensor for conv2 and the raw tensor for conv1 -- both give zero here).
    core = _act(x_ref[...] if d_blk == D else x_ref[pl.ds(d0, d_blk)])
    prev = _act(x_ref[jnp.maximum(d0 - 1, 0)])
    nxt = _act(x_ref[jnp.minimum(d0 + d_blk, D - 1)])
    prev = prev * (d0 > 0).astype(jnp.float32)
    nxt = nxt * (d0 + d_blk < D).astype(jnp.float32)

    # Build the depth+height padded, pre-activated slab ONCE, in bf16.
    slab = jnp.concatenate([prev[None].astype(jnp.bfloat16),
                            core.astype(jnp.bfloat16),
                            nxt[None].astype(jnp.bfloat16)], axis=0)
    zrow = jnp.zeros((d_blk + 2, 1, WC), jnp.bfloat16)
    slab = jnp.concatenate([zrow, slab, zrow], axis=1)      # (d_blk+2, H+2, WC)

    # im2col against the banded weight: ONE MXU dot per grid step.
    pieces = []
    for kd in range(3):
        for kh in range(3):
            pieces.append(
                slab[kd:kd + d_blk, kh:kh + H, :].reshape(d_blk * H, WC))
    lhs = jnp.concatenate(pieces, axis=-1)                   # (d_blk*H, 9*WC)
    out = jnp.dot(lhs, w_ref[...], preferred_element_type=jnp.float32)
    out = out + b_ref[...]

    y_ref[...] = out.reshape(d_blk, H, WC).astype(y_ref.dtype)

    # BatchNorm statistics fused into the conv epilogue, from the f32 `out`
    # (per-lane partials; the tiny W->C fold happens in the wrapper).
    sum_ref[...] = jnp.sum(out, axis=0, keepdims=True)
    ssq_ref[...] = jnp.sum(out * out, axis=0, keepdims=True)


def conv3x3_bn_stats(x, wmat, bias_row, scale_row, shift_row, *,
                     apply_input_act, out_dtype, d_blk=None):
    # x: (N, D, H, W*C)
    N, D, H, WC = x.shape
    K = wmat.shape[0]
    assert K == 9 * WC and wmat.shape[1] == WC

    if d_blk is None:
        # Fold the full depth range per step (one big dot). If batch alone
        # can't feed both v7x TensorCores, split D into 2 parallel blocks.
        d_blk = D if (N >= 2 or D % 2 != 0) else D // 2
    assert D % d_blk == 0
    nd = D // d_blk

    kernel = functools.partial(_conv_bn_kernel,
                               apply_input_act=apply_input_act, d_blk=d_blk)

    out_itemsize = jnp.dtype(out_dtype).itemsize
    x_itemsize = x.dtype.itemsize
    # Conservative per-step VMEM need: resident x slab + weights + lhs/out
    # temporaries + double-buffered y block + stats.
    need = (D * H * WC * x_itemsize + K * WC * 2
            + d_blk * H * (9 * WC) * 2 + d_blk * H * WC * 4
            + 2 * d_blk * H * WC * out_itemsize + 64 * WC)
    flops = 2 * N * D * H * K * WC
    trans = N * D * H * WC if apply_input_act else 0
    bytes_accessed = (x.size * x_itemsize + wmat.size * wmat.dtype.itemsize
                      + N * D * H * WC * out_itemsize + 2 * N * nd * WC * 4)

    return pl.pallas_call(
        kernel,
        out_shape=(
            jax.ShapeDtypeStruct((N, D, H, WC), out_dtype),      # conv output
            jax.ShapeDtypeStruct((N, nd, 1, WC), jnp.float32),   # partial sum
            jax.ShapeDtypeStruct((N, nd, 1, WC), jnp.float32),   # partial sumsq
        ),
        grid=(N, nd),
        in_specs=[
            pl.BlockSpec((None, D, H, WC), lambda n, db: (n, 0, 0, 0)),
            pl.BlockSpec((1, WC), lambda n, db: (0, 0)),
            pl.BlockSpec((1, WC), lambda n, db: (0, 0)),
            pl.BlockSpec((K, WC), lambda n, db: (0, 0)),   # weights stay resident
            pl.BlockSpec((1, WC), lambda n, db: (0, 0)),
        ],
        out_specs=(
            pl.BlockSpec((None, d_blk, H, WC), lambda n, db: (n, db, 0, 0)),
            pl.BlockSpec((None, None, 1, WC), lambda n, db: (n, db, 0, 0)),
            pl.BlockSpec((None, None, 1, WC), lambda n, db: (n, db, 0, 0)),
        ),
        compiler_params=pltpu.CompilerParams(
            dimension_semantics=("parallel", "parallel"),
            vmem_limit_bytes=_vmem_limit_bytes(need)),
        cost_estimate=pl.CostEstimate(flops=int(flops),
                                      transcendentals=int(trans),
                                      bytes_accessed=int(bytes_accessed)),
    )(x, scale_row, shift_row, wmat, bias_row)


# ----------------------------------------------------------------------------
# Kernel B: final BatchNorm affine + residual add + exact GELU, lane-dense
# (operates on a (rows, H*W*C) view; rows blocked from a VMEM budget).
# ----------------------------------------------------------------------------
def _bn_res_gelu_kernel(y_ref, scale_ref, shift_ref, res_ref, o_ref):
    z = (y_ref[...].astype(jnp.float32) * scale_ref[...] + shift_ref[...]
         + res_ref[...].astype(jnp.float32))
    o_ref[...] = _gelu_exact(z).astype(o_ref.dtype)


def _pick_row_block(m, row_bytes, budget=6 << 20):
    cap = max(1, min(m, 1024, budget // max(row_bytes, 1)))
    for br in range(cap, 0, -1):
        if m % br == 0 and br % 8 == 0:
            return br
    for br in range(cap, 0, -1):
        if m % br == 0:
            return br
    return m


def bn_residual_gelu(y, scale_row, shift_row, res):
    M, L = y.shape
    row_bytes = L * (y.dtype.itemsize + res.dtype.itemsize + 4) * 2
    br = _pick_row_block(M, row_bytes)
    flops = 12 * M * L
    trans = M * L
    bytes_accessed = M * L * (y.dtype.itemsize + res.dtype.itemsize + 4) + 2 * L * 4
    return pl.pallas_call(
        _bn_res_gelu_kernel,
        out_shape=jax.ShapeDtypeStruct((M, L), jnp.float32),
        grid=(M // br,),
        in_specs=[
            pl.BlockSpec((br, L), lambda i: (i, 0)),
            pl.BlockSpec((1, L), lambda i: (0, 0)),
            pl.BlockSpec((1, L), lambda i: (0, 0)),
            pl.BlockSpec((br, L), lambda i: (i, 0)),
        ],
        out_specs=pl.BlockSpec((br, L), lambda i: (i, 0)),
        compiler_params=pltpu.CompilerParams(
            dimension_semantics=("parallel",),
            vmem_limit_bytes=_vmem_limit_bytes(br * row_bytes)),
        cost_estimate=pl.CostEstimate(flops=int(flops),
                                      transcendentals=int(trans),
                                      bytes_accessed=int(bytes_accessed)),
    )(y, scale_row, shift_row, res)


# ----------------------------------------------------------------------------
# Stats -> BN affine (tiny per-channel math, done in plain JAX).
# NOTE: E[x^2] - E[x]^2 in f32 with clamp >= 0; fine at this scale for fresh
#       (near-zero-mean) activations.
# ----------------------------------------------------------------------------
def _stats_to_affine(s, ss, count, channels, eps=_EPS):
    total = s.reshape(-1, channels).sum(axis=0)
    total2 = ss.reshape(-1, channels).sum(axis=0)
    mean = total / count
    var = jnp.maximum(total2 / count - mean * mean, 0.0)
    scale = lax.rsqrt(var + eps)
    return scale, -mean * scale


# ----------------------------------------------------------------------------
# Full forward pass (PyTorch NCDHW in / NCDHW out).
# ----------------------------------------------------------------------------
def transformer_block3d_forward(x_ncdhw, params):
    N, C, D, H, W = x_ncdhw.shape
    # NCDHW -> NDHWC, then flatten (W, C) onto the lane axis.
    x = jnp.transpose(x_ncdhw, (0, 2, 3, 4, 1)).reshape(N, D, H, W * C)
    count = N * D * H * W

    dummy = jnp.zeros((1, W * C), jnp.float32)   # unused when apply_input_act=False

    # conv1 (+ fused BN1 statistics); intermediate carried in bf16.
    y1, s1, ss1 = conv3x3_bn_stats(x, params["wmat1"], params["b1row"],
                                   dummy, dummy,
                                   apply_input_act=False,
                                   out_dtype=jnp.bfloat16)
    scale1, shift1 = _stats_to_affine(s1, ss1, count, C)

    # conv2 with norm1 + act1 fused into its input (+ fused BN2 statistics).
    y2, s2, ss2 = conv3x3_bn_stats(y1, params["wmat2"], params["b2row"],
                                   jnp.tile(scale1, W)[None, :],
                                   jnp.tile(shift1, W)[None, :],
                                   apply_input_act=True,
                                   out_dtype=jnp.bfloat16)
    scale2, shift2 = _stats_to_affine(s2, ss2, count, C)

    # norm2 + residual + act2, lane-dense (last dim = H*W*C).
    out = bn_residual_gelu(
        y2.reshape(N * D, H * W * C),
        jnp.tile(scale2, H * W)[None, :],
        jnp.tile(shift2, H * W)[None, :],
        x.reshape(N * D, H * W * C))

    out = out.reshape(N, D, H, W, C)
    return jnp.transpose(out, (0, 4, 1, 2, 3))   # NDHWC -> NCDHW


# ----------------------------------------------------------------------------
# Deterministic parameter init (kaiming_normal_ / conv-bias statistics),
# raw PyTorch layout (Cout, Cin, kd, kh, kw), plus kernel-ready transforms.
# ----------------------------------------------------------------------------
def init_raw_params(key, dim):
    k1, k2, k3, k4 = jax.random.split(key, 4)
    fan_in = dim * 27
    std = (2.0 / fan_in) ** 0.5
    bound = 1.0 / (fan_in ** 0.5)
    return dict(
        w1=jax.random.normal(k1, (dim, dim, 3, 3, 3), jnp.float32) * std,
        w2=jax.random.normal(k2, (dim, dim, 3, 3, 3), jnp.float32) * std,
        b1=jax.random.uniform(k3, (dim,), jnp.float32, -bound, bound),
        b2=jax.random.uniform(k4, (dim,), jnp.float32, -bound, bound),
    )


def prepare_params(raw, width):
    w1 = np.asarray(raw["w1"])
    w2 = np.asarray(raw["w2"])
    b1 = np.asarray(raw["b1"])
    b2 = np.asarray(raw["b2"])
    return dict(
        # bf16 weights: halves weight DMA / VMEM footprint and feeds the MXU
        # at bf16 rate (accumulation stays f32 via preferred_element_type).
        wmat1=jnp.asarray(build_banded_weight(w1, width), dtype=jnp.bfloat16),
        wmat2=jnp.asarray(build_banded_weight(w2, width), dtype=jnp.bfloat16),
        b1row=jnp.asarray(np.tile(b1, width)[None, :], dtype=jnp.float32),
        b2row=jnp.asarray(np.tile(b2, width)[None, :], dtype=jnp.float32),
    )


# ----------------------------------------------------------------------------
# Pure-JAX reference (f32, HIGHEST precision) for validation.
# ----------------------------------------------------------------------------
def reference_forward(x_ncdhw, raw, eps=_EPS):
    x = jnp.transpose(x_ncdhw, (0, 2, 3, 4, 1))
    identity = x

    def conv(z, w, b):
        w5 = jnp.transpose(w, (2, 3, 4, 1, 0))   # (kd,kh,kw,Cin,Cout) = DHWIO
        y = lax.conv_general_dilated(
            z, w5, window_strides=(1, 1, 1), padding="SAME",
            dimension_numbers=("NDHWC", "DHWIO", "NDHWC"),
            precision=lax.Precision.HIGHEST)
        return y + b

    def bn(y):
        m = y.mean(axis=(0, 1, 2, 3))
        v = ((y - m) ** 2).mean(axis=(0, 1, 2, 3))
        return (y - m) / jnp.sqrt(v + eps)

    y = jax.nn.gelu(bn(conv(x, raw["w1"], raw["b1"])), approximate=False)
    y = jax.nn.gelu(bn(conv(y, raw["w2"], raw["b2"])) + identity,
                    approximate=False)
    return jnp.transpose(y, (0, 4, 1, 2, 3))


if __name__ == "__main__":
    key = jax.random.PRNGKey(0)
    kx, kp = jax.random.split(key)

    # channels=16 with W=8 makes the flattened (W*C)=128 lane axis full-width
    # (unmasked vst) and the per-step dot (64, 1152) @ (1152, 128).
    channels, depth, height, width, batch = 16, 8, 8, 8, 2
    x = jax.random.normal(kx, (batch, channels, depth, height, width),
                          jnp.float32)                       # NCDHW
    raw = init_raw_params(kp, channels)
    params = prepare_params(raw, width)

    fwd = jax.jit(transformer_block3d_forward)
    out = jax.block_until_ready(fwd(x, params))

    ref = reference_forward(x, raw)
    assert out.shape == x.shape, (out.shape, x.shape)
    max_err = float(jnp.max(jnp.abs(out - ref)))
    # Expected error budget: bf16 weights + bf16 intermediates (y1, y2) give
    # ~2^-9 relative roundings propagated through two convs and two BNs;
    # observed max abs err is O(1e-2) vs the f32 HIGHEST-precision reference.
    if not bool(jnp.allclose(out, ref, atol=3e-2, rtol=2e-2)):
        raise AssertionError(
            f"Pallas output mismatch vs reference, max abs err {max_err}")

    print("KERNEL_OK")
</pallas_src>

<mosaic_0001>
module attributes {stable_mosaic.version = 11 : i64} {
  func.func @_conv_bn_kernel(%arg0: i32, %arg1: i32, %arg2: memref<1x8x8x128xf32, #tpu.memory_space<vmem>>, %arg3: memref<1x128xf32, #tpu.memory_space<vmem>>, %arg4: memref<1x128xf32, #tpu.memory_space<vmem>>, %arg5: memref<1152x128xbf16, #tpu.memory_space<vmem>>, %arg6: memref<1x128xf32, #tpu.memory_space<vmem>>, %arg7: memref<1x8x8x128xbf16, #tpu.memory_space<vmem>>, %arg8: memref<1x1x1x128xf32, #tpu.memory_space<vmem>>, %arg9: memref<1x1x1x128xf32, #tpu.memory_space<vmem>>) attributes {dimension_semantics = [#tpu.dimension_semantics<parallel>, #tpu.dimension_semantics<parallel>], iteration_bounds = array<i64: 2, 1>, scalar_prefetch = 0 : i64, scratch_operands = 0 : i64, tpu.core_type = #tpu.core_type<tc>, window_params = [{transform_indices = @transform_0, window_bounds = array<i64: 1, 8, 8, 128>}, {pipeline_mode = #tpu.pipeline_mode<synchronous>, transform_indices = @transform_1, window_bounds = array<i64: 1, 128>}, {pipeline_mode = #tpu.pipeline_mode<synchronous>, transform_indices = @transform_2, window_bounds = array<i64: 1, 128>}, {pipeline_mode = #tpu.pipeline_mode<synchronous>, transform_indices = @transform_3, window_bounds = array<i64: 1152, 128>}, {pipeline_mode = #tpu.pipeline_mode<synchronous>, transform_indices = @transform_4, window_bounds = array<i64: 1, 128>}, {transform_indices = @transform_5, window_bounds = array<i64: 1, 8, 8, 128>}, {transform_indices = @transform_6, window_bounds = array<i64: 1, 1, 1, 128>}, {transform_indices = @transform_7, window_bounds = array<i64: 1, 1, 1, 128>}]} {
    %c8_i32 = arith.constant 8 : i32
    %0 = arith.muli %arg1, %c8_i32 : i32
    %1 = tpu.assume_multiple %0, 8 : i32
    %c0 = arith.constant 0 : index
    %c0_0 = arith.constant 0 : index
    %c0_1 = arith.constant 0 : index
    %c0_2 = arith.constant 0 : index
    %2 = vector.load %arg2[%c0, %c0_0, %c0_1, %c0_2] : memref<1x8x8x128xf32, #tpu.memory_space<vmem>>, vector<1x8x8x128xf32>
    %3 = vector.shape_cast %2 : vector<1x8x8x128xf32> to vector<8x8x128xf32>
    %c1_i32 = arith.constant 1 : i32
    %4 = arith.subi %1, %c1_i32 : i32
    %c0_i32 = arith.constant 0 : i32
    %5 = arith.maxsi %4, %c0_i32 : i32
    %c0_3 = arith.constant 0 : index
    %6 = arith.index_cast %5 : i32 to index
    %c0_4 = arith.constant 0 : index
    %c0_5 = arith.constant 0 : index
    %7 = vector.load %arg2[%c0_3, %6, %c0_4, %c0_5] : memref<1x8x8x128xf32, #tpu.memory_space<vmem>>, vector<1x1x8x128xf32>
    %8 = vector.shape_cast %7 : vector<1x1x8x128xf32> to vector<8x128xf32>
    %c8_i32_6 = arith.constant 8 : i32
    %9 = arith.addi %1, %c8_i32_6 : i32
    %c7_i32 = arith.constant 7 : i32
    %10 = arith.minsi %9, %c7_i32 : i32
    %c0_7 = arith.constant 0 : index
    %11 = arith.index_cast %10 : i32 to index
    %c0_8 = arith.constant 0 : index
    %c0_9 = arith.constant 0 : index
    %12 = vector.load %arg2[%c0_7, %11, %c0_8, %c0_9] : memref<1x8x8x128xf32, #tpu.memory_space<vmem>>, vector<1x1x8x128xf32>
    %13 = vector.shape_cast %12 : vector<1x1x8x128xf32> to vector<8x128xf32>
    %c0_i32_10 = arith.constant 0 : i32
    %14 = arith.cmpi sgt, %1, %c0_i32_10 : i32
    %15 = arith.extui %14 : i1 to i32
    %16 = arith.sitofp %15 : i32 to f32
    %17 = vector.broadcast %16 : f32 to vector<8x128xf32>
    %18 = arith.mulf %8, %17 : vector<8x128xf32>
    %c8_i32_11 = arith.constant 8 : i32
    %19 = arith.addi %1, %c8_i32_11 : i32
    %c8_i32_12 = arith.constant 8 : i32
    %20 = arith.cmpi slt, %19, %c8_i32_12 : i32
    %21 = arith.extui %20 : i1 to i32
    %22 = arith.sitofp %21 : i32 to f32
    %23 = vector.broadcast %22 : f32 to vector<8x128xf32>
    %24 = arith.mulf %13, %23 : vector<8x128xf32>
    %25 = vector.shape_cast %18 : vector<8x128xf32> to vector<1x8x128xf32>
    %26 = arith.truncf %25 : vector<1x8x128xf32> to vector<1x8x128xbf16>
    %27 = arith.truncf %3 : vector<8x8x128xf32> to vector<8x8x128xbf16>
    %28 = vector.shape_cast %24 : vector<8x128xf32> to vector<1x8x128xf32>
    %29 = arith.truncf %28 : vector<1x8x128xf32> to vector<1x8x128xbf16>
    %30 = tpu.concatenate %26, %27, %29 in 0 : vector<1x8x128xbf16>, vector<8x8x128xbf16>, vector<1x8x128xbf16> -> vector<10x8x128xbf16>
    %cst = arith.constant 0.000000e+00 : bf16
    %31 = vector.broadcast %cst : bf16 to vector<10x1x128xbf16>
    %32 = tpu.concatenate %31, %30, %31 in 1 : vector<10x1x128xbf16>, vector<10x8x128xbf16>, vector<10x1x128xbf16> -> vector<10x10x128xbf16>
    %33 = vector.extract_strided_slice %32 {offsets = [0, 0, 0], sizes = [8, 8, 128], strides = [1, 1, 1]} : vector<10x10x128xbf16> to vector<8x8x128xbf16>
    %34 = vector.shape_cast %33 : vector<8x8x128xbf16> to vector<64x128xbf16>
    %35 = vector.extract_strided_slice %32 {offsets = [0, 1, 0], sizes = [8, 8, 128], strides = [1, 1, 1]} : vector<10x10x128xbf16> to vector<8x8x128xbf16>
    %36 = vector.shape_cast %35 : vector<8x8x128xbf16> to vector<64x128xbf16>
    %37 = vector.extract_strided_slice %32 {offsets = [0, 2, 0], sizes = [8, 8, 128], strides = [1, 1, 1]} : vector<10x10x128xbf16> to vector<8x8x128xbf16>
    %38 = vector.shape_cast %37 : vector<8x8x128xbf16> to vector<64x128xbf16>
    %39 = vector.extract_strided_slice %32 {offsets = [1, 0, 0], sizes = [8, 8, 128], strides = [1, 1, 1]} : vector<10x10x128xbf16> to vector<8x8x128xbf16>
    %40 = vector.shape_cast %39 : vector<8x8x128xbf16> to vector<64x128xbf16>
    %41 = vector.extract_strided_slice %32 {offsets = [1, 1, 0], sizes = [8, 8, 128], strides = [1, 1, 1]} : vector<10x10x128xbf16> to vector<8x8x128xbf16>
    %42 = vector.shape_cast %41 : vector<8x8x128xbf16> to vector<64x128xbf16>
    %43 = vector.extract_strided_slice %32 {offsets = [1, 2, 0], sizes = [8, 8, 128], strides = [1, 1, 1]} : vector<10x10x128xbf16> to vector<8x8x128xbf16>
    %44 = vector.shape_cast %43 : vector<8x8x128xbf16> to vector<64x128xbf16>
    %45 = vector.extract_strided_slice %32 {offsets = [2, 0, 0], sizes = [8, 8, 128], strides = [1, 1, 1]} : vector<10x10x128xbf16> to vector<8x8x128xbf16>
    %46 = vector.shape_cast %45 : vector<8x8x128xbf16> to vector<64x128xbf16>
    %47 = vector.extract_strided_slice %32 {offsets = [2, 1, 0], sizes = [8, 8, 128], strides = [1, 1, 1]} : vector<10x10x128xbf16> to vector<8x8x128xbf16>
    %48 = vector.shape_cast %47 : vector<8x8x128xbf16> to vector<64x128xbf16>
    %49 = vector.extract_strided_slice %32 {offsets = [2, 2, 0], sizes = [8, 8, 128], strides = [1, 1, 1]} : vector<10x10x128xbf16> to vector<8x8x128xbf16>
    %50 = vector.shape_cast %49 : vector<8x8x128xbf16> to vector<64x128xbf16>
    %51 = tpu.concatenate %34, %36, %38, %40, %42, %44, %46, %48, %50 in 1 : vector<64x128xbf16>, vector<64x128xbf16>, vector<64x128xbf16>, vector<64x128xbf16>, vector<64x128xbf16>, vector<64x128xbf16>, vector<64x128xbf16>, vector<64x128xbf16>, vector<64x128xbf16> -> vector<64x1152xbf16>
    %c0_13 = arith.constant 0 : index
    %c0_14 = arith.constant 0 : index
    %52 = vector.load %arg5[%c0_13, %c0_14] : memref<1152x128xbf16, #tpu.memory_space<vmem>>, vector<1152x128xbf16>
    %cst_15 = arith.constant dense<0.000000e+00> : vector<64x128xf32>
    %53 = tpu.matmul %51, %52, %cst_15 {dimension_numbers = #tpu.dot_dimension_numbers<[1], [0], [0], [1], [0, 0, 1, 1], [], []>} : vector<64x1152xbf16>, vector<1152x128xbf16>, vector<64x128xf32> -> vector<64x128xf32>
    %c0_16 = arith.constant 0 : index
    %c0_17 = arith.constant 0 : index
    %54 = vector.load %arg6[%c0_16, %c0_17] : memref<1x128xf32, #tpu.memory_space<vmem>>, vector<1x128xf32>
    %55 = vector.broadcast %54 : vector<1x128xf32> to vector<64x128xf32>
    %56 = arith.addf %53, %55 : vector<64x128xf32>
    %57 = vector.shape_cast %56 : vector<64x128xf32> to vector<8x8x128xf32>
    %58 = arith.truncf %57 : vector<8x8x128xf32> to vector<8x8x128xbf16>
    %c0_18 = arith.constant 0 : index
    %c0_19 = arith.constant 0 : index
    %c0_20 = arith.constant 0 : index
    %c0_21 = arith.constant 0 : index
    %59 = vector.load %arg7[%c0_18, %c0_19, %c0_20, %c0_21] : memref<1x8x8x128xbf16, #tpu.memory_space<vmem>>, vector<1x8x8x128xbf16>
    %60 = vector.shape_cast %59 : vector<1x8x8x128xbf16> to vector<8x8x128xbf16>
    %61 = vector.shape_cast %58 : vector<8x8x128xbf16> to vector<1x8x8x128xbf16>
    tpu.vector_store %arg7[%c0_18, %c0_19, %c0_20, %c0_21], %61 {strides = array<i32>} : memref<1x8x8x128xbf16, #tpu.memory_space<vmem>>, vector<1x8x8x128xbf16>,
    %cst_22 = arith.constant dense<0.000000e+00> : vector<128xf32>
    %62 = vector.multi_reduction <add>, %56, %cst_22 [0] : vector<64x128xf32> to vector<128xf32>
    %63 = vector.shape_cast %62 : vector<128xf32> to vector<1x128xf32>
    %c0_23 = arith.constant 0 : index
    %c0_24 = arith.constant 0 : index
    %c0_25 = arith.constant 0 : index
    %c0_26 = arith.constant 0 : index
    %64 = vector.load %arg8[%c0_23, %c0_24, %c0_25, %c0_26] : memref<1x1x1x128xf32, #tpu.memory_space<vmem>>, vector<1x1x1x128xf32>
    %65 = vector.shape_cast %64 : vector<1x1x1x128xf32> to vector<1x128xf32>
    %66 = vector.shape_cast %63 : vector<1x128xf32> to vector<1x1x1x128xf32>
    tpu.vector_store %arg8[%c0_23, %c0_24, %c0_25, %c0_26], %66 {strides = array<i32>} : memref<1x1x1x128xf32, #tpu.memory_space<vmem>>, vector<1x1x1x128xf32>,
    %67 = arith.mulf %56, %56 : vector<64x128xf32>
    %cst_27 = arith.constant dense<0.000000e+00> : vector<128xf32>
    %68 = vector.multi_reduction <add>, %67, %cst_27 [0] : vector<64x128xf32> to vector<128xf32>
    %69 = vector.shape_cast %68 : vector<128xf32> to vector<1x128xf32>
    %c0_28 = arith.constant 0 : index
    %c0_29 = arith.constant 0 : index
    %c0_30 = arith.constant 0 : index
    %c0_31 = arith.constant 0 : index
    %70 = vector.load %arg9[%c0_28, %c0_29, %c0_30, %c0_31] : memref<1x1x1x128xf32, #tpu.memory_space<vmem>>, vector<1x1x1x128xf32>
    %71 = vector.shape_cast %70 : vector<1x1x1x128xf32> to vector<1x128xf32>
    %72 = vector.shape_cast %69 : vector<1x128xf32> to vector<1x1x1x128xf32>
    tpu.vector_store %arg9[%c0_28, %c0_29, %c0_30, %c0_31], %72 {strides = array<i32>} : memref<1x1x1x128xf32, #tpu.memory_space<vmem>>, vector<1x1x1x128xf32>,
    return
  }
  func.func @transform_0(%arg0: i32, %arg1: i32) -> (i32, i32, i32, i32) {
    %c0_i32 = arith.constant 0 : i32
    %c0_i32_0 = arith.constant 0 : i32
    %c0_i32_1 = arith.constant 0 : i32
    %c0_i32_2 = arith.constant 0 : i32
    return %arg0, %c0_i32, %c0_i32_0, %c0_i32_1 : i32, i32, i32, i32
  }
  func.func @transform_1(%arg0: i32, %arg1: i32) -> (i32, i32) {
    %c0_i32 = arith.constant 0 : i32
    %c0_i32_0 = arith.constant 0 : i32
    %c0_i32_1 = arith.constant 0 : i32
    return %c0_i32, %c0_i32_0 : i32, i32
  }
  func.func @transform_2(%arg0: i32, %arg1: i32) -> (i32, i32) {
    %c0_i32 = arith.constant 0 : i32
    %c0_i32_0 = arith.constant 0 : i32
    %c0_i32_1 = arith.constant 0 : i32
    return %c0_i32, %c0_i32_0 : i32, i32
  }
  func.func @transform_3(%arg0: i32, %arg1: i32) -> (i32, i32) {
    %c0_i32 = arith.constant 0 : i32
    %c0_i32_0 = arith.constant 0 : i32
    %c0_i32_1 = arith.constant 0 : i32
    return %c0_i32, %c0_i32_0 : i32, i32
  }
  func.func @transform_4(%arg0: i32, %arg1: i32) -> (i32, i32) {
    %c0_i32 = arith.constant 0 : i32
    %c0_i32_0 = arith.constant 0 : i32
    %c0_i32_1 = arith.constant 0 : i32
    return %c0_i32, %c0_i32_0 : i32, i32
  }
  func.func @transform_5(%arg0: i32, %arg1: i32) -> (i32, i32, i32, i32) {
    %c0_i32 = arith.constant 0 : i32
    %c0_i32_0 = arith.constant 0 : i32
    %c0_i32_1 = arith.constant 0 : i32
    return %arg0, %arg1, %c0_i32, %c0_i32_0 : i32, i32, i32, i32
  }
  func.func @transform_6(%arg0: i32, %arg1: i32) -> (i32, i32, i32, i32) {
    %c0_i32 = arith.constant 0 : i32
    %c0_i32_0 = arith.constant 0 : i32
    %c0_i32_1 = arith.constant 0 : i32
    return %arg0, %arg1, %c0_i32, %c0_i32_0 : i32, i32, i32, i32
  }
  func.func @transform_7(%arg0: i32, %arg1: i32) -> (i32, i32, i32, i32) {
    %c0_i32 = arith.constant 0 : i32
    %c0_i32_0 = arith.constant 0 : i32
    %c0_i32_1 = arith.constant 0 : i32
    return %arg0, %arg1, %c0_i32, %c0_i32_0 : i32, i32, i32, i32
  }
}

module attributes {stable_mosaic.version = 11 : i64} {
  func.func @_bn_res_gelu_kernel(%arg0: i32, %arg1: memref<16x1024xbf16, #tpu.memory_space<vmem>>, %arg2: memref<1x1024xf32, #tpu.memory_space<vmem>>, %arg3: memref<1x1024xf32, #tpu.memory_space<vmem>>, %arg4: memref<16x1024xf32, #tpu.memory_space<vmem>>, %arg5: memref<16x1024xf32, #tpu.memory_space<vmem>>) attributes {dimension_semantics = [#tpu.dimension_semantics<parallel>], iteration_bounds = array<i64: 1>, scalar_prefetch = 0 : i64, scratch_operands = 0 : i64, tpu.core_type = #tpu.core_type<tc>, window_params = [{transform_indices = @transform_0, window_bounds = array<i64: 16, 1024>}, {pipeline_mode = #tpu.pipeline_mode<synchronous>, transform_indices = @transform_1, window_bounds = array<i64: 1, 1024>}, {pipeline_mode = #tpu.pipeline_mode<synchronous>, transform_indices = @transform_2, window_bounds = array<i64: 1, 1024>}, {transform_indices = @transform_3, window_bounds = array<i64: 16, 1024>}, {transform_indices = @transform_4, window_bounds = array<i64: 16, 1024>}]} {
    %c0 = arith.constant 0 : index
    %c0_0 = arith.constant 0 : index
    %0 = vector.load %arg1[%c0, %c0_0] : memref<16x1024xbf16, #tpu.memory_space<vmem>>, vector<16x1024xbf16>
    %1 = arith.extf %0 : vector<16x1024xbf16> to vector<16x1024xf32>
    %c0_1 = arith.constant 0 : index
    %c0_2 = arith.constant 0 : index
    %2 = vector.load %arg2[%c0_1, %c0_2] : memref<1x1024xf32, #tpu.memory_space<vmem>>, vector<1x1024xf32>
    %3 = vector.broadcast %2 : vector<1x1024xf32> to vector<16x1024xf32>
    %4 = arith.mulf %1, %3 : vector<16x1024xf32>
    %c0_3 = arith.constant 0 : index
    %c0_4 = arith.constant 0 : index
    %5 = vector.load %arg3[%c0_3, %c0_4] : memref<1x1024xf32, #tpu.memory_space<vmem>>, vector<1x1024xf32>
    %6 = vector.broadcast %5 : vector<1x1024xf32> to vector<16x1024xf32>
    %7 = arith.addf %4, %6 : vector<16x1024xf32>
    %c0_5 = arith.constant 0 : index
    %c0_6 = arith.constant 0 : index
    %8 = vector.load %arg4[%c0_5, %c0_6] : memref<16x1024xf32, #tpu.memory_space<vmem>>, vector<16x1024xf32>
    %9 = arith.addf %7, %8 : vector<16x1024xf32>
    %cst = arith.constant 5.000000e-01 : f32
    %10 = vector.broadcast %cst : f32 to vector<16x1024xf32>
    %11 = arith.mulf %10, %9 : vector<16x1024xf32>
    %cst_7 = arith.constant 0.707106769 : f32
    %12 = vector.broadcast %cst_7 : f32 to vector<16x1024xf32>
    %13 = arith.mulf %9, %12 : vector<16x1024xf32>
    %cst_8 = arith.constant 0.000000e+00 : f32
    %14 = vector.broadcast %cst_8 : f32 to vector<16x1024xf32>
    %15 = arith.cmpf oge, %13, %14 : vector<16x1024xf32>
    %cst_9 = arith.constant 1.000000e+00 : f32
    %cst_10 = arith.constant -1.000000e+00 : f32
    %16 = vector.broadcast %cst_9 : f32 to vector<16x1024xf32>
    %17 = vector.broadcast %cst_10 : f32 to vector<16x1024xf32>
    %18 = arith.select %15, %16, %17 : vector<16x1024xi1>, vector<16x1024xf32>
    %19 = math.absf %13 : vector<16x1024xf32>
    %cst_11 = arith.constant 0.327591091 : f32
    %20 = vector.broadcast %cst_11 : f32 to vector<16x1024xf32>
    %21 = arith.mulf %20, %19 : vector<16x1024xf32>
    %cst_12 = arith.constant 1.000000e+00 : f32
    %22 = vector.broadcast %cst_12 : f32 to vector<16x1024xf32>
    %23 = arith.addf %22, %21 : vector<16x1024xf32>
    %cst_13 = arith.constant 1.000000e+00 : f32
    %24 = vector.broadcast %cst_13 : f32 to vector<16x1024xf32>
    %25 = arith.divf %24, %23 : vector<16x1024xf32>
    %cst_14 = arith.constant 1.06140542 : f32
    %26 = vector.broadcast %cst_14 : f32 to vector<16x1024xf32>
    %27 = arith.mulf %26, %25 : vector<16x1024xf32>
    %cst_15 = arith.constant -1.45315206 : f32
    %28 = vector.broadcast %cst_15 : f32 to vector<16x1024xf32>
    %29 = arith.addf %27, %28 : vector<16x1024xf32>
    %30 = arith.mulf %29, %25 : vector<16x1024xf32>
    %cst_16 = arith.constant 1.42141378 : f32
    %31 = vector.broadcast %cst_16 : f32 to vector<16x1024xf32>
    %32 = arith.addf %30, %31 : vector<16x1024xf32>
    %33 = arith.mulf %32, %25 : vector<16x1024xf32>
    %cst_17 = arith.constant -0.284496725 : f32
    %34 = vector.broadcast %cst_17 : f32 to vector<16x1024xf32>
    %35 = arith.addf %33, %34 : vector<16x1024xf32>
    %36 = arith.mulf %35, %25 : vector<16x1024xf32>
    %cst_18 = arith.constant 0.254829586 : f32
    %37 = vector.broadcast %cst_18 : f32 to vector<16x1024xf32>
    %38 = arith.addf %36, %37 : vector<16x1024xf32>
    %39 = arith.mulf %38, %25 : vector<16x1024xf32>
    %cst_19 = arith.constant 0.000000e+00 : f32
    %40 = vector.broadcast %cst_19 : f32 to vector<16x1024xf32>
    %41 = arith.subf %40, %19 : vector<16x1024xf32>
    %42 = arith.mulf %41, %19 : vector<16x1024xf32>
    %43 = math.exp %42 : vector<16x1024xf32>
    %44 = arith.mulf %39, %43 : vector<16x1024xf32>
    %cst_20 = arith.constant 1.000000e+00 : f32
    %45 = vector.broadcast %cst_20 : f32 to vector<16x1024xf32>
    %46 = arith.subf %45, %44 : vector<16x1024xf32>
    %47 = arith.mulf %18, %46 : vector<16x1024xf32>
    %cst_21 = arith.constant 1.000000e+00 : f32
    %48 = vector.broadcast %cst_21 : f32 to vector<16x1024xf32>
    %49 = arith.addf %48, %47 : vector<16x1024xf32>
    %50 = arith.mulf %11, %49 : vector<16x1024xf32>
    %c0_22 = arith.constant 0 : index
    %c0_23 = arith.constant 0 : index
    %51 = vector.load %arg5[%c0_22, %c0_23] : memref<16x1024xf32, #tpu.memory_space<vmem>>, vector<16x1024xf32>
    tpu.vector_store %arg5[%c0_22, %c0_23], %50 {strides = array<i32>} : memref<16x1024xf32, #tpu.memory_space<vmem>>, vector<16x1024xf32>,
    return
  }
  func.func @transform_0(%arg0: i32) -> (i32, i32) {
    %c0_i32 = arith.constant 0 : i32
    %c0_i32_0 = arith.constant 0 : i32
    return %arg0, %c0_i32 : i32, i32
  }
  func.func @transform_1(%arg0: i32) -> (i32, i32) {
    %c0_i32 = arith.constant 0 : i32
    %c0_i32_0 = arith.constant 0 : i32
    %c0_i32_1 = arith.constant 0 : i32
    return %c0_i32, %c0_i32_0 : i32, i32
  }
  func.func @transform_2(%arg0: i32) -> (i32, i32) {
    %c0_i32 = arith.constant 0 : i32
    %c0_i32_0 = arith.constant 0 : i32
    %c0_i32_1 = arith.constant 0 : i32
    return %c0_i32, %c0_i32_0 : i32, i32
  }
  func.func @transform_3(%arg0: i32) -> (i32, i32) {
    %c0_i32 = arith.constant 0 : i32
    %c0_i32_0 = arith.constant 0 : i32
    return %arg0, %c0_i32 : i32, i32
  }
  func.func @transform_4(%arg0: i32) -> (i32, i32) {
    %c0_i32 = arith.constant 0 : i32
    %c0_i32_0 = arith.constant 0 : i32
    return %arg0, %c0_i32 : i32, i32
  }
}

module attributes {stable_mosaic.version = 11 : i64} {
  func.func @_conv_bn_kernel(%arg0: i32, %arg1: i32, %arg2: memref<1x8x8x128xbf16, #tpu.memory_space<vmem>>, %arg3: memref<1x128xf32, #tpu.memory_space<vmem>>, %arg4: memref<1x128xf32, #tpu.memory_space<vmem>>, %arg5: memref<1152x128xbf16, #tpu.memory_space<vmem>>, %arg6: memref<1x128xf32, #tpu.memory_space<vmem>>, %arg7: memref<1x8x8x128xbf16, #tpu.memory_space<vmem>>, %arg8: memref<1x1x1x128xf32, #tpu.memory_space<vmem>>, %arg9: memref<1x1x1x128xf32, #tpu.memory_space<vmem>>) attributes {dimension_semantics = [#tpu.dimension_semantics<parallel>, #tpu.dimension_semantics<parallel>], iteration_bounds = array<i64: 2, 1>, scalar_prefetch = 0 : i64, scratch_operands = 0 : i64, tpu.core_type = #tpu.core_type<tc>, window_params = [{transform_indices = @transform_0, window_bounds = array<i64: 1, 8, 8, 128>}, {pipeline_mode = #tpu.pipeline_mode<synchronous>, transform_indices = @transform_1, window_bounds = array<i64: 1, 128>}, {pipeline_mode = #tpu.pipeline_mode<synchronous>, transform_indices = @transform_2, window_bounds = array<i64: 1, 128>}, {pipeline_mode = #tpu.pipeline_mode<synchronous>, transform_indices = @transform_3, window_bounds = array<i64: 1152, 128>}, {pipeline_mode = #tpu.pipeline_mode<synchronous>, transform_indices = @transform_4, window_bounds = array<i64: 1, 128>}, {transform_indices = @transform_5, window_bounds = array<i64: 1, 8, 8, 128>}, {transform_indices = @transform_6, window_bounds = array<i64: 1, 1, 1, 128>}, {transform_indices = @transform_7, window_bounds = array<i64: 1, 1, 1, 128>}]} {
    %c8_i32 = arith.constant 8 : i32
    %0 = arith.muli %arg1, %c8_i32 : i32
    %1 = tpu.assume_multiple %0, 8 : i32
    %c0 = arith.constant 0 : index
    %c0_0 = arith.constant 0 : index
    %c0_1 = arith.constant 0 : index
    %c0_2 = arith.constant 0 : index
    %2 = vector.load %arg2[%c0, %c0_0, %c0_1, %c0_2] : memref<1x8x8x128xbf16, #tpu.memory_space<vmem>>, vector<1x8x8x128xbf16>
    %3 = vector.shape_cast %2 : vector<1x8x8x128xbf16> to vector<8x8x128xbf16>
    %4 = arith.extf %3 : vector<8x8x128xbf16> to vector<8x8x128xf32>
    %c0_3 = arith.constant 0 : index
    %c0_4 = arith.constant 0 : index
    %5 = vector.load %arg3[%c0_3, %c0_4] : memref<1x128xf32, #tpu.memory_space<vmem>>, vector<1x128xf32>
    %6 = vector.shape_cast %5 : vector<1x128xf32> to vector<1x1x128xf32>
    %7 = vector.broadcast %6 : vector<1x1x128xf32> to vector<8x8x128xf32>
    %8 = arith.mulf %4, %7 : vector<8x8x128xf32>
    %c0_5 = arith.constant 0 : index
    %c0_6 = arith.constant 0 : index
    %9 = vector.load %arg4[%c0_5, %c0_6] : memref<1x128xf32, #tpu.memory_space<vmem>>, vector<1x128xf32>
    %10 = vector.shape_cast %9 : vector<1x128xf32> to vector<1x1x128xf32>
    %11 = vector.broadcast %10 : vector<1x1x128xf32> to vector<8x8x128xf32>
    %12 = arith.addf %8, %11 : vector<8x8x128xf32>
    %cst = arith.constant 5.000000e-01 : f32
    %13 = vector.broadcast %cst : f32 to vector<8x8x128xf32>
    %14 = arith.mulf %13, %12 : vector<8x8x128xf32>
    %cst_7 = arith.constant 0.707106769 : f32
    %15 = vector.broadcast %cst_7 : f32 to vector<8x8x128xf32>
    %16 = arith.mulf %12, %15 : vector<8x8x128xf32>
    %cst_8 = arith.constant 0.000000e+00 : f32
    %17 = vector.broadcast %cst_8 : f32 to vector<8x8x128xf32>
    %18 = arith.cmpf oge, %16, %17 : vector<8x8x128xf32>
    %cst_9 = arith.constant 1.000000e+00 : f32
    %cst_10 = arith.constant -1.000000e+00 : f32
    %19 = vector.broadcast %cst_9 : f32 to vector<8x8x128xf32>
    %20 = vector.broadcast %cst_10 : f32 to vector<8x8x128xf32>
    %21 = arith.select %18, %19, %20 : vector<8x8x128xi1>, vector<8x8x128xf32>
    %22 = math.absf %16 : vector<8x8x128xf32>
    %cst_11 = arith.constant 0.327591091 : f32
    %23 = vector.broadcast %cst_11 : f32 to vector<8x8x128xf32>
    %24 = arith.mulf %23, %22 : vector<8x8x128xf32>
    %cst_12 = arith.constant 1.000000e+00 : f32
    %25 = vector.broadcast %cst_12 : f32 to vector<8x8x128xf32>
    %26 = arith.addf %25, %24 : vector<8x8x128xf32>
    %cst_13 = arith.constant 1.000000e+00 : f32
    %27 = vector.broadcast %cst_13 : f32 to vector<8x8x128xf32>
    %28 = arith.divf %27, %26 : vector<8x8x128xf32>
    %cst_14 = arith.constant 1.06140542 : f32
    %29 = vector.broadcast %cst_14 : f32 to vector<8x8x128xf32>
    %30 = arith.mulf %29, %28 : vector<8x8x128xf32>
    %cst_15 = arith.constant -1.45315206 : f32
    %31 = vector.broadcast %cst_15 : f32 to vector<8x8x128xf32>
    %32 = arith.addf %30, %31 : vector<8x8x128xf32>
    %33 = arith.mulf %32, %28 : vector<8x8x128xf32>
    %cst_16 = arith.constant 1.42141378 : f32
    %34 = vector.broadcast %cst_16 : f32 to vector<8x8x128xf32>
    %35 = arith.addf %33, %34 : vector<8x8x128xf32>
    %36 = arith.mulf %35, %28 : vector<8x8x128xf32>
    %cst_17 = arith.constant -0.284496725 : f32
    %37 = vector.broadcast %cst_17 : f32 to vector<8x8x128xf32>
    %38 = arith.addf %36, %37 : vector<8x8x128xf32>
    %39 = arith.mulf %38, %28 : vector<8x8x128xf32>
    %cst_18 = arith.constant 0.254829586 : f32
    %40 = vector.broadcast %cst_18 : f32 to vector<8x8x128xf32>
    %41 = arith.addf %39, %40 : vector<8x8x128xf32>
    %42 = arith.mulf %41, %28 : vector<8x8x128xf32>
    %cst_19 = arith.constant 0.000000e+00 : f32
    %43 = vector.broadcast %cst_19 : f32 to vector<8x8x128xf32>
    %44 = arith.subf %43, %22 : vector<8x8x128xf32>
    %45 = arith.mulf %44, %22 : vector<8x8x128xf32>
    %46 = math.exp %45 : vector<8x8x128xf32>
    %47 = arith.mulf %42, %46 : vector<8x8x128xf32>
    %cst_20 = arith.constant 1.000000e+00 : f32
    %48 = vector.broadcast %cst_20 : f32 to vector<8x8x128xf32>
    %49 = arith.subf %48, %47 : vector<8x8x128xf32>
    %50 = arith.mulf %21, %49 : vector<8x8x128xf32>
    %cst_21 = arith.constant 1.000000e+00 : f32
    %51 = vector.broadcast %cst_21 : f32 to vector<8x8x128xf32>
    %52 = arith.addf %51, %50 : vector<8x8x128xf32>
    %53 = arith.mulf %14, %52 : vector<8x8x128xf32>
    %c1_i32 = arith.constant 1 : i32
    %54 = arith.subi %1, %c1_i32 : i32
    %c0_i32 = arith.constant 0 : i32
    %55 = arith.maxsi %54, %c0_i32 : i32
    %c0_22 = arith.constant 0 : index
    %56 = arith.index_cast %55 : i32 to index
    %c0_23 = arith.constant 0 : index
    %c0_24 = arith.constant 0 : index
    %57 = vector.load %arg2[%c0_22, %56, %c0_23, %c0_24] : memref<1x8x8x128xbf16, #tpu.memory_space<vmem>>, vector<1x1x8x128xbf16>
    %58 = vector.shape_cast %57 : vector<1x1x8x128xbf16> to vector<8x128xbf16>
    %59 = arith.extf %58 : vector<8x128xbf16> to vector<8x128xf32>
    %c0_25 = arith.constant 0 : index
    %c0_26 = arith.constant 0 : index
    %60 = vector.load %arg3[%c0_25, %c0_26] : memref<1x128xf32, #tpu.memory_space<vmem>>, vector<1x128xf32>
    %61 = vector.broadcast %60 : vector<1x128xf32> to vector<8x128xf32>
    %62 = arith.mulf %59, %61 : vector<8x128xf32>
    %c0_27 = arith.constant 0 : index
    %c0_28 = arith.constant 0 : index
    %63 = vector.load %arg4[%c0_27, %c0_28] : memref<1x128xf32, #tpu.memory_space<vmem>>, vector<1x128xf32>
    %64 = vector.broadcast %63 : vector<1x128xf32> to vector<8x128xf32>
    %65 = arith.addf %62, %64 : vector<8x128xf32>
    %cst_29 = arith.constant 5.000000e-01 : f32
    %66 = vector.broadcast %cst_29 : f32 to vector<8x128xf32>
    %67 = arith.mulf %66, %65 : vector<8x128xf32>
    %cst_30 = arith.constant 0.707106769 : f32
    %68 = vector.broadcast %cst_30 : f32 to vector<8x128xf32>
    %69 = arith.mulf %65, %68 : vector<8x128xf32>
    %cst_31 = arith.constant 0.000000e+00 : f32
    %70 = vector.broadcast %cst_31 : f32 to vector<8x128xf32>
    %71 = arith.cmpf oge, %69, %70 : vector<8x128xf32>
    %cst_32 = arith.constant 1.000000e+00 : f32
    %cst_33 = arith.constant -1.000000e+00 : f32
    %72 = vector.broadcast %cst_32 : f32 to vector<8x128xf32>
    %73 = vector.broadcast %cst_33 : f32 to vector<8x128xf32>
    %74 = arith.select %71, %72, %73 : vector<8x128xi1>, vector<8x128xf32>
    %75 = math.absf %69 : vector<8x128xf32>
    %cst_34 = arith.constant 0.327591091 : f32
    %76 = vector.broadcast %cst_34 : f32 to vector<8x128xf32>
    %77 = arith.mulf %76, %75 : vector<8x128xf32>
    %cst_35 = arith.constant 1.000000e+00 : f32
    %78 = vector.broadcast %cst_35 : f32 to vector<8x128xf32>
    %79 = arith.addf %78, %77 : vector<8x128xf32>
    %cst_36 = arith.constant 1.000000e+00 : f32
    %80 = vector.broadcast %cst_36 : f32 to vector<8x128xf32>
    %81 = arith.divf %80, %79 : vector<8x128xf32>
    %cst_37 = arith.constant 1.06140542 : f32
    %82 = vector.broadcast %cst_37 : f32 to vector<8x128xf32>
    %83 = arith.mulf %82, %81 : vector<8x128xf32>
    %cst_38 = arith.constant -1.45315206 : f32
    %84 = vector.broadcast %cst_38 : f32 to vector<8x128xf32>
    %85 = arith.addf %83, %84 : vector<8x128xf32>
    %86 = arith.mulf %85, %81 : vector<8x128xf32>
    %cst_39 = arith.constant 1.42141378 : f32
    %87 = vector.broadcast %cst_39 : f32 to vector<8x128xf32>
    %88 = arith.addf %86, %87 : vector<8x128xf32>
    %89 = arith.mulf %88, %81 : vector<8x128xf32>
    %cst_40 = arith.constant -0.284496725 : f32
    %90 = vector.broadcast %cst_40 : f32 to vector<8x128xf32>
    %91 = arith.addf %89, %90 : vector<8x128xf32>
    %92 = arith.mulf %91, %81 : vector<8x128xf32>
    %cst_41 = arith.constant 0.254829586 : f32
    %93 = vector.broadcast %cst_41 : f32 to vector<8x128xf32>
    %94 = arith.addf %92, %93 : vector<8x128xf32>
    %95 = arith.mulf %94, %81 : vector<8x128xf32>
    %cst_42 = arith.constant 0.000000e+00 : f32
    %96 = vector.broadcast %cst_42 : f32 to vector<8x128xf32>
    %97 = arith.subf %96, %75 : vector<8x128xf32>
    %98 = arith.mulf %97, %75 : vector<8x128xf32>
    %99 = math.exp %98 : vector<8x128xf32>
    %100 = arith.mulf %95, %99 : vector<8x128xf32>
    %cst_43 = arith.constant 1.000000e+00 : f32
    %101 = vector.broadcast %cst_43 : f32 to vector<8x128xf32>
    %102 = arith.subf %101, %100 : vector<8x128xf32>
    %103 = arith.mulf %74, %102 : vector<8x128xf32>
    %cst_44 = arith.constant 1.000000e+00 : f32
    %104 = vector.broadcast %cst_44 : f32 to vector<8x128xf32>
    %105 = arith.addf %104, %103 : vector<8x128xf32>
    %106 = arith.mulf %67, %105 : vector<8x128xf32>
    %c8_i32_45 = arith.constant 8 : i32
    %107 = arith.addi %1, %c8_i32_45 : i32
    %c7_i32 = arith.constant 7 : i32
    %108 = arith.minsi %107, %c7_i32 : i32
    %c0_46 = arith.constant 0 : index
    %109 = arith.index_cast %108 : i32 to index
    %c0_47 = arith.constant 0 : index
    %c0_48 = arith.constant 0 : index
    %110 = vector.load %arg2[%c0_46, %109, %c0_47, %c0_48] : memref<1x8x8x128xbf16, #tpu.memory_space<vmem>>, vector<1x1x8x128xbf16>
    %111 = vector.shape_cast %110 : vector<1x1x8x128xbf16> to vector<8x128xbf16>
    %112 = arith.extf %111 : vector<8x128xbf16> to vector<8x128xf32>
    %c0_49 = arith.constant 0 : index
    %c0_50 = arith.constant 0 : index
    %113 = vector.load %arg3[%c0_49, %c0_50] : memref<1x128xf32, #tpu.memory_space<vmem>>, vector<1x128xf32>
    %114 = vector.broadcast %113 : vector<1x128xf32> to vector<8x128xf32>
    %115 = arith.mulf %112, %114 : vector<8x128xf32>
    %c0_51 = arith.constant 0 : index
    %c0_52 = arith.constant 0 : index
    %116 = vector.load %arg4[%c0_51, %c0_52] : memref<1x128xf32, #tpu.memory_space<vmem>>, vector<1x128xf32>
    %117 = vector.broadcast %116 : vector<1x128xf32> to vector<8x128xf32>
    %118 = arith.addf %115, %117 : vector<8x128xf32>
    %cst_53 = arith.constant 5.000000e-01 : f32
    %119 = vector.broadcast %cst_53 : f32 to vector<8x128xf32>
    %120 = arith.mulf %119, %118 : vector<8x128xf32>
    %cst_54 = arith.constant 0.707106769 : f32
    %121 = vector.broadcast %cst_54 : f32 to vector<8x128xf32>
    %122 = arith.mulf %118, %121 : vector<8x128xf32>
    %cst_55 = arith.constant 0.000000e+00 : f32
    %123 = vector.broadcast %cst_55 : f32 to vector<8x128xf32>
    %124 = arith.cmpf oge, %122, %123 : vector<8x128xf32>
    %cst_56 = arith.constant 1.000000e+00 : f32
    %cst_57 = arith.constant -1.000000e+00 : f32
    %125 = vector.broadcast %cst_56 : f32 to vector<8x128xf32>
    %126 = vector.broadcast %cst_57 : f32 to vector<8x128xf32>
    %127 = arith.select %124, %125, %126 : vector<8x128xi1>, vector<8x128xf32>
    %128 = math.absf %122 : vector<8x128xf32>
    %cst_58 = arith.constant 0.327591091 : f32
    %129 = vector.broadcast %cst_58 : f32 to vector<8x128xf32>
    %130 = arith.mulf %129, %128 : vector<8x128xf32>
    %cst_59 = arith.constant 1.000000e+00 : f32
    %131 = vector.broadcast %cst_59 : f32 to vector<8x128xf32>
    %132 = arith.addf %131, %130 : vector<8x128xf32>
    %cst_60 = arith.constant 1.000000e+00 : f32
    %133 = vector.broadcast %cst_60 : f32 to vector<8x128xf32>
    %134 = arith.divf %133, %132 : vector<8x128xf32>
    %cst_61 = arith.constant 1.06140542 : f32
    %135 = vector.broadcast %cst_61 : f32 to vector<8x128xf32>
    %136 = arith.mulf %135, %134 : vector<8x128xf32>
    %cst_62 = arith.constant -1.45315206 : f32
    %137 = vector.broadcast %cst_62 : f32 to vector<8x128xf32>
    %138 = arith.addf %136, %137 : vector<8x128xf32>
    %139 = arith.mulf %138, %134 : vector<8x128xf32>
    %cst_63 = arith.constant 1.42141378 : f32
    %140 = vector.broadcast %cst_63 : f32 to vector<8x128xf32>
    %141 = arith.addf %139, %140 : vector<8x128xf32>
    %142 = arith.mulf %141, %134 : vector<8x128xf32>
    %cst_64 = arith.constant -0.284496725 : f32
    %143 = vector.broadcast %cst_64 : f32 to vector<8x128xf32>
    %144 = arith.addf %142, %143 : vector<8x128xf32>
    %145 = arith.mulf %144, %134 : vector<8x128xf32>
    %cst_65 = arith.constant 0.254829586 : f32
    %146 = vector.broadcast %cst_65 : f32 to vector<8x128xf32>
    %147 = arith.addf %145, %146 : vector<8x128xf32>
    %148 = arith.mulf %147, %134 : vector<8x128xf32>
    %cst_66 = arith.constant 0.000000e+00 : f32
    %149 = vector.broadcast %cst_66 : f32 to vector<8x128xf32>
    %150 = arith.subf %149, %128 : vector<8x128xf32>
    %151 = arith.mulf %150, %128 : vector<8x128xf32>
    %152 = math.exp %151 : vector<8x128xf32>
    %153 = arith.mulf %148, %152 : vector<8x128xf32>
    %cst_67 = arith.constant 1.000000e+00 : f32
    %154 = vector.broadcast %cst_67 : f32 to vector<8x128xf32>
    %155 = arith.subf %154, %153 : vector<8x128xf32>
    %156 = arith.mulf %127, %155 : vector<8x128xf32>
    %cst_68 = arith.constant 1.000000e+00 : f32
    %157 = vector.broadcast %cst_68 : f32 to vector<8x128xf32>
    %158 = arith.addf %157, %156 : vector<8x128xf32>
    %159 = arith.mulf %120, %158 : vector<8x128xf32>
    %c0_i32_69 = arith.constant 0 : i32
    %160 = arith.cmpi sgt, %1, %c0_i32_69 : i32
    %161 = arith.extui %160 : i1 to i32
    %162 = arith.sitofp %161 : i32 to f32
    %163 = vector.broadcast %162 : f32 to vector<8x128xf32>
    %164 = arith.mulf %106, %163 : vector<8x128xf32>
    %c8_i32_70 = arith.constant 8 : i32
    %165 = arith.addi %1, %c8_i32_70 : i32
    %c8_i32_71 = arith.constant 8 : i32
    %166 = arith.cmpi slt, %165, %c8_i32_71 : i32
    %167 = arith.extui %166 : i1 to i32
    %168 = arith.sitofp %167 : i32 to f32
    %169 = vector.broadcast %168 : f32 to vector<8x128xf32>
    %170 = arith.mulf %159, %169 : vector<8x128xf32>
    %171 = vector.shape_cast %164 : vector<8x128xf32> to vector<1x8x128xf32>
    %172 = arith.truncf %171 : vector<1x8x128xf32> to vector<1x8x128xbf16>
    %173 = arith.truncf %53 : vector<8x8x128xf32> to vector<8x8x128xbf16>
    %174 = vector.shape_cast %170 : vector<8x128xf32> to vector<1x8x128xf32>
    %175 = arith.truncf %174 : vector<1x8x128xf32> to vector<1x8x128xbf16>
    %176 = tpu.concatenate %172, %173, %175 in 0 : vector<1x8x128xbf16>, vector<8x8x128xbf16>, vector<1x8x128xbf16> -> vector<10x8x128xbf16>
    %cst_72 = arith.constant 0.000000e+00 : bf16
    %177 = vector.broadcast %cst_72 : bf16 to vector<10x1x128xbf16>
    %178 = tpu.concatenate %177, %176, %177 in 1 : vector<10x1x128xbf16>, vector<10x8x128xbf16>, vector<10x1x128xbf16> -> vector<10x10x128xbf16>
    %179 = vector.extract_strided_slice %178 {offsets = [0, 0, 0], sizes = [8, 8, 128], strides = [1, 1, 1]} : vector<10x10x128xbf16> to vector<8x8x128xbf16>
    %180 = vector.shape_cast %179 : vector<8x8x128xbf16> to vector<64x128xbf16>
    %181 = vector.extract_strided_slice %178 {offsets = [0, 1, 0], sizes = [8, 8, 128], strides = [1, 1, 1]} : vector<10x10x128xbf16> to vector<8x8x128xbf16>
    %182 = vector.shape_cast %181 : vector<8x8x128xbf16> to vector<64x128xbf16>
    %183 = vector.extract_strided_slice %178 {offsets = [0, 2, 0], sizes = [8, 8, 128], strides = [1, 1, 1]} : vector<10x10x128xbf16> to vector<8x8x128xbf16>
    %184 = vector.shape_cast %183 : vector<8x8x128xbf16> to vector<64x128xbf16>
    %185 = vector.extract_strided_slice %178 {offsets = [1, 0, 0], sizes = [8, 8, 128], strides = [1, 1, 1]} : vector<10x10x128xbf16> to vector<8x8x128xbf16>
    %186 = vector.shape_cast %185 : vector<8x8x128xbf16> to vector<64x128xbf16>
    %187 = vector.extract_strided_slice %178 {offsets = [1, 1, 0], sizes = [8, 8, 128], strides = [1, 1, 1]} : vector<10x10x128xbf16> to vector<8x8x128xbf16>
    %188 = vector.shape_cast %187 : vector<8x8x128xbf16> to vector<64x128xbf16>
    %189 = vector.extract_strided_slice %178 {offsets = [1, 2, 0], sizes = [8, 8, 128], strides = [1, 1, 1]} : vector<10x10x128xbf16> to vector<8x8x128xbf16>
    %190 = vector.shape_cast %189 : vector<8x8x128xbf16> to vector<64x128xbf16>
    %191 = vector.extract_strided_slice %178 {offsets = [2, 0, 0], sizes = [8, 8, 128], strides = [1, 1, 1]} : vector<10x10x128xbf16> to vector<8x8x128xbf16>
    %192 = vector.shape_cast %191 : vector<8x8x128xbf16> to vector<64x128xbf16>
    %193 = vector.extract_strided_slice %178 {offsets = [2, 1, 0], sizes = [8, 8, 128], strides = [1, 1, 1]} : vector<10x10x128xbf16> to vector<8x8x128xbf16>
    %194 = vector.shape_cast %193 : vector<8x8x128xbf16> to vector<64x128xbf16>
    %195 = vector.extract_strided_slice %178 {offsets = [2, 2, 0], sizes = [8, 8, 128], strides = [1, 1, 1]} : vector<10x10x128xbf16> to vector<8x8x128xbf16>
    %196 = vector.shape_cast %195 : vector<8x8x128xbf16> to vector<64x128xbf16>
    %197 = tpu.concatenate %180, %182, %184, %186, %188, %190, %192, %194, %196 in 1 : vector<64x128xbf16>, vector<64x128xbf16>, vector<64x128xbf16>, vector<64x128xbf16>, vector<64x128xbf16>, vector<64x128xbf16>, vector<64x128xbf16>, vector<64x128xbf16>, vector<64x128xbf16> -> vector<64x1152xbf16>
    %c0_73 = arith.constant 0 : index
    %c0_74 = arith.constant 0 : index
    %198 = vector.load %arg5[%c0_73, %c0_74] : memref<1152x128xbf16, #tpu.memory_space<vmem>>, vector<1152x128xbf16>
    %cst_75 = arith.constant dense<0.000000e+00> : vector<64x128xf32>
    %199 = tpu.matmul %197, %198, %cst_75 {dimension_numbers = #tpu.dot_dimension_numbers<[1], [0], [0], [1], [0, 0, 1, 1], [], []>} : vector<64x1152xbf16>, vector<1152x128xbf16>, vector<64x128xf32> -> vector<64x128xf32>
    %c0_76 = arith.constant 0 : index
    %c0_77 = arith.constant 0 : index
    %200 = vector.load %arg6[%c0_76, %c0_77] : memref<1x128xf32, #tpu.memory_space<vmem>>, vector<1x128xf32>
    %201 = vector.broadcast %200 : vector<1x128xf32> to vector<64x128xf32>
    %202 = arith.addf %199, %201 : vector<64x128xf32>
    %203 = vector.shape_cast %202 : vector<64x128xf32> to vector<8x8x128xf32>
    %204 = arith.truncf %203 : vector<8x8x128xf32> to vector<8x8x128xbf16>
    %c0_78 = arith.constant 0 : index
    %c0_79 = arith.constant 0 : index
    %c0_80 = arith.constant 0 : index
    %c0_81 = arith.constant 0 : index
    %205 = vector.load %arg7[%c0_78, %c0_79, %c0_80, %c0_81] : memref<1x8x8x128xbf16, #tpu.memory_space<vmem>>, vector<1x8x8x128xbf16>
    %206 = vector.shape_cast %205 : vector<1x8x8x128xbf16> to vector<8x8x128xbf16>
    %207 = vector.shape_cast %204 : vector<8x8x128xbf16> to vector<1x8x8x128xbf16>
    tpu.vector_store %arg7[%c0_78, %c0_79, %c0_80, %c0_81], %207 {strides = array<i32>} : memref<1x8x8x128xbf16, #tpu.memory_space<vmem>>, vector<1x8x8x128xbf16>,
    %cst_82 = arith.constant dense<0.000000e+00> : vector<128xf32>
    %208 = vector.multi_reduction <add>, %202, %cst_82 [0] : vector<64x128xf32> to vector<128xf32>
    %209 = vector.shape_cast %208 : vector<128xf32> to vector<1x128xf32>
    %c0_83 = arith.constant 0 : index
    %c0_84 = arith.constant 0 : index
    %c0_85 = arith.constant 0 : index
    %c0_86 = arith.constant 0 : index
    %210 = vector.load %arg8[%c0_83, %c0_84, %c0_85, %c0_86] : memref<1x1x1x128xf32, #tpu.memory_space<vmem>>, vector<1x1x1x128xf32>
    %211 = vector.shape_cast %210 : vector<1x1x1x128xf32> to vector<1x128xf32>
    %212 = vector.shape_cast %209 : vector<1x128xf32> to vector<1x1x1x128xf32>
    tpu.vector_store %arg8[%c0_83, %c0_84, %c0_85, %c0_86], %212 {strides = array<i32>} : memref<1x1x1x128xf32, #tpu.memory_space<vmem>>, vector<1x1x1x128xf32>,
    %213 = arith.mulf %202, %202 : vector<64x128xf32>
    %cst_87 = arith.constant dense<0.000000e+00> : vector<128xf32>
    %214 = vector.multi_reduction <add>, %213, %cst_87 [0] : vector<64x128xf32> to vector<128xf32>
    %215 = vector.shape_cast %214 : vector<128xf32> to vector<1x128xf32>
    %c0_88 = arith.constant 0 : index
    %c0_89 = arith.constant 0 : index
    %c0_90 = arith.constant 0 : index
    %c0_91 = arith.constant 0 : index
    %216 = vector.load %arg9[%c0_88, %c0_89, %c0_90, %c0_91] : memref<1x1x1x128xf32, #tpu.memory_space<vmem>>, vector<1x1x1x128xf32>
    %217 = vector.shape_cast %216 : vector<1x1x1x128xf32> to vector<1x128xf32>
    %218 = vector.shape_cast %215 : vector<1x128xf32> to vector<1x1x1x128xf32>
    tpu.vector_store %arg9[%c0_88, %c0_89, %c0_90, %c0_91], %218 {strides = array<i32>} : memref<1x1x1x128xf32, #tpu.memory_space<vmem>>, vector<1x1x1x128xf32>,
    return
  }
  func.func @transform_0(%arg0: i32, %arg1: i32) -> (i32, i32, i32, i32) {
    %c0_i32 = arith.constant 0 : i32
    %c0_i32_0 = arith.constant 0 : i32
    %c0_i32_1 = arith.constant 0 : i32
    %c0_i32_2 = arith.constant 0 : i32
    return %arg0, %c0_i32, %c0_i32_0, %c0_i32_1 : i32, i32, i32, i32
  }
  func.func @transform_1(%arg0: i32, %arg1: i32) -> (i32, i32) {
    %c0_i32 = arith.constant 0 : i32
    %c0_i32_0 = arith.constant 0 : i32
    %c0_i32_1 = arith.constant 0 : i32
    return %c0_i32, %c0_i32_0 : i32, i32
  }
  func.func @transform_2(%arg0: i32, %arg1: i32) -> (i32, i32) {
    %c0_i32 = arith.constant 0 : i32
    %c0_i32_0 = arith.constant 0 : i32
    %c0_i32_1 = arith.constant 0 : i32
    return %c0_i32, %c0_i32_0 : i32, i32
  }
  func.func @transform_3(%arg0: i32, %arg1: i32) -> (i32, i32) {
    %c0_i32 = arith.constant 0 : i32
    %c0_i32_0 = arith.constant 0 : i32
    %c0_i32_1 = arith.constant 0 : i32
    return %c0_i32, %c0_i32_0 : i32, i32
  }
  func.func @transform_4(%arg0: i32, %arg1: i32) -> (i32, i32) {
    %c0_i32 = arith.constant 0 : i32
    %c0_i32_0 = arith.constant 0 : i32
    %c0_i32_1 = arith.constant 0 : i32
    return %c0_i32, %c0_i32_0 : i32, i32
  }
  func.func @transform_5(%arg0: i32, %arg1: i32) -> (i32, i32, i32, i32) {
    %c0_i32 = arith.constant 0 : i32
    %c0_i32_0 = arith.constant 0 : i32
    %c0_i32_1 = arith.constant 0 : i32
    return %arg0, %arg1, %c0_i32, %c0_i32_0 : i32, i32, i32, i32
  }
  func.func @transform_6(%arg0: i32, %arg1: i32) -> (i32, i32, i32, i32) {
    %c0_i32 = arith.constant 0 : i32
    %c0_i32_0 = arith.constant 0 : i32
    %c0_i32_1 = arith.constant 0 : i32
    return %arg0, %arg1, %c0_i32, %c0_i32_0 : i32, i32, i32, i32
  }
  func.func @transform_7(%arg0: i32, %arg1: i32) -> (i32, i32, i32, i32) {
    %c0_i32 = arith.constant 0 : i32
    %c0_i32_0 = arith.constant 0 : i32
    %c0_i32_1 = arith.constant 0 : i32
    return %arg0, %arg1, %c0_i32, %c0_i32_0 : i32, i32, i32, i32
  }
}

</mosaic_0001>

<bundles_post_ra>
// kernel: tile.28
= control target key start
LH: loop header
LB: loop body
LE: loop exit
PB: predicated region body
PF: predicated region fallthrough
CT: control target
= control target key end

     0   :  { %s22_s0 = inlined_call_operand.vmem [shape: f32[16], index: 0, kind: input, shape index: {}]   ;;  %s23_s1 = inlined_call_operand.vmem [shape: f32[8,16], index: 1, kind: output, shape index: {}]  }
   0x1   :  { %v4_v0 = vld [vmem:[%s22_s0] ss:$0 sm:$0xff] }
   0x2   :  { %5 = vst [vmem:[%s23_s1] sm:$0xff] %v4_v0 }

// kernel: tile.29
= control target key start
LH: loop header
LB: loop body
LE: loop exit
PB: predicated region body
PF: predicated region fallthrough
CT: control target
= control target key end

     0   :  { %s67_s10 = smov 112   ;;  %s68_s11 = smov 80   ;;  %vm3_vm0 = vcmask 130048   ;;  %vm9_vm1 = vcmask 1048448   ;;  %vm15_vm2 = vcmask 917248   ;;  %vm21_vm3 = vcmask 786048   ;;  %s111_s0 = inlined_call_operand.vmem [shape: f32[8,16], index: 0, kind: input, shape index: {}]   ;;  %s112_s1 = inlined_call_operand.vmem [shape: f32[1,128], index: 1, kind: output, shape index: {}]  }
   0x1   :  { %v53_v0 = vld [vmem:[%s111_s0 + $0x7] sm:$0x1]   ;;  %v55_v1 = vld [vmem:[%s111_s0 + $0x5] sm:$0x1]   ;;  %v57_v2 = vld [vmem:[%s111_s0 + $0x3] sm:$0x1]  }
   0x2   :  { %7 = vrot.lane.b32.xlu0 %v53_v0, %s67_s10  ;;  %19 = vrot.lane.b32.xlu1 %v55_v1, %s68_s11  ;;  %s69_s14 = smov 48   ;;  %v54_v3 = vld [vmem:[%s111_s0 + $0x6] sm:$0x1]   ;;  %v56_v4 = vld [vmem:[%s111_s0 + $0x4] sm:$0x1]   ;;  %s70_s21 = smov 96  }
   0x3   :  { %31 = vrot.lane.b32.xlu2 %v57_v2, %s69_s14  ;;  %v58_v5 = vld [vmem:[%s111_s0 + $0x2] sm:$0x1]   ;;  %s71_s22 = smov 64   ;;  %s72_s23 = smov 32   ;;  %v59_v6 = vld [vmem:[%s111_s0 + $0x1] sm:$0x1]  }
   0x4   :  { %s73_s26 = smov 16   ;;  %v2_v7 = vld [vmem:[%s111_s0] sm:$0x1]   ;;  %vm27_vm4 = vcmask 654848   ;;  %vm33_vm5 = vcmask 523648   ;;  %vm39_vm6 = vcmask 392448  }
   0x5   :  { %4 = vst.msk [vmem:[#allocation0] sm:$0x1] %vm3_vm0, %v2_v7   ;;  %vm45_vm7 = vcmask 261248  }
   0xa   :  { %13 = vrot.lane.b32.xlu0 %v54_v3, %s70_s21  ;;  %25 = vrot.lane.b32.xlu1 %v56_v4, %s71_s22 }
   0xb   :  { %37 = vrot.lane.b32.xlu2 %v58_v5, %s72_s23 }
  0x12   :  { %43 = vrot.lane.b32.xlu0 %v59_v6, %s73_s26 }
  0x5d   :  { %v32_v8 = vpop.permute.xlu2 %31  }
  0x65   :  { %v38_v9 = vpop.permute.xlu2 %37  }
  0x74   :  { %v8_v10 = vpop.permute.xlu0 %7   ;;  %v20_v11 = vpop.permute.xlu1 %19  }
  0x75   :  { %10 = vst.msk [vmem:[#allocation0] sm:$0x1] %vm9_vm1, %v8_v10  }
  0x7c   :  { %v14_v12 = vpop.permute.xlu0 %13   ;;  %v26_v13 = vpop.permute.xlu1 %25  }
  0x7d   :  { %16 = vst.msk [vmem:[#allocation0] sm:$0x1] %vm15_vm2, %v14_v12  }
  0x7e   :  { %22 = vst.msk [vmem:[#allocation0] sm:$0x1] %vm21_vm3, %v20_v11  }
  0x7f   :  { %28 = vst.msk [vmem:[#allocation0] sm:$0x1] %vm27_vm4, %v26_v13  }
  0x80   :  { %34 = vst.msk [vmem:[#allocation0] sm:$0x1] %vm33_vm5, %v32_v8  }
  0x81   :  { %40 = vst.msk [vmem:[#allocation0] sm:$0x1] %vm39_vm6, %v38_v9  }
  0x84   :  { %v44_v14 = vpop.permute.xlu0 %43  }
  0x85   :  { %46 = vst.msk [vmem:[#allocation0] sm:$0x1] %vm45_vm7, %v44_v14  }
  0x8c   :  { %v49_v15 = vld [vmem:[#allocation0] sm:$0x1] }
  0x8d   :  { %52 = vst [vmem:[%s112_s1] sm:$0x1] %v49_v15 }

// kernel: tile.38
= control target key start
LH: loop header
LB: loop body
LE: loop exit
PB: predicated region body
PF: predicated region fallthrough
CT: control target
= control target key end

     0   :  { %s64_s0 = inlined_call_operand.vmem [shape: f32[16], index: 0, kind: input, shape index: {}]   ;;  %s65_s1 = inlined_call_operand.vmem [shape: f32[64,16], index: 1, kind: output, shape index: {}]  }
   0x1   :  { %v4_v0 = vld [vmem:[%s64_s0] ss:$0 sm:$0xff] }
   0x2   :  { %5 = vst [vmem:[%s65_s1] sm:$0xff] %v4_v0 }
   0x3   :  { %20 = vst [vmem:[%s65_s1 + $0x8] sm:$0xff] %v4_v0 }
   0x4   :  { %21 = vst [vmem:[%s65_s1 + $0x10] sm:$0xff] %v4_v0 }
   0x5   :  { %22 = vst [vmem:[%s65_s1 + $0x18] sm:$0xff] %v4_v0 }
   0x6   :  { %23 = vst [vmem:[%s65_s1 + $0x20] sm:$0xff] %v4_v0 }
   0x7   :  { %24 = vst [vmem:[%s65_s1 + $0x28] sm:$0xff] %v4_v0 }
   0x8   :  { %25 = vst [vmem:[%s65_s1 + $0x30] sm:$0xff] %v4_v0 }
   0x9   :  { %26 = vst [vmem:[%s65_s1 + $0x38] sm:$0xff] %v4_v0 }

// kernel: tile.39
= control target key start
LH: loop header
LB: loop body
LE: loop exit
PB: predicated region body
PF: predicated region fallthrough
CT: control target
= control target key end

     0   :  { %vm4_vm0 = vcmask 1047556   ;;  %s162_s14 = smov 112   ;;  %s163_s15 = smov 80   ;;  %vm6_vm1 = vcmask 130048   ;;  %vm17_vm2 = vcmask 1048448   ;;  %vm28_vm3 = vcmask 917248   ;;  %s259_s0 = inlined_call_operand.vmem [shape: f32[64,16], index: 0, kind: input, shape index: {}]   ;;  %s260_s1 = inlined_call_operand.vmem [shape: f32[1,1024], index: 1, kind: output, shape index: {}]  }
   0x1   :  { %v134_v0 = vld [vmem:[%s259_s0 + $0x7] ss:$8 sm:$0xf]   ;;  %v138_v2 = vld [vmem:[%s259_s0 + $0x5] ss:$8 sm:$0xf]  }
   0x2   :  { %v135_v1 = vld [vmem:[%s259_s0 + $0x7] ss:$8 sm:$0xf0]   ;;  %v139_v4 = vld [vmem:[%s259_s0 + $0x5] ss:$8 sm:$0xf0]  }
   0x3   :  { %v14_v3 = vsel %vm4_vm0, %v135_v1, %v134_v0  ;;  %v36_v5 = vsel %vm4_vm0, %v139_v4, %v138_v2  ;;  %v136_v6 = vld [vmem:[%s259_s0 + $0x6] ss:$8 sm:$0xf]   ;;  %v140_v8 = vld [vmem:[%s259_s0 + $0x4] ss:$8 sm:$0xf]  }
   0x4   :  { %15 = vrot.lane.b32.xlu0 %v14_v3, %s162_s14  ;;  %37 = vrot.lane.b32.xlu1 %v36_v5, %s163_s15  ;;  %v137_v7 = vld [vmem:[%s259_s0 + $0x6] ss:$8 sm:$0xf0]   ;;  %v141_v9 = vld [vmem:[%s259_s0 + $0x4] ss:$8 sm:$0xf0]  }
   0x5   :  { %v142_v10 = vld [vmem:[%s259_s0 + $0x3] ss:$8 sm:$0xf]   ;;  %v25_v12 = vsel %vm4_vm0, %v137_v7, %v136_v6  ;;  %v47_v14 = vsel %vm4_vm0, %v141_v9, %v140_v8  ;;  %s164_s28 = smov 48   ;;  %s165_s29 = smov 96   ;;  %vm39_vm4 = vcmask 786048  }
   0x6   :  { %v143_v11 = vld [vmem:[%s259_s0 + $0x3] ss:$8 sm:$0xf0]   ;;  %v144_v15 = vld [vmem:[%s259_s0 + $0x2] ss:$8 sm:$0xf]  }
   0x7   :  { %v58_v13 = vsel %vm4_vm0, %v143_v11, %v142_v10  ;;  %v145_v16 = vld [vmem:[%s259_s0 + $0x2] ss:$8 sm:$0xf0]   ;;  %s166_s5 = smov 64   ;;  %s167_s10 = smov 32   ;;  %vm50_vm5 = vcmask 654848  }
   0x8   :  { %59 = vrot.lane.b32.xlu2 %v58_v13, %s164_s28  ;;  %v146_v17 = vld [vmem:[%s259_s0 + $0x1] ss:$8 sm:$0xf]   ;;  %v69_v19 = vsel %vm4_vm0, %v145_v16, %v144_v15  ;;  %s168_s11 = smov 16   ;;  %vm61_vm6 = vcmask 523648   ;;  %vm72_vm7 = vcmask 392448  }
   0x9   :  { %v147_v18 = vld [vmem:[%s259_s0 + $0x1] ss:$8 sm:$0xf0]   ;;  %v2_v21 = vld [vmem:[%s259_s0] ss:$8 sm:$0xf]  }
   0xa   :  { %v80_v20 = vsel %vm4_vm0, %v147_v18, %v146_v17  ;;  %v3_v22 = vld [vmem:[%s259_s0] ss:$8 sm:$0xf0]   ;;  %vm83_vm8 = vcmask 261248  }
   0xb   :  { %v5_v23 = vsel %vm4_vm0, %v3_v22, %v2_v21 }
   0xc   :  { %26 = vrot.lane.b32.xlu0 %v25_v12, %s165_s29  ;;  %48 = vrot.lane.b32.xlu1 %v47_v14, %s166_s5  ;;  %7 = vst.msk [vmem:[#allocation0] ss:$8 sm:$0xf] %vm6_vm1, %v5_v23  }
   0xd   :  { %8 = vst.msk [vmem:[#allocation0] ss:$8 sm:$0xf0] %vm6_vm1, %v5_v23  }
  0x10   :  { %70 = vrot.lane.b32.xlu2 %v69_v19, %s167_s10 }
  0x14   :  { %81 = vrot.lane.b32.xlu0 %v80_v20, %s168_s11 }
  0x62   :  { %v60_v24 = vpop.permute.xlu2 %59  }
  0x6a   :  { %v71_v25 = vpop.permute.xlu2 %70  }
  0x76   :  { %v16_v26 = vpop.permute.xlu0 %15   ;;  %v38_v27 = vpop.permute.xlu1 %37  }
  0x77   :  { %18 = vst.msk [vmem:[#allocation0] ss:$8 sm:$0xf] %vm17_vm2, %v16_v26  }
  0x78   :  { %19 = vst.msk [vmem:[#allocation0] ss:$8 sm:$0xf0] %vm17_vm2, %v16_v26  }
  0x7e   :  { %v27_v28 = vpop.permute.xlu0 %26   ;;  %v49_v29 = vpop.permute.xlu1 %48  }
  0x7f   :  { %29 = vst.msk [vmem:[#allocation0] ss:$8 sm:$0xf] %vm28_vm3, %v27_v28  }
  0x80   :  { %30 = vst.msk [vmem:[#allocation0] ss:$8 sm:$0xf0] %vm28_vm3, %v27_v28  }
  0x81   :  { %40 = vst.msk [vmem:[#allocation0] ss:$8 sm:$0xf] %vm39_vm4, %v38_v27  }
  0x82   :  { %41 = vst.msk [vmem:[#allocation0] ss:$8 sm:$0xf0] %vm39_vm4, %v38_v27  }
  0x83   :  { %51 = vst.msk [vmem:[#allocation0] ss:$8 sm:$0xf] %vm50_vm5, %v49_v29  }
  0x84   :  { %52 = vst.msk [vmem:[#allocation0] ss:$8 sm:$0xf0] %vm50_vm5, %v49_v29  }
  0x85   :  { %62 = vst.msk [vmem:[#allocation0] ss:$8 sm:$0xf] %vm61_vm6, %v60_v24  }
  0x86   :  { %63 = vst.msk [vmem:[#allocation0] ss:$8 sm:$0xf0] %vm61_vm6, %v60_v24   ;;  %v82_v30 = vpop.permute.xlu0 %81  }
  0x87   :  { %73 = vst.msk [vmem:[#allocation0] ss:$8 sm:$0xf] %vm72_vm7, %v71_v25  }
  0x88   :  { %74 = vst.msk [vmem:[#allocation0] ss:$8 sm:$0xf0] %vm72_vm7, %v71_v25  }
  0x89   :  { %84 = vst.msk [vmem:[#allocation0] ss:$8 sm:$0xf] %vm83_vm8, %v82_v30  }
  0x8a   :  { %85 = vst.msk [vmem:[#allocation0] ss:$8 sm:$0xf0] %vm83_vm8, %v82_v30  }
  0x90   :  { %v88_v31 = vld [vmem:[#allocation0] sm:$0x1]  ;;  %v93_v32 = vld [vmem:[#allocation0 + $0x8] sm:$0x1]  ;;  %v99_v33 = vld [vmem:[#allocation0 + $0x10] sm:$0x1] }
  0x91   :  { %91 = vst [vmem:[%s260_s1] sm:$0x1] %v88_v31  ;;  %v105_v34 = vld [vmem:[#allocation0 + $0x18] sm:$0x1]  ;;  %v111_v35 = vld [vmem:[#allocation0 + $0x20] sm:$0x1] }
  0x92   :  { %148 = vst [vmem:[%s260_s1 + $0x1] sm:$0x1] %v93_v32  ;;  %v117_v36 = vld [vmem:[#allocation0 + $0x28] sm:$0x1]  ;;  %v123_v37 = vld [vmem:[#allocation0 + $0x30] sm:$0x1] }
  0x93   :  { %149 = vst [vmem:[%s260_s1 + $0x2] sm:$0x1] %v99_v33  ;;  %v129_v38 = vld [vmem:[#allocation0 + $0x38] sm:$0x1] }
  0x94   :  { %150 = vst [vmem:[%s260_s1 + $0x3] sm:$0x1] %v105_v34 }
  0x95   :  { %151 = vst [vmem:[%s260_s1 + $0x4] sm:$0x1] %v111_v35 }
  0x96   :  { %152 = vst [vmem:[%s260_s1 + $0x5] sm:$0x1] %v117_v36 }
  0x97   :  { %153 = vst [vmem:[%s260_s1 + $0x6] sm:$0x1] %v123_v37 }
  0x98   :  { %154 = vst [vmem:[%s260_s1 + $0x7] sm:$0x1] %v129_v38 }

// kernel: transformer_block3d_forward.5
= control target key start
LH: loop header
LB: loop body
LE: loop exit
PB: predicated region body
PF: predicated region fallthrough
CT: control target
= control target key end

     0   :  { %s1710_s0 = inlined_call_operand.vmem [shape: bf16[16,1024], index: 0, kind: input, shape index: {}]   ;;  %s1711_s1 = inlined_call_operand.vmem [shape: f32[1,1024], index: 1, kind: input, shape index: {}]   ;;  %s1712_s2 = inlined_call_operand.vmem [shape: f32[1,1024], index: 2, kind: input, shape index: {}]   ;;  %s1713_s3 = inlined_call_operand.vmem [shape: f32[16,1024], index: 3, kind: input, shape index: {}]   ;;  %s1714_s4 = inlined_call_operand.vmem [shape: f32[16,1024], index: 4, kind: output, shape index: {}]  }
   0x1   :  { %v17_v0 = vld [vmem:[%s1710_s0] sm:$0xff]  ;;  %v18_v7 = vld [vmem:[%s1710_s0 + $0x8] sm:$0xff]  ;;  %v19_v20 = vld [vmem:[%s1710_s0 + $0x10] sm:$0xff] }
   0x2   :  { %v898_v1 = vld [vmem:[%s1711_s1] sm:$0xff]  ;;  %v25_v3 = vunpack.c.l.bf16 %v17_v0  ;;  %v26_v6 = vunpack.c.h.bf16 %v17_v0  ;;  %v27_v10 = vunpack.c.l.bf16 %v18_v7  ;;  %v28_v14 = vunpack.c.h.bf16 %v18_v7  ;;  %v110_v22 = vld [vmem:[%s1713_s3 + $0x8] sm:$0xff]  ;;  %v111_v23 = vld [vmem:[%s1713_s3 + $0x10] sm:$0xff] }
   0x3   :  { %v903_v2 = vld [vmem:[%s1712_s2] sm:$0xff]  ;;  %v43_v4 = vperm.slane %v898_v1, 0  ;;  %v44_v8 = vperm.slane %v898_v1, 1  ;;  %v45_v11 = vperm.slane %v898_v1, 2  ;;  %v46_v15 = vperm.slane %v898_v1, 3  ;;  %v112_v27 = vld [vmem:[%s1713_s3 + $0x18] sm:$0xff] }
   0x4   :  { %v77_v5 = vperm.slane %v903_v2, 0  ;;  %v78_v9 = vperm.slane %v903_v2, 1  ;;  %v79_v13 = vperm.slane %v903_v2, 2  ;;  %v109_v16 = vld [vmem:[%s1713_s3] sm:$0xff]  ;;  %v80_v19 = vperm.slane %v903_v2, 3  ;;  %v975_v50 = vld [vmem:[%s1710_s0 + $0x18] sm:$0xff] }
   0x5   :  { %v59_v12 = vmul.f32 %v43_v4, %v25_v3  ;;  %v60_v17 = vmul.f32 %v44_v8, %v26_v6  ;;  %v61_v18 = vmul.f32 %v45_v11, %v27_v10  ;;  %v62_v24 = vmul.f32 %v46_v15, %v28_v14  ;;  %v113_v60 = vld [vmem:[%s1713_s3 + $0x20] sm:$0xff]  ;;  %v114_v0 = vld [vmem:[%s1713_s3 + $0x28] sm:$0xff] }
   0x6   :  { %v29_v30 = vunpack.c.l.bf16 %v19_v20  ;;  %v47_v31 = vperm.slane %v898_v1, 4  ;;  %v30_v34 = vunpack.c.h.bf16 %v19_v20  ;;  %v48_v35 = vperm.slane %v898_v1, 5 }
   0x7   :  { %v93_v21 = vadd.f32 %v77_v5, %v59_v12  ;;  %v94_v25 = vadd.f32 %v78_v9, %v60_v17  ;;  %v95_v26 = vadd.f32 %v79_v13, %v61_v18  ;;  %v96_v29 = vadd.f32 %v80_v19, %v62_v24 }
   0x8   :  { %v63_v42 = vmul.f32 %v47_v31, %v29_v30  ;;  %v81_v43 = vperm.slane %v903_v2, 4  ;;  %v64_v46 = vmul.f32 %v48_v35, %v30_v34  ;;  %v1715_v47 = vperm.slane %v903_v2, 5 }
   0x9   :  { %v125_v28 = vadd.f32 %v109_v16, %v93_v21  ;;  %v948_v32 = vadd.f32 %v110_v22, %v94_v25  ;;  %v950_v33 = vadd.f32 %v111_v23, %v95_v26  ;;  %v953_v37 = vadd.f32 %v112_v27, %v96_v29 }
   0xa   :  { %v97_v57 = vadd.f32 %v81_v43, %v63_v42  ;;  %v98_v61 = vadd.f32 %v1715_v47, %v64_v46  ;;  %v31_v62 = vunpack.c.l.bf16 %v975_v50  ;;  %v1716_v3 = vperm.slane %v898_v1, 6 }
   0xb   :  { %v157_v36 = vmul.f32 0.70710677, %v125_v28  ;;  %v956_v38 = vmul.f32 0.70710677, %v948_v32  ;;  %v959_v39 = vmul.f32 0.70710677, %v950_v33 }
   0xc   :  { %v962_v41 = vmul.f32 0.70710677, %v953_v37  ;;  %v990_v63 = vmul.f32 0.5, %v125_v28  ;;  %v1002_v17 = vadd.f32 %v113_v60, %v97_v57  ;;  %v866_v18 = vmov -1.0  }
   0xd   :  { %v205_v40 = vand.u32 2147483647, %v157_v36  ;;  %v206_v44 = vand.u32 2147483647, %v956_v38  ;;  %v207_v45 = vand.u32 2147483647, %v959_v39  ;;  %v1008_v23 = vadd.f32 %v114_v0, %v98_v61 }
   0xe   :  { %v208_v53 = vand.u32 2147483647, %v962_v41  ;;  %vm173_vm0 = vcmp.ge.f32.partialorder %v157_v36, 0.0  ;;  %v1014_v26 = vmul.f32 %v1716_v3, %v31_v62  ;;  %vm174_vm7 = vcmp.ge.f32.partialorder %v956_v38, 0.0 }
   0xf   :  { %v221_v48 = vmul.f32 0.3275911, %v205_v40  ;;  %v637_v49 = vsub.f32 0.0, %v205_v40  ;;  %v222_v51 = vmul.f32 0.3275911, %v206_v44  ;;  %v638_v56 = vsub.f32 0.0, %v206_v44 }
  0x10   :  { %v223_v52 = vmul.f32 0.3275911, %v207_v45  ;;  %v639_v59 = vsub.f32 0.0, %v207_v45  ;;  %v224_v10 = vmul.f32 0.3275911, %v208_v53  ;;  %v1005_v20 = vsel %vm173_vm0, 1.0, %v866_v18 }
  0x11   :  { %v978_v54 = vadd.f32 1.0, %v221_v48  ;;  %v653_v55 = vmul.f32 %v637_v49, %v205_v40  ;;  %v982_v58 = vadd.f32 1.0, %v222_v51  ;;  %v654_v16 = vmul.f32 %v638_v56, %v206_v44 }
  0x12   :  { %v999_v7 = vadd.f32 1.0, %v223_v52  ;;  %v655_v22 = vmul.f32 %v639_v59, %v207_v45  ;;  %v640_v25 = vsub.f32 0.0, %v208_v53  ;;  %v1022_v28 = vadd.f32 1.0, %v224_v10 }
  0x13   :  { %802 = vrcp.f32 %v978_v54  ;;  %v262_v6 = vand.u32 2147483647, %v978_v54  ;;  %v264_v12 = vand.u32 2147483648, %v978_v54  ;;  %v669_v14 = vmul.f32 1.442695, %v653_v55 }
  0x14   :  { %804 = vrcp.f32 %v982_v58  ;;  %v277_v21 = vand.u32 2147483647, %v982_v58  ;;  %vm258_vm1 = vweird.f32 %v978_v54  ;;  %v279_v24 = vand.u32 2147483648, %v982_v58 }
  0x15   :  { %vm1016_vm2 = vcmp.eq.f32.partialorder %v262_v6, 8.507059e+37  ;;  %vm273_vm3 = vweird.f32 %v982_v58  ;;  %806 = vrcp.f32 %v999_v7  ;;  %v265_v30 = vor.u32 1.1754944e-38, %v264_v12 }
  0x16   :  { %808 = vpow2.f32 %v669_v14  ;;  %v671_v34 = vmul.f32 1.442695, %v654_v16  ;;  %v292_v36 = vand.u32 2147483647, %v999_v7  ;;  %vm1026_vm4 = vcmp.eq.f32.partialorder %v277_v21, 8.507059e+37 }
  0x17   :  { %v294_v45 = vand.u32 2147483648, %v999_v7  ;;  %v673_v46 = vmul.f32 1.442695, %v655_v22  ;;  %v280_v49 = vor.u32 1.1754944e-38, %v279_v24  ;;  %vm288_vm5 = vweird.f32 %v999_v7 }
  0x18   :  { %810 = vrcp.f32 %v1022_v28  ;;  %vm175_vm8 = vcmp.ge.f32.partialorder %v959_v39, 0.0  ;;  %vm1036_vm10 = vcmp.eq.f32.partialorder %v292_v36, 8.507059e+37  ;;  %v656_v60 = vmul.f32 %v640_v25, %v208_v53 }
  0x19   :  { %v803_v29 = vpop.eup %802  ;;  %812 = vpow2.f32 %v671_v34  ;;  %v295_v59 = vor.u32 1.1754944e-38, %v294_v45  ;;  %v1049_v39 = vsel %vm174_vm7, 1.0, %v866_v18  ;;  %v1052_v0 = vsel %vm175_vm8, 1.0, %v866_v18 }
  0x1a   :  { %v805_v40 = vpop.eup %804  ;;  %v254_v42 = vmul.f32 %v803_v29, %v978_v54  ;;  %vm259_vm6 = vweird.f32 %v803_v29  ;;  %814 = vpow2.f32 %v673_v46  ;;  %vm303_vm13 = vweird.f32 %v1022_v28 }
  0x1b   :  { %v269_v48 = vmul.f32 %v805_v40, %v982_v58  ;;  %vm274_vm9 = vweird.f32 %v805_v40  ;;  %v807_v56 = vpop.eup %806  ;;  %vm1044_vm11 = vmor %vm258_vm1, %vm259_vm6  ;;  %v307_v54 = vand.u32 2147483647, %v1022_v28  ;;  %v1065_v12 = vmul.f32 0.70710677, %v1002_v17 }
  0x1c   :  { %v255_v51 = vsub.f32 1.0, %v254_v42  ;;  %v1040_v61 = vpop.eup %808  ;;  %v284_v6 = vmul.f32 %v807_v56, %v999_v7  ;;  %vm1058_vm12 = vmor %vm273_vm3, %vm274_vm9  ;;  %vm289_vm14 = vweird.f32 %v807_v56  ;;  %v1068_v22 = vmul.f32 0.70710677, %v1008_v23 }
  0x1d   :  { %v270_v52 = vsub.f32 1.0, %v269_v48  ;;  %v309_v25 = vand.u32 2147483648, %v1022_v28  ;;  %v1075_v34 = vand.u32 2147483647, %v1065_v12  ;;  %v675_v48 = vmul.f32 1.442695, %v656_v60  ;;  %vm1094_vm15 = vmor %vm288_vm5, %vm289_vm14 }
  0x1e   :  { %v256_v57 = vmul.f32 %v803_v29, %v255_v51  ;;  %v811_v14 = vpop.eup %810  ;;  %v285_v21 = vsub.f32 1.0, %v284_v6  ;;  %v1101_v38 = vand.u32 2147483647, %v1068_v22  ;;  %v1104_v44 = vmul.f32 0.5, %v948_v32 }
  0x1f   :  { %v271_v62 = vmul.f32 %v805_v40, %v270_v52  ;;  %v299_v24 = vmul.f32 %v811_v14, %v1022_v28  ;;  %v1077_v36 = vpop.eup %812  ;;  %vm304_vm0 = vweird.f32 %v811_v14  ;;  %v225_v60 = vmul.f32 0.3275911, %v1075_v34 }
  0x20   :  { %v257_v10 = vadd.f32 %v803_v29, %v256_v57  ;;  %v286_v46 = vmul.f32 %v807_v56, %v285_v21  ;;  %v1085_v51 = vpop.eup %814  ;;  %vm176_vm1 = vcmp.ge.f32.partialorder %v962_v41, 0.0  ;;  %v310_v53 = vor.u32 1.1754944e-38, %v309_v25 }
  0x21   :  { %v272_v16 = vadd.f32 %v805_v40, %v271_v62  ;;  %v300_v27 = vsub.f32 1.0, %v299_v24  ;;  %vm308_vm3 = vcmp.eq.f32.partialorder %v307_v54, 8.507059e+37  ;;  %v226_v28 = vmul.f32 0.3275911, %v1101_v38 }
  0x22   :  { %v261_v58 = vsel %vm1044_vm11, %v803_v29, %v257_v10  ;;  %v1129_v25 = vsel %vm176_vm1, 1.0, %v866_v18 }
  0x23   :  { %v1081_v42 = vsel %vm1016_vm2, %v265_v30, %v261_v58  ;;  %v276_v45 = vsel %vm1058_vm12, %v805_v40, %v272_v16  ;;  %v287_v40 = vadd.f32 %v807_v56, %v286_v46  ;;  %v301_v7 = vmul.f32 %v811_v14, %v300_v27  ;;  %vm1111_vm2 = vmor %vm303_vm13, %vm304_vm0 }
  0x24   :  { %v493_v29 = vmul.f32 1.0614054, %v1081_v42  ;;  %v1090_v52 = vsel %vm1026_vm4, %v280_v49, %v276_v45  ;;  %v241_v16 = vadd.f32 1.0, %v225_v60  ;;  %v1124_v46 = vmul.f32 0.5, %v950_v33 }
  0x25   :  { %v494_v30 = vmul.f32 1.0614054, %v1090_v52  ;;  %v291_v6 = vsel %vm1094_vm15, %v807_v56, %v287_v40  ;;  %v302_v58 = vadd.f32 %v811_v14, %v301_v7  ;;  %v1137_v27 = vmul.f32 0.5, %v953_v37 }
  0x26   :  { %v509_v62 = vadd.f32 -1.4531521, %v493_v29  ;;  %v1118_v32 = vsel %vm1036_vm10, %v295_v59, %v291_v6  ;;  %816 = vrcp.f32 %v241_v16  ;;  %v242_v60 = vadd.f32 1.0, %v226_v28 }
  0x27   :  { %v510_v49 = vadd.f32 -1.4531521, %v494_v30  ;;  %v495_v56 = vmul.f32 1.0614054, %v1118_v32  ;;  %v306_v55 = vsel %vm1111_vm2, %v811_v14, %v302_v58  ;;  %818 = vpow2.f32 %v675_v48 }
  0x28   :  { %v525_v21 = vmul.f32 %v509_v62, %v1081_v42  ;;  %v1133_v29 = vsel %vm308_vm3, %v310_v53, %v306_v55  ;;  %v83_v30 = vperm.slane %v903_v2, 6  ;;  %v641_v14 = vsub.f32 0.0, %v1075_v34 }
  0x29   :  { %v526_v24 = vmul.f32 %v510_v49, %v1090_v52  ;;  %v511_v54 = vadd.f32 -1.4531521, %v495_v56  ;;  %v496_v33 = vmul.f32 1.0614054, %v1133_v29  ;;  %v322_v49 = vand.u32 2147483647, %v241_v16 }
  0x2a   :  { %v541_v45 = vadd.f32 1.4214138, %v525_v21  ;;  %v32_v48 = vunpack.c.h.bf16 %v975_v50  ;;  %v324_v53 = vand.u32 2147483648, %v241_v16  ;;  %820 = vrcp.f32 %v242_v60 }
  0x2b   :  { %v542_v59 = vadd.f32 1.4214138, %v526_v24  ;;  %v527_v40 = vmul.f32 %v511_v54, %v1118_v32  ;;  %v512_v7 = vadd.f32 -1.4531521, %v496_v33  ;;  %v642_v56 = vsub.f32 0.0, %v1101_v38 }
  0x2c   :  { %v557_v57 = vmul.f32 %v541_v45, %v1081_v42  ;;  %v817_v6 = vpop.eup %816  ;;  %vm318_vm4 = vweird.f32 %v241_v16  ;;  %vm1151_vm6 = vcmp.eq.f32.partialorder %v322_v49, 8.507059e+37  ;;  %vm333_vm7 = vweird.f32 %v242_v60 }
  0x2d   :  { %v558_v41 = vmul.f32 %v542_v59, %v1090_v52  ;;  %v543_v37 = vadd.f32 1.4214138, %v527_v40  ;;  %v528_v58 = vmul.f32 %v512_v7, %v1133_v29  ;;  %v314_v24 = vmul.f32 %v817_v6, %v241_v16  ;;  %v819_v45 = vpop.eup %818 }
  0x2e   :  { %v573_v62 = vadd.f32 -0.28449672, %v557_v57  ;;  %v657_v59 = vmul.f32 %v641_v14, %v1075_v34  ;;  %vm319_vm5 = vweird.f32 %v817_v6  ;;  %v325_v7 = vor.u32 1.1754944e-38, %v324_v53 }
  0x2f   :  { %v574_v10 = vadd.f32 -0.28449672, %v558_v41  ;;  %v559_v55 = vmul.f32 %v543_v37, %v1118_v32  ;;  %v544_v57 = vadd.f32 1.4214138, %v528_v58  ;;  %v315_v33 = vsub.f32 1.0, %v314_v24  ;;  %vm1160_vm8 = vmor %vm318_vm4, %vm319_vm5 }
  0x30   :  { %v589_v21 = vmul.f32 %v573_v62, %v1081_v42  ;;  %v821_v37 = vpop.eup %820  ;;  %v337_v49 = vand.u32 2147483647, %v242_v60  ;;  %v339_v58 = vand.u32 2147483648, %v242_v60  ;;  %vm177_vm12 = vcmp.ge.f32.partialorder %v1065_v12, 0.0 }
  0x31   :  { %v590_v28 = vmul.f32 %v574_v10, %v1090_v52  ;;  %v575_v40 = vadd.f32 -0.28449672, %v559_v55  ;;  %v560_v10 = vmul.f32 %v544_v57, %v1133_v29  ;;  %v316_v3 = vmul.f32 %v817_v6, %v315_v33 }
  0x32   :  { %v605_v54 = vadd.f32 0.2548296, %v589_v21  ;;  %vm334_vm9 = vweird.f32 %v821_v37  ;;  %vm1180_vm10 = vcmp.eq.f32.partialorder %v337_v49, 8.507059e+37  ;;  %v340_v62 = vor.u32 1.1754944e-38, %v339_v58 }
  0x33   :  { %v606_v41 = vadd.f32 0.2548296, %v590_v28  ;;  %v591_v14 = vmul.f32 %v575_v40, %v1118_v32  ;;  %v576_v24 = vadd.f32 -0.28449672, %v560_v10  ;;  %v329_v28 = vmul.f32 %v821_v37, %v242_v60  ;;  %vm1190_vm11 = vmor %vm333_vm7, %vm334_vm9 }
  0x34   :  { %v621_v47 = vmul.f32 %v605_v54, %v1081_v42  ;;  %v317_v42 = vadd.f32 %v817_v6, %v316_v3  ;;  %vm178_vm13 = vcmp.ge.f32.partialorder %v1068_v22, 0.0 }
  0x35   :  { %v622_v34 = vmul.f32 %v606_v41, %v1090_v52  ;;  %v607_v54 = vadd.f32 0.2548296, %v591_v14  ;;  %v99_v52 = vadd.f32 %v83_v30, %v1014_v26  ;;  %v592_v57 = vmul.f32 %v576_v24, %v1133_v29 }
  0x36   :  { %v701_v53 = vmul.f32 %v1040_v61, %v621_v47  ;;  %v321_v33 = vsel %vm1160_vm8, %v817_v6, %v317_v42  ;;  %v330_v41 = vsub.f32 1.0, %v329_v28  ;;  %v115_v47 = vld [vmem:[%s1713_s3 + $0x30] sm:$0xff] }
  0x37   :  { %v702_v55 = vmul.f32 %v1077_v36, %v622_v34  ;;  %v623_v61 = vmul.f32 %v607_v54, %v1118_v32  ;;  %v1178_v36 = vsel %vm1151_vm6, %v325_v7, %v321_v33  ;;  %v608_v10 = vadd.f32 0.2548296, %v592_v57  ;;  %v21_v33 = vld [vmem:[%s1710_s0 + $0x20] sm:$0xff] }
  0x38   :  { %v717_v16 = vsub.f32 1.0, %v701_v53  ;;  %v497_v6 = vmul.f32 1.0614054, %v1178_v36  ;;  %v331_v34 = vmul.f32 %v821_v37, %v330_v41  ;;  %v1194_v7 = vadd.f32 %v115_v47, %v99_v52  ;;  %v117_v32 = vld [vmem:[%s1713_s3 + $0x40] sm:$0xff] }
  0x39   :  { %v718_v3 = vsub.f32 1.0, %v702_v55  ;;  %v703_v21 = vmul.f32 %v1085_v51, %v623_v61  ;;  %v50_v51 = vperm.slane %v898_v1, 7  ;;  %v84_v47 = vperm.slane %v903_v2, 7 }
  0x3a   :  { %v733_v40 = vmul.f32 %v717_v16, %v1005_v20  ;;  %v624_v20 = vmul.f32 %v608_v10, %v1133_v29  ;;  %v513_v53 = vadd.f32 -1.4531521, %v497_v6  ;;  %v332_v24 = vadd.f32 %v821_v37, %v331_v34 }
  0x3b   :  { %v734_v14 = vmul.f32 %v718_v3, %v1049_v39  ;;  %v719_v28 = vsub.f32 1.0, %v703_v21  ;;  %v1198_v39 = vmul.f32 0.70710677, %v1194_v7  ;;  %v677_v16 = vmul.f32 1.442695, %v657_v59 }
  0x3c   :  { %v749_v49 = vadd.f32 1.0, %v733_v40  ;;  %v704_v55 = vmul.f32 %v819_v45, %v624_v20  ;;  %v529_v54 = vmul.f32 %v513_v53, %v1178_v36  ;;  %v336_v58 = vsel %vm1190_vm11, %v821_v37, %v332_v24 }
  0x3d   :  { %v750_v42 = vadd.f32 1.0, %v734_v14  ;;  %v735_v29 = vmul.f32 %v719_v28, %v1052_v0  ;;  %v1209_v57 = vsel %vm1180_vm10, %v340_v62, %v336_v58  ;;  %v658_v0 = vmul.f32 %v642_v56, %v1101_v38  ;;  %v116_v56 = vld [vmem:[%s1713_s3 + $0x38] sm:$0xff] }
  0x3e   :  { %v765_v60 = vmul.f32 %v749_v49, %v990_v63  ;;  %v720_v63 = vsub.f32 1.0, %v704_v55  ;;  %v545_v45 = vadd.f32 1.4214138, %v529_v54  ;;  %v498_v37 = vmul.f32 1.0614054, %v1209_v57 }
  0x3f   :  { %v766_v52 = vmul.f32 %v750_v42, %v1104_v44  ;;  %v751_v44 = vadd.f32 1.0, %v735_v29  ;;  %v1225_v59 = vand.u32 2147483647, %v1198_v39  ;;  %v66_v41 = vmul.f32 %v50_v51, %v32_v48 }
  0x40   :  { %781 = vst [vmem:[%s1714_s4] sm:$0xff] %v765_v60  ;;  %v736_v3 = vmul.f32 %v720_v63, %v1129_v25  ;;  %v561_v61 = vmul.f32 %v545_v45, %v1178_v36  ;;  %v514_v38 = vadd.f32 -1.4531521, %v498_v37  ;;  %v33_v26 = vunpack.c.l.bf16 %v21_v33 }
  0x41   :  { %782 = vst [vmem:[%s1714_s4 + $0x8] sm:$0xff] %v766_v52  ;;  %v767_v40 = vmul.f32 %v751_v44, %v1124_v46  ;;  %822 = vpow2.f32 %v677_v16  ;;  %v227_v50 = vmul.f32 0.3275911, %v1225_v59  ;;  %v100_v48 = vadd.f32 %v84_v47, %v66_v41  ;;  %v118_v41 = vld [vmem:[%s1713_s3 + $0x48] sm:$0xff] }
  0x42   :  { %v752_v10 = vadd.f32 1.0, %v736_v3  ;;  %v577_v6 = vadd.f32 -0.28449672, %v561_v61  ;;  %v530_v25 = vmul.f32 %v514_v38, %v1209_v57  ;;  %v67_v34 = vmul.f32 %v43_v4, %v33_v26 }
  0x43   :  { %783 = vst [vmem:[%s1714_s4 + $0x10] sm:$0xff] %v767_v40  ;;  %v679_v14 = vmul.f32 1.442695, %v658_v0  ;;  %v1247_v21 = vadd.f32 1.0, %v227_v50  ;;  %v1249_v46 = vadd.f32 %v116_v56, %v100_v48  ;;  %v34_v62 = vunpack.c.h.bf16 %v21_v33  ;;  %v1298_v48 = vld [vmem:[%s1710_s0 + $0x28] sm:$0xff] }
  0x44   :  { %v768_v49 = vmul.f32 %v752_v10, %v1137_v27  ;;  %v593_v20 = vmul.f32 %v577_v6, %v1178_v36  ;;  %v546_v53 = vadd.f32 1.4214138, %v530_v25  ;;  %v101_v4 = vadd.f32 %v77_v5, %v67_v34 }
  0x45   :  { %824 = vrcp.f32 %v1247_v21  ;;  %v1267_v27 = vmul.f32 0.70710677, %v1249_v46  ;;  %v68_v5 = vmul.f32 %v44_v8, %v34_v62  ;;  %v145_v52 = vmul.f32 0.5, %v1002_v17 }
  0x46   :  { %784 = vst [vmem:[%s1714_s4 + $0x18] sm:$0xff] %v768_v49  ;;  %v609_v24 = vadd.f32 0.2548296, %v593_v20  ;;  %v562_v42 = vmul.f32 %v546_v53, %v1209_v57  ;;  %v1263_v28 = vadd.f32 %v117_v32, %v101_v4  ;;  %826 = vpow2.f32 %v679_v14 }
  0x47   :  { %v823_v60 = vpop.eup %822  ;;  %v212_v29 = vand.u32 2147483647, %v1267_v27  ;;  %v193_v16 = vsel %vm177_vm12, 1.0, %v866_v18  ;;  %v643_v8 = vsub.f32 0.0, %v1225_v59  ;;  %v102_v37 = vadd.f32 %v78_v9, %v68_v5 }
  0x48   :  { %v625_v55 = vmul.f32 %v609_v24, %v1178_v36  ;;  %v578_v54 = vadd.f32 -0.28449672, %v562_v42  ;;  %v1273_v58 = vmul.f32 0.70710677, %v1263_v28  ;;  %vm348_vm14 = vweird.f32 %v1247_v21 }
  0x49   :  { %v228_v36 = vmul.f32 0.3275911, %v212_v29  ;;  %v352_v61 = vand.u32 2147483647, %v1247_v21  ;;  %v354_v38 = vand.u32 2147483648, %v1247_v21  ;;  %v194_v10 = vsel %vm178_vm13, 1.0, %v866_v18 }
  0x4a   :  { %v705_v12 = vmul.f32 %v823_v60, %v625_v55  ;;  %v594_v33 = vmul.f32 %v578_v54, %v1209_v57  ;;  %v1280_v63 = vand.u32 2147483647, %v1273_v58  ;;  %v659_v6 = vmul.f32 %v643_v8, %v1225_v59 }
  0x4b   :  { %v825_v45 = vpop.eup %824  ;;  %v244_v56 = vadd.f32 1.0, %v228_v36  ;;  %v1304_v25 = vadd.f32 %v118_v41, %v102_v37  ;;  %vm179_vm0 = vcmp.ge.f32.partialorder %v1198_v39, 0.0  ;;  %v355_v62 = vor.u32 1.1754944e-38, %v354_v38 }
  0x4c   :  { %v721_v17 = vsub.f32 1.0, %v705_v12  ;;  %v610_v0 = vadd.f32 0.2548296, %v594_v33  ;;  %v344_v44 = vmul.f32 %v825_v45, %v1247_v21  ;;  %v827_v3 = vpop.eup %826  ;;  %v229_v26 = vmul.f32 0.3275911, %v1280_v63 }
  0x4d   :  { %vm349_vm15 = vweird.f32 %v825_v45  ;;  %828 = vrcp.f32 %v244_v56  ;;  %v644_v49 = vsub.f32 0.0, %v212_v29  ;;  %v35_v59 = vunpack.c.l.bf16 %v1298_v48 }
  0x4e   :  { %v737_v40 = vmul.f32 %v721_v17, %v193_v16  ;;  %v626_v9 = vmul.f32 %v610_v0, %v1209_v57  ;;  %v345_v50 = vsub.f32 1.0, %v344_v44  ;;  %vm1309_vm1 = vmor %vm348_vm14, %vm349_vm15  ;;  %v1313_v22 = vadd.f32 1.0, %v229_v26 }
  0x4f   :  { %vm353_vm2 = vcmp.eq.f32.partialorder %v352_v61, 8.507059e+37  ;;  %v146_v24 = vmul.f32 0.5, %v1008_v23  ;;  %v1318_v42 = vmul.f32 0.5, %v1194_v7  ;;  %v681_v21 = vmul.f32 1.442695, %v659_v6 }
  0x50   :  { %v753_v34 = vadd.f32 1.0, %v737_v40  ;;  %v706_v14 = vmul.f32 %v827_v3, %v626_v9  ;;  %v346_v57 = vmul.f32 %v825_v45, %v345_v50  ;;  %v1321_v60 = vmul.f32 0.70710677, %v1304_v25  ;;  %v119_v50 = vld [vmem:[%s1713_s3 + $0x50] sm:$0xff] }
  0x51   :  { %v1329_v55 = vsel %vm179_vm0, 1.0, %v866_v18  ;;  %830 = vrcp.f32 %v1313_v22  ;;  %v660_v16 = vmul.f32 %v644_v49, %v212_v29  ;;  %v69_v12 = vmul.f32 %v45_v11, %v35_v59 }
  0x52   :  { %v769_v20 = vmul.f32 %v753_v34, %v145_v52  ;;  %v722_v53 = vsub.f32 1.0, %v706_v14  ;;  %v347_v4 = vadd.f32 %v825_v45, %v346_v57  ;;  %v367_v52 = vand.u32 2147483647, %v244_v56  ;;  %v1371_v34 = vld [vmem:[%s1710_s0 + $0x30] sm:$0xff] }
  0x53   :  { %v829_v7 = vpop.eup %828  ;;  %v369_v39 = vand.u32 2147483648, %v244_v56  ;;  %832 = vpow2.f32 %v681_v21  ;;  %vm363_vm3 = vweird.f32 %v244_v56  ;;  %v1340_v37 = vand.u32 2147483647, %v1321_v60 }
  0x54   :  { %785 = vst [vmem:[%s1714_s4 + $0x20] sm:$0xff] %v769_v20  ;;  %v738_v5 = vmul.f32 %v722_v53, %v194_v10  ;;  %v351_v23 = vsel %vm1309_vm1, %v825_v45, %v347_v4  ;;  %v359_v36 = vmul.f32 %v829_v7, %v244_v56  ;;  %v36_v45 = vunpack.c.h.bf16 %v1298_v48 }
  0x55   :  { %v1334_v54 = vsel %vm353_vm2, %v355_v62, %v351_v23  ;;  %vm364_vm4 = vweird.f32 %v829_v7  ;;  %v683_v29 = vmul.f32 1.442695, %v660_v16  ;;  %v645_v41 = vsub.f32 0.0, %v1280_v63  ;;  %v120_v16 = vld [vmem:[%s1713_s3 + $0x58] sm:$0xff] }
  0x56   :  { %v754_v33 = vadd.f32 1.0, %v738_v5  ;;  %v499_v8 = vmul.f32 1.0614054, %v1334_v54  ;;  %v360_v44 = vsub.f32 1.0, %v359_v36  ;;  %v230_v11 = vmul.f32 0.3275911, %v1340_v37  ;;  %vm1359_vm6 = vmor %vm363_vm3, %vm364_vm4 }
  0x57   :  { %v103_v3 = vadd.f32 %v79_v13, %v69_v12  ;;  %v831_v61 = vpop.eup %830  ;;  %vm1351_vm5 = vcmp.eq.f32.partialorder %v367_v52, 8.507059e+37  ;;  %v370_v9 = vor.u32 1.1754944e-38, %v369_v39  ;;  %vm378_vm7 = vweird.f32 %v1313_v22 }
  0x58   :  { %v770_v17 = vmul.f32 %v754_v33, %v146_v24  ;;  %v515_v0 = vadd.f32 -1.4531521, %v499_v8  ;;  %v361_v26 = vmul.f32 %v829_v7, %v360_v44  ;;  %v374_v48 = vmul.f32 %v831_v61, %v1313_v22 }
  0x59   :  { %v382_v10 = vand.u32 2147483647, %v1313_v22  ;;  %v1366_v6 = vadd.f32 1.0, %v230_v11  ;;  %v384_v56 = vand.u32 2147483648, %v1313_v22  ;;  %v70_v32 = vmul.f32 %v46_v15, %v36_v45  ;;  %v833_v62 = vpop.eup %832 }
  0x5a   :  { %786 = vst [vmem:[%s1714_s4 + $0x28] sm:$0xff] %v770_v17  ;;  %v531_v38 = vmul.f32 %v515_v0, %v1334_v54  ;;  %v362_v57 = vadd.f32 %v829_v7, %v361_v26  ;;  %v375_v49 = vsub.f32 1.0, %v374_v48  ;;  %vm379_vm8 = vweird.f32 %v831_v61 }
  0x5b   :  { %834 = vrcp.f32 %v1366_v6  ;;  %v1377_v59 = vadd.f32 %v119_v50, %v103_v3  ;;  %v661_v4 = vmul.f32 %v645_v41, %v1280_v63  ;;  %v37_v24 = vunpack.c.l.bf16 %v1371_v34  ;;  %vm1395_vm10 = vmor %vm378_vm7, %vm379_vm8 }
  0x5c   :  { %v547_v14 = vadd.f32 1.4214138, %v531_v38  ;;  %v366_v53 = vsel %vm1359_vm6, %v829_v7, %v362_v57  ;;  %v1385_v21 = vmul.f32 0.5, %v1249_v46  ;;  %836 = vpow2.f32 %v683_v29 }
  0x5d   :  { %v1389_v15 = vsel %vm1351_vm5, %v370_v9, %v366_v53  ;;  %v376_v5 = vmul.f32 %v831_v61, %v375_v49  ;;  %vm180_vm9 = vcmp.ge.f32.partialorder %v1267_v27, 0.0  ;;  %v385_v7 = vor.u32 1.1754944e-38, %v384_v56 }
  0x5e   :  { %v563_v20 = vmul.f32 %v547_v14, %v1334_v54  ;;  %v500_v52 = vmul.f32 1.0614054, %v1389_v15  ;;  %v104_v46 = vadd.f32 %v80_v19, %v70_v32  ;;  %vm181_vm11 = vcmp.ge.f32.partialorder %v1273_v58, 0.0 }
  0x5f   :  { %v377_v12 = vadd.f32 %v831_v61, %v376_v5  ;;  %vm383_vm12 = vcmp.eq.f32.partialorder %v382_v10, 8.507059e+37  ;;  %v1406_v33 = vmul.f32 0.70710677, %v1377_v59  ;;  %v397_v36 = vand.u32 2147483647, %v1366_v6 }
  0x60   :  { %v579_v23 = vadd.f32 -0.28449672, %v563_v20  ;;  %v516_v8 = vadd.f32 -1.4531521, %v500_v52  ;;  %v646_v39 = vsub.f32 0.0, %v1340_v37  ;;  %v1416_v0 = vadd.f32 %v120_v16, %v104_v46 }
  0x61   :  { %v835_v45 = vpop.eup %834  ;;  %v381_v19 = vsel %vm1395_vm10, %v831_v61, %v377_v12  ;;  %v1414_v17 = vand.u32 2147483647, %v1406_v33  ;;  %v71_v44 = vmul.f32 %v47_v31, %v37_v24  ;;  %vm393_vm13 = vweird.f32 %v1366_v6 }
  0x62   :  { %v595_v22 = vmul.f32 %v579_v23, %v1334_v54  ;;  %v532_v41 = vmul.f32 %v516_v8, %v1389_v15  ;;  %v1421_v11 = vsel %vm383_vm12, %v385_v7, %v381_v19  ;;  %v389_v3 = vmul.f32 %v835_v45, %v1366_v6  ;;  %v837_v38 = vpop.eup %836 }
  0x63   :  { %v501_v26 = vmul.f32 1.0614054, %v1421_v11  ;;  %v399_v61 = vand.u32 2147483648, %v1366_v6  ;;  %v231_v40 = vmul.f32 0.3275911, %v1414_v17  ;;  %vm394_vm14 = vweird.f32 %v835_v45 }
  0x64   :  { %v611_v29 = vadd.f32 0.2548296, %v595_v22  ;;  %v548_v50 = vadd.f32 1.4214138, %v532_v41  ;;  %v390_v31 = vsub.f32 1.0, %v389_v3  ;;  %v105_v14 = vadd.f32 %v81_v43, %v71_v44  ;;  %vm1443_vm15 = vmor %vm393_vm13, %vm394_vm14 }
  0x65   :  { %v517_v13 = vadd.f32 -1.4531521, %v501_v26  ;;  %v1429_v48 = vadd.f32 1.0, %v231_v40  ;;  %v1432_v10 = vmul.f32 0.70710677, %v1416_v0  ;;  %v400_v24 = vor.u32 1.1754944e-38, %v399_v61 }
  0x66   :  { %v627_v9 = vmul.f32 %v611_v29, %v1334_v54  ;;  %v564_v56 = vmul.f32 %v548_v50, %v1389_v15  ;;  %v685_v32 = vmul.f32 1.442695, %v661_v4  ;;  %v391_v49 = vmul.f32 %v835_v45, %v390_v31  ;;  %v121_v54 = vld [vmem:[%s1713_s3 + $0x60] sm:$0xff] }
  0x67   :  { %v533_v20 = vmul.f32 %v517_v13, %v1421_v11  ;;  %v662_v43 = vmul.f32 %v646_v39, %v1340_v37  ;;  %838 = vrcp.f32 %v1429_v48  ;;  %vm398_vm0 = vcmp.eq.f32.partialorder %v397_v36, 8.507059e+37 }
  0x68   :  { %v707_v57 = vmul.f32 %v833_v62, %v627_v9  ;;  %v580_v4 = vadd.f32 -0.28449672, %v564_v56  ;;  %v392_v5 = vadd.f32 %v835_v45, %v391_v49  ;;  %v196_v23 = vsel %vm180_vm9, 1.0, %v866_v18 }
  0x69   :  { %v549_v52 = vadd.f32 1.4214138, %v533_v20  ;;  %v1453_v6 = vand.u32 2147483647, %v1432_v10  ;;  %v1455_v63 = vadd.f32 %v121_v54, %v105_v14  ;;  %v1462_v46 = vsel %vm181_vm11, 1.0, %v866_v18 }
  0x6a   :  { %v723_v62 = vsub.f32 1.0, %v707_v57  ;;  %v596_v37 = vmul.f32 %v580_v4, %v1389_v15  ;;  %v396_v16 = vsel %vm1443_vm15, %v835_v45, %v392_v5  ;;  %840 = vpow2.f32 %v685_v32 }
  0x6b   :  { %v565_v27 = vmul.f32 %v549_v52, %v1421_v11  ;;  %v1467_v12 = vsel %vm398_vm0, %v400_v24, %v396_v16  ;;  %v687_v22 = vmul.f32 1.442695, %v662_v43  ;;  %v647_v39 = vsub.f32 0.0, %v1414_v17 }
  0x6c   :  { %v739_v7 = vmul.f32 %v723_v62, %v1329_v55  ;;  %v612_v36 = vadd.f32 0.2548296, %v596_v37  ;;  %v502_v55 = vmul.f32 1.0614054, %v1467_v12  ;;  %vm408_vm1 = vweird.f32 %v1429_v48 }
  0x6d   :  { %v839_v19 = vpop.eup %838  ;;  %v581_v44 = vadd.f32 -0.28449672, %v565_v27  ;;  %v232_v58 = vmul.f32 0.3275911, %v1453_v6  ;;  %v1474_v45 = vmul.f32 0.70710677, %v1455_v63  ;;  %v663_v57 = vmul.f32 %v647_v39, %v1414_v17 }
  0x6e   :  { %v755_v8 = vadd.f32 1.0, %v739_v7  ;;  %v628_v41 = vmul.f32 %v612_v36, %v1389_v15  ;;  %v518_v3 = vadd.f32 -1.4531521, %v502_v55  ;;  %v404_v26 = vmul.f32 %v839_v19, %v1429_v48  ;;  %v1520_v39 = vld [vmem:[%s1710_s0 + $0x38] sm:$0xff] }
  0x6f   :  { %v597_v61 = vmul.f32 %v581_v44, %v1421_v11  ;;  %v412_v40 = vand.u32 2147483647, %v1429_v48  ;;  %v414_v9 = vand.u32 2147483648, %v1429_v48  ;;  %v1482_v50 = vadd.f32 1.0, %v232_v58 }
  0x70   :  { %v771_v29 = vmul.f32 %v755_v8, %v1318_v42  ;;  %v708_v31 = vmul.f32 %v837_v38, %v628_v41  ;;  %v534_v42 = vmul.f32 %v518_v3, %v1467_v12  ;;  %v405_v13 = vsub.f32 1.0, %v404_v26  ;;  %v841_v15 = vpop.eup %840 }
  0x71   :  { %vm409_vm2 = vweird.f32 %v839_v19  ;;  %v613_v14 = vadd.f32 0.2548296, %v597_v61  ;;  %842 = vrcp.f32 %v1482_v50  ;;  %v1491_v56 = vand.u32 2147483647, %v1474_v45 }
  0x72   :  { %787 = vst [vmem:[%s1714_s4 + $0x30] sm:$0xff] %v771_v29  ;;  %v724_v32 = vsub.f32 1.0, %v708_v31  ;;  %v149_v49 = vmul.f32 0.5, %v1263_v28  ;;  %v550_v54 = vadd.f32 1.4214138, %v534_v42  ;;  %v406_v20 = vmul.f32 %v839_v19, %v405_v13  ;;  %vm1498_vm4 = vmor %vm408_vm1, %vm409_vm2 }
  0x73   :  { %v629_v38 = vmul.f32 %v613_v14, %v1421_v11  ;;  %vm182_vm3 = vcmp.ge.f32.partialorder %v1321_v60, 0.0  ;;  %844 = vpow2.f32 %v687_v22  ;;  %v415_v17 = vor.u32 1.1754944e-38, %v414_v9 }
  0x74   :  { %v740_v24 = vmul.f32 %v724_v32, %v196_v23  ;;  %v566_v43 = vmul.f32 %v550_v54, %v1467_v12  ;;  %v407_v62 = vadd.f32 %v839_v19, %v406_v20  ;;  %vm413_vm5 = vcmp.eq.f32.partialorder %v412_v40, 8.507059e+37 }
  0x75   :  { %v709_v28 = vmul.f32 %v841_v15, %v629_v38  ;;  %v689_v4 = vmul.f32 1.442695, %v663_v57  ;;  %v233_v5 = vmul.f32 0.3275911, %v1491_v56  ;;  %v38_v11 = vunpack.c.h.bf16 %v1371_v34 }
  0x76   :  { %v756_v52 = vadd.f32 1.0, %v740_v24  ;;  %v582_v7 = vadd.f32 -0.28449672, %v566_v43  ;;  %v411_v48 = vsel %vm1498_vm4, %v839_v19, %v407_v62  ;;  %v648_v37 = vsub.f32 0.0, %v1453_v6  ;;  %v122_v43 = vld [vmem:[%s1713_s3 + $0x68] sm:$0xff]  ;;  %v123_v62 = vld [vmem:[%s1713_s3 + $0x70] sm:$0xff] }
  0x77   :  { %v843_v16 = vpop.eup %842  ;;  %v725_v27 = vsub.f32 1.0, %v709_v28  ;;  %v1508_v23 = vsel %vm413_vm5, %v415_v17, %v411_v48  ;;  %vm423_vm6 = vweird.f32 %v1482_v50  ;;  %v1511_v22 = vadd.f32 1.0, %v233_v5 }
  0x78   :  { %v772_v8 = vmul.f32 %v756_v52, %v1385_v21  ;;  %v598_v36 = vmul.f32 %v582_v7, %v1467_v12  ;;  %v503_v34 = vmul.f32 1.0614054, %v1508_v23  ;;  %v419_v55 = vmul.f32 %v843_v16, %v1482_v50 }
  0x79   :  { %v845_v19 = vpop.eup %844  ;;  %v741_v44 = vmul.f32 %v725_v27, %v1462_v46  ;;  %v427_v58 = vand.u32 2147483647, %v1482_v50  ;;  %v429_v29 = vand.u32 2147483648, %v1482_v50  ;;  %846 = vrcp.f32 %v1511_v22 }
  0x7a   :  { %788 = vst [vmem:[%s1714_s4 + $0x38] sm:$0xff] %v772_v8  ;;  %v614_v21 = vadd.f32 0.2548296, %v598_v36  ;;  %v519_v41 = vadd.f32 -1.4531521, %v503_v34  ;;  %v420_v3 = vsub.f32 1.0, %v419_v55  ;;  %vm424_vm7 = vweird.f32 %v843_v16 }
  0x7b   :  { %v757_v26 = vadd.f32 1.0, %v741_v44  ;;  %v150_v61 = vmul.f32 0.5, %v1304_v25  ;;  %v198_v46 = vsel %vm182_vm3, 1.0, %v866_v18  ;;  %v39_v40 = vunpack.c.l.bf16 %v1520_v39  ;;  %vm1538_vm8 = vmor %vm423_vm6, %vm424_vm7 }
  0x7c   :  { %v630_v9 = vmul.f32 %v614_v21, %v1467_v12  ;;  %v535_v31 = vmul.f32 %v519_v41, %v1508_v23  ;;  %848 = vpow2.f32 %v689_v4  ;;  %v421_v42 = vmul.f32 %v843_v16, %v420_v3 }
  0x7d   :  { %v773_v13 = vmul.f32 %v757_v26, %v149_v49  ;;  %vm1542_vm9 = vcmp.eq.f32.partialorder %v427_v58, 8.507059e+37  ;;  %v430_v60 = vor.u32 1.1754944e-38, %v429_v29  ;;  %v664_v14 = vmul.f32 %v648_v37, %v1453_v6 }
  0x7e   :  { %v710_v57 = vmul.f32 %v845_v19, %v630_v9  ;;  %v551_v12 = vadd.f32 1.4214138, %v535_v31  ;;  %v422_v32 = vadd.f32 %v843_v16, %v421_v42  ;;  %v72_v54 = vmul.f32 %v48_v35, %v38_v11 }
  0x7f   :  { %v847_v49 = vpop.eup %846  ;;  %789 = vst [vmem:[%s1714_s4 + $0x40] sm:$0xff] %v773_v13  ;;  %vm438_vm10 = vweird.f32 %v1511_v22  ;;  %v442_v50 = vand.u32 2147483647, %v1511_v22  ;;  %v444_v20 = vand.u32 2147483648, %v1511_v22  ;;  %v1755_v38 = vperm.slane %v898_v1, 6 }
  0x80   :  { %v726_v53 = vsub.f32 1.0, %v710_v57  ;;  %v567_v17 = vmul.f32 %v551_v12, %v1508_v23  ;;  %v426_v35 = vsel %vm1538_vm8, %v843_v16, %v422_v32  ;;  %v434_v24 = vmul.f32 %v847_v49, %v1511_v22 }
  0x81   :  { %v73_v6 = vmul.f32 %v1755_v38, %v39_v40  ;;  %v1569_v28 = vsel %vm1542_vm9, %v430_v60, %v426_v35  ;;  %vm439_vm11 = vweird.f32 %v847_v49  ;;  %v1756_v4 = vperm.slane %v903_v2, 5 }
  0x82   :  { %v849_v52 = vpop.eup %848  ;;  %v742_v7 = vmul.f32 %v726_v53, %v198_v46  ;;  %v583_v48 = vadd.f32 -0.28449672, %v567_v17  ;;  %v504_v37 = vmul.f32 1.0614054, %v1569_v28  ;;  %v435_v16 = vsub.f32 1.0, %v434_v24  ;;  %vm1588_vm13 = vmor %vm438_vm10, %vm439_vm11 }
  0x83   :  { %v106_v5 = vadd.f32 %v1756_v4, %v72_v54  ;;  %v107_v11 = vadd.f32 %v83_v30, %v73_v6  ;;  %v691_v27 = vmul.f32 1.442695, %v664_v14  ;;  %vm1576_vm12 = vcmp.eq.f32.partialorder %v442_v50, 8.507059e+37 }
  0x84   :  { %v758_v55 = vadd.f32 1.0, %v742_v7  ;;  %v599_v19 = vmul.f32 %v583_v48, %v1508_v23  ;;  %v520_v44 = vadd.f32 -1.4531521, %v504_v37  ;;  %v436_v30 = vmul.f32 %v847_v49, %v435_v16 }
  0x85   :  { %v1580_v36 = vadd.f32 %v122_v43, %v106_v5  ;;  %v1582_v34 = vadd.f32 %v123_v62, %v107_v11  ;;  %v445_v29 = vor.u32 1.1754944e-38, %v444_v20  ;;  %v40_v3 = vunpack.c.h.bf16 %v1520_v39 }
  0x86   :  { %v774_v26 = vmul.f32 %v758_v55, %v150_v61  ;;  %v615_v46 = vadd.f32 0.2548296, %v599_v19  ;;  %v536_v40 = vmul.f32 %v520_v44, %v1569_v28  ;;  %v437_v9 = vadd.f32 %v847_v49, %v436_v30 }
  0x87   :  { %v1593_v21 = vmul.f32 0.70710677, %v1580_v36  ;;  %v1596_v41 = vmul.f32 0.70710677, %v1582_v34  ;;  %vm183_vm14 = vcmp.ge.f32.partialorder %v1406_v33, 0.0  ;;  %v649_v22 = vsub.f32 0.0, %v1491_v56 }
  0x88   :  { %790 = vst [vmem:[%s1714_s4 + $0x48] sm:$0xff] %v774_v26  ;;  %v631_v39 = vmul.f32 %v615_v46, %v1508_v23  ;;  %v552_v61 = vadd.f32 1.4214138, %v536_v40  ;;  %v441_v13 = vsel %vm1588_vm13, %v847_v49, %v437_v9  ;;  %v74_v60 = vmul.f32 %v50_v51, %v40_v3 }
  0x89   :  { %v1603_v31 = vand.u32 2147483647, %v1593_v21  ;;  %v1606_v42 = vand.u32 2147483647, %v1596_v41  ;;  %v1616_v33 = vsel %vm1576_vm12, %v445_v29, %v441_v13  ;;  %v199_v14 = vsel %vm183_vm14, 1.0, %v866_v18 }
  0x8a   :  { %v711_v57 = vmul.f32 %v849_v52, %v631_v39  ;;  %v568_v23 = vmul.f32 %v552_v61, %v1569_v28  ;;  %v505_v12 = vmul.f32 1.0614054, %v1616_v33  ;;  %850 = vpow2.f32 %v691_v27 }
  0x8b   :  { %v234_v15 = vmul.f32 0.3275911, %v1603_v31  ;;  %v235_v25 = vmul.f32 0.3275911, %v1606_v42  ;;  %v665_v32 = vmul.f32 %v649_v22, %v1491_v56  ;;  %v108_v1 = vadd.f32 %v84_v47, %v74_v60  ;;  %v124_v56 = vld [vmem:[%s1713_s3 + $0x78] sm:$0xff] }
  0x8c   :  { %v727_v50 = vsub.f32 1.0, %v711_v57  ;;  %v584_v20 = vadd.f32 -0.28449672, %v568_v23  ;;  %v521_v38 = vadd.f32 -1.4531521, %v505_v12  ;;  %v151_v51 = vmul.f32 0.5, %v1377_v59 }
  0x8d   :  { %v250_v54 = vadd.f32 1.0, %v234_v15  ;;  %v1626_v49 = vadd.f32 1.0, %v235_v25  ;;  %v693_v35 = vmul.f32 1.442695, %v665_v32  ;;  %vm184_vm15 = vcmp.ge.f32.partialorder %v1432_v10, 0.0 }
  0x8e   :  { %v743_v6 = vmul.f32 %v727_v50, %v199_v14  ;;  %v600_v53 = vmul.f32 %v584_v20, %v1569_v28  ;;  %v537_v17 = vmul.f32 %v521_v38, %v1616_v33  ;;  %v1638_v62 = vadd.f32 %v124_v56, %v108_v1 }
  0x8f   :  { %852 = vrcp.f32 %v250_v54  ;;  %v152_v52 = vmul.f32 0.5, %v1416_v0  ;;  %v200_v7 = vsel %vm184_vm15, 1.0, %v866_v18  ;;  %v459_v48 = vand.u32 2147483648, %v250_v54 }
  0x90   :  { %854 = vrcp.f32 %v1626_v49  ;;  %v759_v24 = vadd.f32 1.0, %v743_v6  ;;  %v616_v43 = vadd.f32 0.2548296, %v600_v53  ;;  %v553_v2 = vadd.f32 1.4214138, %v537_v17  ;;  %v851_v47 = vpop.eup %850 }
  0x91   :  { %856 = vpow2.f32 %v693_v35  ;;  %vm185_vm0 = vcmp.ge.f32.partialorder %v1474_v45, 0.0  ;;  %vm453_vm1 = vweird.f32 %v250_v54  ;;  %v650_v8 = vsub.f32 0.0, %v1603_v31 }
  0x92   :  { %v775_v59 = vmul.f32 %v759_v24, %v151_v51  ;;  %v632_v4 = vmul.f32 %v616_v43, %v1569_v28  ;;  %v569_v5 = vmul.f32 %v553_v2, %v1616_v33  ;;  %v457_v28 = vand.u32 2147483647, %v250_v54 }
  0x93   :  { %v1650_v0 = vmul.f32 0.70710677, %v1638_v62  ;;  %v460_v30 = vor.u32 1.1754944e-38, %v459_v48  ;;  %vm468_vm3 = vweird.f32 %v1626_v49  ;;  %v474_v40 = vand.u32 2147483648, %v1626_v49 }
  0x94   :  { %791 = vst [vmem:[%s1714_s4 + $0x50] sm:$0xff] %v775_v59  ;;  %v712_v10 = vmul.f32 %v851_v47, %v632_v4  ;;  %v585_v37 = vadd.f32 -0.28449672, %v569_v5  ;;  %v472_v61 = vand.u32 2147483647, %v1626_v49  ;;  %vm458_vm6 = vcmp.eq.f32.partialorder %v457_v28, 8.507059e+37 }
  0x95   :  { %v853_v11 = vpop.eup %852  ;;  %v1656_v29 = vand.u32 2147483647, %v1650_v0  ;;  %v201_v14 = vsel %vm185_vm0, 1.0, %v866_v18  ;;  %v666_v38 = vmul.f32 %v650_v8, %v1603_v31  ;;  %v651_v6 = vsub.f32 0.0, %v1606_v42 }
  0x96   :  { %v449_v16 = vmul.f32 %v853_v11, %v250_v54  ;;  %v855_v27 = vpop.eup %854  ;;  %v728_v55 = vsub.f32 1.0, %v712_v10  ;;  %v601_v19 = vmul.f32 %v585_v37, %v1616_v33  ;;  %vm454_vm2 = vweird.f32 %v853_v11 }
  0x97   :  { %v464_v58 = vmul.f32 %v855_v27, %v1626_v49  ;;  %v857_v9 = vpop.eup %856  ;;  %vm1660_vm4 = vmor %vm453_vm1, %vm454_vm2  ;;  %vm469_vm5 = vweird.f32 %v855_v27  ;;  %v236_v13 = vmul.f32 0.3275911, %v1656_v29  ;;  %vm473_vm8 = vcmp.eq.f32.partialorder %v472_v61, 8.507059e+37 }
  0x98   :  { %v450_v44 = vsub.f32 1.0, %v449_v16  ;;  %v744_v3 = vmul.f32 %v728_v55, %v200_v7  ;;  %v617_v26 = vadd.f32 0.2548296, %v601_v19  ;;  %vm1674_vm7 = vmor %vm468_vm3, %vm469_vm5  ;;  %v153_v53 = vmul.f32 0.5, %v1455_v63 }
  0x99   :  { %v465_v39 = vsub.f32 1.0, %v464_v58  ;;  %v252_v23 = vadd.f32 1.0, %v236_v13  ;;  %v695_v31 = vmul.f32 1.442695, %v666_v38  ;;  %v667_v47 = vmul.f32 %v651_v6, %v1606_v42 }
  0x9a   :  { %v451_v46 = vmul.f32 %v853_v11, %v450_v44  ;;  %v760_v15 = vadd.f32 1.0, %v744_v3  ;;  %v633_v25 = vmul.f32 %v617_v26, %v1616_v33  ;;  %v475_v33 = vor.u32 1.1754944e-38, %v474_v40 }
  0x9b   :  { %v466_v57 = vmul.f32 %v855_v27, %v465_v39  ;;  %858 = vrcp.f32 %v252_v23  ;;  %v697_v48 = vmul.f32 1.442695, %v667_v47  ;;  %vm483_vm9 = vweird.f32 %v252_v23 }
  0x9c   :  { %v452_v60 = vadd.f32 %v853_v11, %v451_v46  ;;  %v776_v12 = vmul.f32 %v760_v15, %v152_v52  ;;  %v713_v32 = vmul.f32 %v857_v9, %v633_v25  ;;  %860 = vpow2.f32 %v695_v31 }
  0x9d   :  { %v467_v1 = vadd.f32 %v855_v27, %v466_v57  ;;  %v489_v10 = vand.u32 2147483648, %v252_v23  ;;  %862 = vpow2.f32 %v697_v48  ;;  %v652_v26 = vsub.f32 0.0, %v1656_v29 }
  0x9e   :  { %v456_v54 = vsel %vm1660_vm4, %v853_v11, %v452_v60  ;;  %792 = vst [vmem:[%s1714_s4 + $0x58] sm:$0xff] %v776_v12  ;;  %v729_v45 = vsub.f32 1.0, %v713_v32  ;;  %vm186_vm13 = vcmp.ge.f32.partialorder %v1593_v21, 0.0  ;;  %vm187_vm14 = vcmp.ge.f32.partialorder %v1596_v41, 0.0 }
  0x9f   :  { %v461_v20 = vsel %vm458_vm6, %v460_v30, %v456_v54  ;;  %v471_v49 = vsel %vm1674_vm7, %v855_v27, %v467_v1  ;;  %v487_v27 = vand.u32 2147483647, %v252_v23  ;;  %v490_v19 = vor.u32 1.1754944e-38, %v489_v10 }
  0xa0   :  { %v506_v51 = vmul.f32 1.0614054, %v461_v20  ;;  %v745_v17 = vmul.f32 %v729_v45, %v201_v14  ;;  %v476_v35 = vsel %vm473_vm8, %v475_v33, %v471_v49  ;;  %v668_v25 = vmul.f32 %v652_v26, %v1656_v29 }
  0xa1   :  { %v507_v24 = vmul.f32 1.0614054, %v476_v35  ;;  %v859_v4 = vpop.eup %858  ;;  %vm488_vm12 = vcmp.eq.f32.partialorder %v487_v27, 8.507059e+37  ;;  %v202_v60 = vsel %vm186_vm13, 1.0, %v866_v18  ;;  %v154_v54 = vmul.f32 0.5, %v1580_v36 }
  0xa2   :  { %v522_v56 = vadd.f32 -1.4531521, %v506_v51  ;;  %v761_v43 = vadd.f32 1.0, %v745_v17  ;;  %v479_v7 = vmul.f32 %v859_v4, %v252_v23  ;;  %vm484_vm10 = vweird.f32 %v859_v4  ;;  %v861_v44 = vpop.eup %860 }
  0xa3   :  { %v523_v59 = vadd.f32 -1.4531521, %v507_v24  ;;  %vm485_vm11 = vmor %vm483_vm9, %vm484_vm10  ;;  %v863_v13 = vpop.eup %862  ;;  %v203_v50 = vsel %vm187_vm14, 1.0, %v866_v18  ;;  %v699_v33 = vmul.f32 1.442695, %v668_v25  ;;  %v155_v29 = vmul.f32 0.5, %v1582_v34 }
  0xa4   :  { %v538_v2 = vmul.f32 %v522_v56, %v461_v20  ;;  %v777_v5 = vmul.f32 %v761_v43, %v153_v53  ;;  %v480_v16 = vsub.f32 1.0, %v479_v7  ;;  %vm188_vm15 = vcmp.ge.f32.partialorder %v1650_v0, 0.0 }
  0xa5   :  { %v539_v52 = vmul.f32 %v523_v59, %v476_v35  ;;  %864 = vpow2.f32 %v699_v33  ;;  %v204_v31 = vsel %vm188_vm15, 1.0, %v866_v18  ;;  %v156_v43 = vmul.f32 0.5, %v1638_v62 }
  0xa6   :  { %v554_v11 = vadd.f32 1.4214138, %v538_v2  ;;  %793 = vst [vmem:[%s1714_s4 + $0x60] sm:$0xff] %v777_v5  ;;  %v481_v8 = vmul.f32 %v859_v4, %v480_v16 }
  0xa7   :  { %v555_v37 = vadd.f32 1.4214138, %v539_v52 }
  0xa8   :  { %v570_v63 = vmul.f32 %v554_v11, %v461_v20  ;;  %v482_v58 = vadd.f32 %v859_v4, %v481_v8 }
  0xa9   :  { %v571_v28 = vmul.f32 %v555_v37, %v476_v35 }
  0xaa   :  { %v586_v42 = vadd.f32 -0.28449672, %v570_v63  ;;  %v486_v40 = vsel %vm485_vm11, %v859_v4, %v482_v58 }
  0xab   :  { %v587_v30 = vadd.f32 -0.28449672, %v571_v28  ;;  %v491_v22 = vsel %vm488_vm12, %v490_v19, %v486_v40  ;;  %v865_v56 = vpop.eup %864 }
  0xac   :  { %v602_v55 = vmul.f32 %v586_v42, %v461_v20  ;;  %v508_v61 = vmul.f32 1.0614054, %v491_v22 }
  0xad   :  { %v603_v46 = vmul.f32 %v587_v30, %v476_v35 }
  0xae   :  { %v618_v3 = vadd.f32 0.2548296, %v602_v55  ;;  %v524_v57 = vadd.f32 -1.4531521, %v508_v61 }
  0xaf   :  { %v619_v39 = vadd.f32 0.2548296, %v603_v46 }
  0xb0   :  { %v634_v9 = vmul.f32 %v618_v3, %v461_v20  ;;  %v540_v32 = vmul.f32 %v524_v57, %v491_v22 }
  0xb1   :  { %v635_v14 = vmul.f32 %v619_v39, %v476_v35 }
  0xb2   :  { %v714_v15 = vmul.f32 %v861_v44, %v634_v9  ;;  %v556_v38 = vadd.f32 1.4214138, %v540_v32 }
  0xb3   :  { %v715_v12 = vmul.f32 %v863_v13, %v635_v14 }
  0xb4   :  { %v730_v23 = vsub.f32 1.0, %v714_v15  ;;  %v572_v51 = vmul.f32 %v556_v38, %v491_v22 }
  0xb5   :  { %v731_v20 = vsub.f32 1.0, %v715_v12 }
  0xb6   :  { %v746_v21 = vmul.f32 %v730_v23, %v202_v60  ;;  %v588_v49 = vadd.f32 -0.28449672, %v572_v51 }
  0xb7   :  { %v747_v45 = vmul.f32 %v731_v20, %v203_v50 }
  0xb8   :  { %v762_v1 = vadd.f32 1.0, %v746_v21  ;;  %v604_v53 = vmul.f32 %v588_v49, %v491_v22 }
  0xb9   :  { %v763_v41 = vadd.f32 1.0, %v747_v45 }
  0xba   :  { %v778_v6 = vmul.f32 %v762_v1, %v154_v54  ;;  %v620_v17 = vadd.f32 0.2548296, %v604_v53 }
  0xbb   :  { %v779_v36 = vmul.f32 %v763_v41, %v155_v29 }
  0xbc   :  { %794 = vst [vmem:[%s1714_s4 + $0x68] sm:$0xff] %v778_v6  ;;  %v636_v34 = vmul.f32 %v620_v17, %v491_v22 }
  0xbd   :  { %795 = vst [vmem:[%s1714_s4 + $0x70] sm:$0xff] %v779_v36 }
  0xbe   :  { %v716_v35 = vmul.f32 %v865_v56, %v636_v34 }
  0xc0   :  { %v732_v24 = vsub.f32 1.0, %v716_v35 }
  0xc2   :  { %v748_v2 = vmul.f32 %v732_v24, %v204_v31 }
  0xc4   :  { %v764_v47 = vadd.f32 1.0, %v748_v2 }
  0xc6   :  { %v780_v59 = vmul.f32 %v764_v47, %v156_v43 }
  0xc8   :  { %796 = vst [vmem:[%s1714_s4 + $0x78] sm:$0xff] %v780_v59 }

// kernel: transformer_block3d_forward.3
= control target key start
LH: loop header
LB: loop body
LE: loop exit
PB: predicated region body
PF: predicated region fallthrough
CT: control target
= control target key end

     0   :  { %s2383_s24 = smov 0   ;;  %s2385_s1 = smov 0   ;;  %s3024_s0 = inlined_call_operand.vmem [shape: f32[2,8,8,128], index: 0, kind: input, shape index: {}]   ;;  %s3025_s1 = inlined_call_operand.vmem [shape: f32[1,128], index: 1, kind: input, shape index: {}, may-alias: {1,2}]   ;;  %s3026_s2 = inlined_call_operand.vmem [shape: f32[1,128], index: 2, kind: input, shape index: {}, may-alias: {1,2}]   ;;  %s3027_s3 = inlined_call_operand.vmem [shape: bf16[1152,128], index: 3, kind: input, shape index: {}]   ;;  %s3028_s4 = inlined_call_operand.vmem [shape: f32[1,128], index: 4, kind: input, shape index: {}]   ;;  %s3029_s5 = inlined_call_operand.vmem [shape: bf16[2,8,8,128], index: 5, kind: output, shape index: {0}]   ;;  %s3030_s6 = inlined_call_operand.vmem [shape: f32[2,1,1,128], index: 6, kind: output, shape index: {1}]   ;;  %s3031_s7 = inlined_call_operand.vmem [shape: f32[2,1,1,128], index: 7, kind: output, shape index: {2}]  }
   0x1   :  { %s2387_s2 = smov 0  }
   0x2 LB: > { %s30_s25 = sadd.s32 1, %s2337_s1  ;;  %p1875_p0 = scmp.ge.s32.totalorder %s2341_s2, 1  ;;  %s2341_s2 = sphi %s2387_s2, %s18_s2   ;;  %s2337_s1 = sphi %s2385_s1, %s3041_s1   ;;  %s2333_s24 = sphi %s2383_s24, %s3040_s24  }
   0x3   : > { %p32_p1 = scmp.ge.s32.totalorder %s30_s25, 2  ;;  %p260_p2 = scmp.lt.s32.totalorder %s2341_s2, 3 }
   0x5   : > { %s3043_s25 = smov (%p32_p1, %s30_s25), 0  ;;  %p261_p3 = pnand %p1875_p0, %p260_p2 }
   0x6   : > { %p308_p4 = scmp.lt.s32.totalorder (!%p261_p3), %s2333_s24, 1 }
   0x7   : > { %264 = sbr.rel (%p261_p3) target bundleno = 347 (0x15b), region = 40 }
   0xc   : > { %v2190_v0 = vld [vmem:[%s3027_s3 + $0x38] sm:$0xff]  ;;  %v2189_v2 = vld [vmem:[%s3027_s3 + $0x30] sm:$0xff]  ;;  %s3045_s24 = smov (!%p308_p4, %s2333_s24), 1  ;;  %v2188_v6 = vld [vmem:[%s3027_s3 + $0x28] sm:$0xff]  ;;  %vm487_vm0 = vcmask 1040384   ;;  %vm500_vm1 = vcmask 1044480  }
   0xd   : > { %v2206_v1 = vld [vmem:[%s3027_s3 + $0xb8] sm:$0xff]  ;;  %2278 = vmatpush.bf16.msra.mxu1 %v2190_v0  ;;  %1403 = vmatpush.bf16.msra.mxu0 %v2190_v0  ;;  %v2205_v3 = vld [vmem:[%s3027_s3 + $0xb0] sm:$0xff]  ;;  %s2181_s13 = sshll.u32 %s3045_s24, 6  ;;  %v2204_v9 = vld [vmem:[%s3027_s3 + $0xa8] sm:$0xff]  ;;  %vm488_vm2 = vsmask.f32 256  ;;  %s328_s15 = scalar_lea.vmem %s3030_s6, %s3045_s24 }
   0xe   : > { %1461 = vmatpush.bf16.msra.mxu2 %v2206_v1  ;;  %v2214_v4 = vld [vmem:[%s3027_s3 + $0xf8] sm:$0xff]  ;;  %v2213_v5 = vld [vmem:[%s3027_s3 + $0xf0] sm:$0xff]  ;;  %s2425_s18 = scalar_lea.vmem %s3024_s0, %s2181_s13  ;;  %v2212_v13 = vld [vmem:[%s3027_s3 + $0xe8] sm:$0xff]  ;;  %vm501_vm3 = vsmask.f32 4352  ;;  %vm668_vm6 = vcmask 1042432   ;;  %s334_s19 = scalar_lea.vmem %s3031_s7, %s3045_s24 }
   0xf   : > { %1490 = vmatpush.bf16.msra.mxu3 %v2214_v4  ;;  %v340_v7 = vld [vmem:[%s2425_s18 + $0x18] sm:$0xff]  ;;  %v341_v8 = vld [vmem:[%s2425_s18 + $0x20] sm:$0xff]  ;;  %v342_v24 = vld [vmem:[%s2425_s18 + $0x28] sm:$0xff]  ;;  %vm669_vm7 = vcmask 1046532   ;;  %vm553_vm9 = vsmask.f32 3328 }
  0x10   : > { %v371_v10 = vpack.c.bf16 %v340_v7, %v340_v7  ;;  %v372_v11 = vpack.c.bf16 %v341_v8, %v341_v8  ;;  %v337_v12 = vld [vmem:[%s2425_s18] sm:$0xff]  ;;  %v343_v25 = vld [vmem:[%s2425_s18 + $0x30] sm:$0xff]  ;;  %v2186_v31 = vld [vmem:[%s3027_s3 + $0x18] sm:$0xff]  ;;  %v373_v34 = vpack.c.bf16 %v342_v24, %v342_v24  ;;  %vm554_vm10 = vsmask.f32 7440  ;;  %s2182_s10 = sshll.u32 %s3045_s24, 5 }
  0x11   : > { %2279 = vmatpush.bf16.msra.mxu1 %v2189_v2  ;;  %1404 = vmatpush.bf16.msra.mxu0 %v2189_v2  ;;  %v361_v16 = vmul.f32 0.0, %v337_v12  ;;  %v368_v17 = vpack.c.bf16 %v337_v12, %v337_v12  ;;  %v2187_v18 = vld [vmem:[%s3027_s3 + $0x20] sm:$0xff]  ;;  %v374_v35 = vpack.c.bf16 %v343_v25, %v343_v25  ;;  %v2202_v36 = vld [vmem:[%s3027_s3 + $0x98] sm:$0xff]  ;;  %vm2458_vm4 = vmand %vm487_vm0, %vm488_vm2  ;;  %s2989_s13 = scalar_lea.vmem %s3029_s5, %s2182_s10 }
  0x12   : > { %1462 = vmatpush.bf16.msra.mxu2 %v2205_v3  ;;  %v391_v14 = vunpack.c.l.b16 %v371_v10  ;;  %v392_v15 = vunpack.c.l.b16 %v372_v11  ;;  %v2203_v19 = vld [vmem:[%s3027_s3 + $0xa0] sm:$0xff]  ;;  %v393_v43 = vunpack.c.l.b16 %v373_v34  ;;  %vm2464_vm5 = vmand %vm500_vm1, %vm501_vm3  ;;  %v2210_v47 = vld [vmem:[%s3027_s3 + $0xd8] sm:$0xff] }
  0x13   : > { %1491 = vmatpush.bf16.msra.mxu3 %v2213_v5  ;;  %v367_v22 = vpack.c.bf16 %v361_v16, %v361_v16  ;;  %v388_v23 = vunpack.c.l.b16 %v368_v17  ;;  %v2211_v30 = vld [vmem:[%s3027_s3 + $0xe0] sm:$0xff]  ;;  %v394_v48 = vunpack.c.l.b16 %v374_v35  ;;  %v2185_v49 = vld [vmem:[%s3027_s3 + $0x10] sm:$0xff]  ;;  %v338_v61 = vld [vmem:[%s2425_s18 + $0x8] sm:$0xff] }
  0x14   : > { %v401_v20 = vpack.c.b16 %v391_v14, %v391_v14  ;;  %v402_v21 = vpack.c.b16 %v392_v15, %v392_v15  ;;  %v403_v53 = vpack.c.b16 %v393_v43, %v393_v43  ;;  %v2201_v54 = vld [vmem:[%s3027_s3 + $0x90] sm:$0xff]  ;;  %v2184_v0 = vld [vmem:[%s3027_s3 + $0x8] sm:$0xff]  ;;  %v369_v8 = vpack.c.bf16 %v338_v61, %v338_v61  ;;  %v2199_v24 = vld [vmem:[%s3027_s3 + $0x80] sm:$0xff] }
  0x15   : > { %2280 = vmatpush.bf16.msra.mxu1 %v2188_v6  ;;  %1405 = vmatpush.bf16.msra.mxu0 %v2188_v6  ;;  %v387_v32 = vunpack.c.l.b16 %v367_v22  ;;  %v398_v33 = vpack.c.b16 %v388_v23, %v388_v23  ;;  %v2209_v62 = vld [vmem:[%s3027_s3 + $0xd0] sm:$0xff]  ;;  %v404_v63 = vpack.c.b16 %v394_v48, %v394_v48  ;;  %v2200_v6 = vld [vmem:[%s3027_s3 + $0x88] sm:$0xff]  ;;  %v2198_v23 = vld [vmem:[%s3027_s3 + $0x78] sm:$0xff] }
  0x16   : > { %1463 = vmatpush.bf16.msra.mxu2 %v2204_v9  ;;  %v436_v26 = vshrl.u32 %v401_v20, 16  ;;  %v439_v27 = vshll.u32 %v401_v20, 16  ;;  %v443_v28 = vshrl.u32 %v402_v21, 16  ;;  %v446_v29 = vshll.u32 %v402_v21, 16  ;;  %v339_v7 = vld [vmem:[%s2425_s18 + $0x10] sm:$0xff]  ;;  %v2208_v16 = vld [vmem:[%s3027_s3 + $0xc8] sm:$0xff]  ;;  %vm2547_vm8 = vmor %vm668_vm6, %vm669_vm7 }
  0x17   : > { %1492 = vmatpush.bf16.msra.mxu3 %v2212_v13  ;;  %v397_v40 = vpack.c.b16 %v387_v32, %v387_v32  ;;  %v415_v41 = vshrl.u32 %v398_v33, 16  ;;  %v418_v42 = vshll.u32 %v398_v33, 16  ;;  %v450_v3 = vshrl.u32 %v403_v53, 16  ;;  %v2222_v32 = vld [vmem:[%s3027_s3 + $0x138] sm:$0xff]  ;;  %vm2680_vm11 = vmor %vm553_vm9, %vm554_vm10 }
  0x18   : > { %v438_v37 = vrot.slane %v436_v26, 7  ;;  %v445_v38 = vrot.slane %v443_v28, 7  ;;  %v453_v12 = vshll.u32 %v403_v53, 16  ;;  %v457_v17 = vshrl.u32 %v404_v63, 16  ;;  %v2238_v34 = vld [vmem:[%s3027_s3 + $0x1b8] sm:$0xff] }
  0x19   : > { %2281 = vmatpush.bf16.msra.mxu1 %v2187_v18  ;;  %1406 = vmatpush.bf16.msra.mxu0 %v2187_v18  ;;  %v408_v50 = vshrl.u32 %v397_v40, 16  ;;  %v411_v51 = vshll.u32 %v397_v40, 16  ;;  %v417_v52 = vrot.slane %v415_v41, 7  ;;  %v452_v11 = vrot.slane %v450_v3, 7  ;;  %v2183_v18 = vld [vmem:[%s3027_s3] sm:$0xff]  ;;  %v2220_v3 = vld [vmem:[%s3027_s3 + $0x128] sm:$0xff] }
  0x1a   : > { %1464 = vmatpush.bf16.msra.mxu2 %v2203_v19  ;;  %v441_v44 = vor.u32 %v439_v27, %v438_v37  ;;  %v448_v45 = vor.u32 %v446_v29, %v445_v38  ;;  %v460_v21 = vshll.u32 %v404_v63, 16  ;;  %v370_v22 = vpack.c.bf16 %v339_v7, %v339_v7  ;;  %v2245_v63 = vld [vmem:[%s3027_s3 + $0x1f0] sm:$0xff] }
  0x1b   : > { %1493 = vmatpush.bf16.msra.mxu3 %v2211_v30  ;;  %v410_v59 = vrot.slane %v408_v50, 7  ;;  %v420_v60 = vor.u32 %v418_v42, %v417_v52  ;;  %v459_v27 = vrot.slane %v457_v17, 7  ;;  %v389_v28 = vunpack.c.l.b16 %v369_v8  ;;  %v2207_v42 = vld [vmem:[%s3027_s3 + $0xc0] sm:$0xff] }
  0x1c   : > { %v494_v55 = vsel %vm2458_vm4, 0, %v441_v44  ;;  %v495_v56 = vsel %vm2458_vm4, 0, %v448_v45  ;;  %v455_v38 = vor.u32 %v453_v12, %v452_v11  ;;  %v390_v43 = vunpack.c.l.b16 %v370_v22  ;;  %v2197_v44 = vld [vmem:[%s3027_s3 + $0x70] sm:$0xff]  ;;  %v2236_v11 = vld [vmem:[%s3027_s3 + $0x1a8] sm:$0xff]  ;;  %v2219_v22 = vld [vmem:[%s3027_s3 + $0x120] sm:$0xff] }
  0x1d   : > { %2282 = vmatpush.bf16.msra.mxu1 %v2186_v31  ;;  %1407 = vmatpush.bf16.msra.mxu0 %v2186_v31  ;;  %v2483_v57 = vsel %vm2464_vm5, %v494_v55, 0  ;;  %v2487_v58 = vsel %vm2464_vm5, %v495_v56, 0  ;;  %v413_v1 = vor.u32 %v411_v51, %v410_v59  ;;  %v491_v2 = vsel %vm2458_vm4, 0, %v420_v60  ;;  %v2221_v51 = vld [vmem:[%s3027_s3 + $0x130] sm:$0xff]  ;;  %v2196_v60 = vld [vmem:[%s3027_s3 + $0x68] sm:$0xff] }
  0x1e   : > { %1465 = vmatpush.bf16.msra.mxu2 %v2202_v36  ;;  %v2499_v4 = vunpack.c.l.b16 %v2483_v57  ;;  %v2502_v5 = vunpack.c.l.b16 %v2487_v58  ;;  %v504_v10 = vsel %vm2464_vm5, %v491_v2, 0  ;;  %v462_v41 = vor.u32 %v460_v21, %v459_v27 }
  0x1f   : > { %1494 = vmatpush.bf16.msra.mxu3 %v2210_v47  ;;  %v490_v9 = vsel %vm2458_vm4, 0, %v413_v1  ;;  %v2514_v14 = vunpack.c.l.b16 %v504_v10  ;;  %v524_v15 = vunpack.c.h.b16 %v504_v10  ;;  %v399_v48 = vpack.c.b16 %v389_v28, %v389_v28  ;;  %v2235_v28 = vld [vmem:[%s3027_s3 + $0x1a0] sm:$0xff] }
  0x20   : > { %v503_v13 = vsel %vm2464_vm5, %v490_v9, 0  ;;  %v2536_v29 = vpack.c.b16 %v2502_v5, %v2499_v4  ;;  %v496_v53 = vsel %vm2458_vm4, 0, %v455_v38  ;;  %v497_v56 = vsel %vm2458_vm4, 0, %v462_v41 }
  0x21   : > { %2283 = vmatpush.bf16.msra.mxu1 %v2185_v49  ;;  %1408 = vmatpush.bf16.msra.mxu0 %v2185_v49  ;;  %v521_v19 = vunpack.c.l.b16 %v503_v13  ;;  %v522_v20 = vunpack.c.h.b16 %v503_v13  ;;  %v2530_v25 = vpack.c.b16 %v2514_v14, %v2514_v14  ;;  %v2532_v26 = vpack.c.b16 %v524_v15, %v524_v15  ;;  %v2246_v49 = vld [vmem:[%s3027_s3 + $0x1f8] sm:$0xff]  ;;  %v2195_v15 = vld [vmem:[%s3027_s3 + $0x60] sm:$0xff] }
  0x22   : > { %1466 = vmatpush.bf16.msra.mxu2 %v2201_v54  ;;  %v2237_v54 = vld [vmem:[%s3027_s3 + $0x1b0] sm:$0xff]  ;;  %v400_v59 = vpack.c.b16 %v390_v43, %v390_v43  ;;  %v422_v61 = vshrl.u32 %v399_v48, 16  ;;  %v2605_v7 = vsel %vm2464_vm5, %v497_v56, 0 }
  0x23   : > { %1495 = vmatpush.bf16.msra.mxu3 %v2209_v62  ;;  %v2538_v30 = vpack.c.b16 %v521_v19, %v521_v19  ;;  %v2540_v31 = vpack.c.b16 %v522_v20, %v522_v20  ;;  %v749_v35 = vpack.c.b16 %v2514_v14, %v521_v19  ;;  %v1882_v36 = vrot.slane %v2530_v25, 9 }
  0x24   : > { %v677_v37 = vrot.slane %v2532_v26, 5  ;;  %v425_v62 = vshll.u32 %v399_v48, 16  ;;  %v424_v8 = vrot.slane %v422_v61, 7  ;;  %v429_v9 = vshrl.u32 %v400_v59, 16 }
  0x25   : > { %2284 = vmatpush.bf16.msra.mxu1 %v2184_v0  ;;  %1409 = vmatpush.bf16.msra.mxu0 %v2184_v0  ;;  %v673_v40 = vrot.slane %v2540_v31, 5  ;;  %v1881_v45 = vrot.slane %v2538_v30, 9  ;;  %v557_v0 = vshrl.u32 %v2538_v30, 16  ;;  %v560_v1 = vshll.u32 %v2538_v30, 16  ;;  %v2244_v30 = vld [vmem:[%s3027_s3 + $0x1e8] sm:$0xff] }
  0x26   : > { %1467 = vmatpush.bf16.msra.mxu2 %v2200_v6  ;;  %v2567_v47 = vsel %vm2547_vm8, %v1882_v36, %v677_v37  ;;  %v2601_v6 = vsel %vm2464_vm5, %v496_v53, 0  ;;  %v432_v10 = vshll.u32 %v400_v59, 16  ;;  %v571_v12 = vshrl.u32 %v2530_v25, 16  ;;  %v2194_v37 = vld [vmem:[%s3027_s3 + $0x58] sm:$0xff] }
  0x27   : > { %1496 = vmatpush.bf16.msra.mxu3 %v2208_v16  ;;  %v774_v50 = vunpack.c.l.b16 %v2567_v47  ;;  %v674_v52 = vsel %vm2547_vm8, %v1881_v45, %v673_v40  ;;  %v574_v13 = vshll.u32 %v2530_v25, 16  ;;  %v427_v16 = vor.u32 %v425_v62, %v424_v8  ;;  %v2191_v47 = vld [vmem:[%s3027_s3 + $0x40] sm:$0xff] }
  0x28   : > { %v773_v55 = vunpack.c.l.b16 %v674_v52  ;;  %v431_v17 = vrot.slane %v429_v9, 7  ;;  %v562_v19 = vrot.slane %v560_v1, 5  ;;  %v2616_v20 = vunpack.c.l.b16 %v2601_v6 }
  0x29   : > { %2285 = vmatpush.bf16.msra.mxu1 %v2183_v18  ;;  %1410 = vmatpush.bf16.msra.mxu0 %v2183_v18  ;;  %v559_v18 = vrot.slane %v557_v0, 4  ;;  %v2619_v21 = vunpack.c.l.b16 %v2605_v7  ;;  %v492_v27 = vsel %vm2458_vm4, 0, %v427_v16  ;;  %v566_v36 = vshll.u32 %v2540_v31, 16  ;;  %v2243_v16 = vld [vmem:[%s3027_s3 + $0x1e0] sm:$0xff] }
  0x2a   : > { %1468 = vmatpush.bf16.msra.mxu2 %v2199_v24  ;;  %v781_v2 = vpack.c.b16 %v774_v50, %v773_v55  ;;  %v532_v24 = vunpack.c.h.b16 %v2487_v58  ;;  %v434_v25 = vor.u32 %v432_v10, %v431_v17  ;;  %v2193_v55 = vld [vmem:[%s3027_s3 + $0x50] sm:$0xff]  ;;  %v2234_v10 = vld [vmem:[%s3027_s3 + $0x198] sm:$0xff]  ;;  %v2192_v17 = vld [vmem:[%s3027_s3 + $0x48] sm:$0xff] }
  0x2b   : > { %1497 = vmatpush.bf16.msra.mxu3 %v2207_v42  ;;  %v580_v42 = vshll.u32 %v2532_v26, 16  ;;  %v2649_v43 = vpack.c.b16 %v2619_v21, %v2616_v20  ;;  %v563_v45 = vor.u32 %v562_v19, %v559_v18 }
  0x2c   : > { %1421 = vmatmul.bf16.vlgmr.msra.gmra.mxu1 %v2536_v29  ;;  %1411 = vmatmul.bf16.vlgmr.msra.gmra.mxu0 %v749_v35  ;;  %v576_v35 = vrot.slane %v574_v13, 5  ;;  %v493_v38 = vsel %vm2458_vm4, 0, %v434_v25  ;;  %v2703_v25 = vpack.c.b16 %v2502_v5, %v2502_v5 }
  0x2d   : > { %1432 = vmatpush.bf16.msrb.mxu1 %v2198_v23  ;;  %1519 = vmatpush.bf16.msrb.mxu0 %v2222_v32  ;;  %v530_v23 = vunpack.c.h.b16 %v2483_v57  ;;  %v2636_v32 = vpack.c.b16 %v2499_v4, %v2499_v4  ;;  %v505_v57 = vsel %vm2464_vm5, %v492_v27, 0  ;;  %v506_v31 = vsel %vm2464_vm5, %v493_v38, 0 }
  0x2e   : > { %1577 = vmatpush.bf16.msrb.mxu2 %v2238_v34  ;;  %v573_v34 = vrot.slane %v571_v12, 4  ;;  %v525_v40 = vunpack.c.l.b16 %v505_v57  ;;  %v526_v41 = vunpack.c.h.b16 %v505_v57  ;;  %v2656_v48 = vunpack.c.l.b16 %v506_v31 }
  0x2f   : > { %1606 = vmatpush.bf16.msrb.mxu3 %v2246_v49  ;;  %1469 = vmatmul.bf16.vlgmr.msra.gmra.mxu2 %v781_v2  ;;  %v528_v49 = vunpack.c.h.b16 %v506_v31  ;;  %v564_v0 = vrot.slane %v563_v45, 4  ;;  %v2708_v27 = vpack.c.b16 %v532_v24, %v532_v24  ;;  %v613_v24 = vshrl.u32 %v2636_v32, 16  ;;  %v2215_v31 = vld [vmem:[%s3027_s3 + $0x100] sm:$0xff] }
  0x30   : > { %v542_v52 = vpack.c.b16 %v526_v41, %v526_v41  ;;  %v789_v26 = vpack.c.b16 %v525_v40, %v2514_v14  ;;  %v577_v53 = vor.u32 %v576_v35, %v573_v34  ;;  %v2664_v56 = vpack.c.b16 %v2656_v48, %v2656_v48 }
  0x31   : > { %1433 = vmatpush.bf16.msrb.mxu1 %v2197_v44  ;;  %1520 = vmatpush.bf16.msrb.mxu0 %v2221_v51  ;;  %v2218_v44 = vld [vmem:[%s3027_s3 + $0x118] sm:$0xff]  ;;  %v541_v51 = vpack.c.b16 %v525_v40, %v525_v40  ;;  %v2666_v59 = vpack.c.b16 %v528_v49, %v528_v49  ;;  %v1886_v49 = vrot.slane %v2703_v25, 9 }
  0x32   : > { %1578 = vmatpush.bf16.msrb.mxu2 %v2237_v54  ;;  %v568_v54 = vrot.slane %v566_v36, 5  ;;  %v594_v61 = vshll.u32 %v542_v52, 16  ;;  %1498 = vmatmul.bf16.vlgmr.msra.gmra.mxu3 %v789_v26  ;;  %v681_v62 = vrot.slane %v542_v52, 5  ;;  %v1884_v1 = vrot.slane %v2664_v56, 9  ;;  %v2233_v52 = vld [vmem:[%s3027_s3 + $0x190] sm:$0xff] }
  0x33   : > { %1607 = vmatpush.bf16.msrb.mxu3 %v2245_v63  ;;  %v1883_v14 = vrot.slane %v541_v51, 9  ;;  %v2217_v63 = vld [vmem:[%s3027_s3 + $0x110] sm:$0xff]  ;;  %v685_v2 = vrot.slane %v2666_v59, 5  ;;  %v585_v8 = vshrl.u32 %v541_v51, 16  ;;  %v588_v9 = vshll.u32 %v541_v51, 16 }
  0x34   : > { %v578_v13 = vrot.slane %v577_v53, 4  ;;  %v569_v57 = vsel %vm2680_vm11, %v564_v0, %v568_v54  ;;  %v596_v58 = vrot.slane %v594_v61, 5  ;;  %v599_v38 = vshrl.u32 %v2664_v56, 16  ;;  %v2760_v0 = vld [vmem:[%s2425_s18 + $0x38] sm:$0xff] }
  0x35   : > { %1434 = vmatpush.bf16.msrb.mxu1 %v2196_v60  ;;  %1521 = vmatpush.bf16.msrb.mxu0 %v2220_v3  ;;  %v2669_v60 = vpack.c.b16 %v2656_v48, %v525_v40  ;;  %v682_v12 = vsel %vm2547_vm8, %v1883_v14, %v681_v62  ;;  %v2699_v18 = vsel %vm2547_vm8, %v1884_v1, %v685_v2  ;;  %v602_v40 = vshll.u32 %v2664_v56, 16  ;;  %v2242_v56 = vld [vmem:[%s3027_s3 + $0x1d8] sm:$0xff] }
  0x36   : > { %1579 = vmatpush.bf16.msrb.mxu2 %v2236_v11  ;;  %v2687_v11 = vpack.c.b16 %v530_v23, %v530_v23  ;;  %v775_v19 = vunpack.c.l.b16 %v682_v12  ;;  %v590_v23 = vrot.slane %v588_v9, 5  ;;  %v693_v51 = vrot.slane %v2708_v27, 5  ;;  %v2229_v9 = vld [vmem:[%s3027_s3 + $0x170] sm:$0xff] }
  0x37   : > { %1608 = vmatpush.bf16.msrb.mxu3 %v2244_v30  ;;  %v2216_v30 = vld [vmem:[%s3027_s3 + $0x108] sm:$0xff]  ;;  %v757_v26 = vunpack.c.l.b16 %v569_v57  ;;  %v601_v14 = vrot.slane %v599_v38, 4  ;;  %v604_v62 = vrot.slane %v602_v40, 5  ;;  %v790_v1 = vpack.c.b16 %v2499_v4, %v2656_v48  ;;  %v2231_v38 = vld [vmem:[%s3027_s3 + $0x180] sm:$0xff]  ;;  %v2241_v40 = vld [vmem:[%s3027_s3 + $0x1d0] sm:$0xff] }
  0x38   : > { %v2718_v34 = vpack.c.b16 %v775_v19, %v774_v50  ;;  %v2230_v50 = vld [vmem:[%s3027_s3 + $0x178] sm:$0xff]  ;;  %v689_v45 = vrot.slane %v2687_v11, 5  ;;  %v375_v4 = vpack.c.bf16 %v2760_v0, %v2760_v0  ;;  %v2228_v57 = vld [vmem:[%s3027_s3 + $0x168] sm:$0xff] }
  0x39   : > { %1435 = vmatpush.bf16.msrb.mxu1 %v2195_v15  ;;  %1522 = vmatpush.bf16.msrb.mxu0 %v2219_v22  ;;  %v582_v15 = vrot.slane %v580_v42, 5  ;;  %v587_v22 = vrot.slane %v585_v8, 4  ;;  %v616_v42 = vshll.u32 %v2636_v32, 16  ;;  %v2770_v8 = vsel %vm2547_vm8, %v1886_v49, %v693_v51  ;;  %v2227_v49 = vld [vmem:[%s3027_s3 + $0x160] sm:$0xff] }
  0x3a   : > { %1580 = vmatpush.bf16.msrb.mxu2 %v2235_v28  ;;  %v776_v28 = vunpack.c.l.b16 %v2699_v18  ;;  %v605_v48 = vor.u32 %v604_v62, %v601_v14  ;;  %v627_v51 = vshrl.u32 %v2703_v25, 16 }
  0x3b   : > { %1609 = vmatpush.bf16.msrb.mxu3 %v2243_v16  ;;  %v591_v35 = vor.u32 %v590_v23, %v587_v22  ;;  %v622_v16 = vshll.u32 %v2687_v11, 16  ;;  %v395_v22 = vunpack.c.l.b16 %v375_v4  ;;  %v536_v23 = vunpack.c.h.b16 %v2605_v7  ;;  %v2232_v11 = vld [vmem:[%s3027_s3 + $0x188] sm:$0xff] }
  0x3c   : > { %1426 = vmatmul.bf16.gmra.mxu1 %v2649_v43  ;;  %1416 = vmatmul.bf16.gmra.mxu0 %v2669_v60  ;;  %v2723_v36 = vpack.c.b16 %v776_v28, %v775_v19  ;;  %v534_v19 = vunpack.c.h.b16 %v2601_v6  ;;  %v629_v4 = vrot.slane %v627_v51, 4 }
  0x3d   : > { %1436 = vmatpush.bf16.msrb.mxu1 %v2194_v37  ;;  %1523 = vmatpush.bf16.msrb.mxu0 %v2218_v44  ;;  %v583_v37 = vsel %vm2680_vm11, %v578_v13, %v582_v15  ;;  %v592_v41 = vrot.slane %v591_v35, 4  ;;  %v1885_v44 = vrot.slane %v2636_v32, 9  ;;  %v2752_v32 = vld [vmem:[%s3027_s3 + $0x238] sm:$0xff]  ;;  %v608_v13 = vshll.u32 %v2666_v59, 16 }
  0x3e   : > { %1581 = vmatpush.bf16.msrb.mxu2 %v2234_v10  ;;  %v758_v53 = vunpack.c.l.b16 %v583_v37  ;;  %v405_v35 = vpack.c.b16 %v395_v22, %v395_v22  ;;  %v2252_v37 = vld [vmem:[%s3027_s3 + $0x228] sm:$0xff]  ;;  %v791_v22 = vpack.c.b16 %v2616_v20, %v2502_v5 }
  0x3f   : > { %1474 = vmatmul.bf16.gmra.mxu2 %v2723_v36  ;;  %v597_v54 = vsel %vm2680_vm11, %v592_v41, %v596_v58  ;;  %1610 = vmatpush.bf16.msrb.mxu3 %v2242_v56  ;;  %v2766_v2 = vsel %vm2547_vm8, %v1885_v44, %v689_v45  ;;  %v610_v6 = vrot.slane %v608_v13, 5  ;;  %v606_v58 = vrot.slane %v605_v48, 4 }
  0x40   : > { %v2757_v61 = vunpack.c.l.b16 %v597_v54  ;;  %v765_v10 = vpack.c.b16 %v758_v53, %v757_v26  ;;  %v777_v59 = vunpack.c.l.b16 %v2766_v2  ;;  %v464_v41 = vshrl.u32 %v405_v35, 16 }
  0x41   : > { %1437 = vmatpush.bf16.msrb.mxu1 %v2193_v55  ;;  %1524 = vmatpush.bf16.msrb.mxu0 %v2217_v63  ;;  %v615_v55 = vrot.slane %v613_v24, 4  ;;  %v618_v63 = vrot.slane %v616_v42, 5  ;;  %v624_v24 = vrot.slane %v622_v16, 5  ;;  %v467_v42 = vshll.u32 %v405_v35, 16 }
  0x42   : > { %1582 = vmatpush.bf16.msrb.mxu2 %v2233_v52  ;;  %v798_v12 = vpack.c.b16 %v2757_v61, %v758_v53  ;;  %1503 = vmatmul.bf16.gmra.mxu3 %v790_v1  ;;  %v2811_v44 = vpack.c.b16 %v536_v23, %v536_v23  ;;  %v630_v52 = vshll.u32 %v2703_v25, 16  ;;  %v466_v26 = vrot.slane %v464_v41, 7 }
  0x43   : > { %v619_v15 = vor.u32 %v618_v63, %v615_v55  ;;  %1611 = vmatpush.bf16.msrb.mxu3 %v2241_v40  ;;  %v611_v53 = vsel %vm2680_vm11, %v606_v58, %v610_v6  ;;  %v2225_v6 = vld [vmem:[%s3027_s3 + $0x150] sm:$0xff] }
  0x44   : > { %v469_v62 = vor.u32 %v467_v42, %v466_v26  ;;  %v701_v1 = vrot.slane %v2811_v44, 5  ;;  %v632_v48 = vrot.slane %v630_v52, 5  ;;  %v2223_v52 = vld [vmem:[%s3027_s3 + $0x140] sm:$0xff] }
  0x45   : > { %1438 = vmatpush.bf16.msrb.mxu1 %v2192_v17  ;;  %1525 = vmatpush.bf16.msrb.mxu0 %v2216_v30  ;;  %v2253_v17 = vld [vmem:[%s3027_s3 + $0x230] sm:$0xff]  ;;  %v778_v30 = vunpack.c.l.b16 %v2770_v8  ;;  %v620_v7 = vrot.slane %v619_v15, 4 }
  0x46   : > { %1583 = vmatpush.bf16.msrb.mxu2 %v2232_v11  ;;  %v498_v15 = vsel %vm2458_vm4, 0, %v469_v62  ;;  %v636_v11 = vshll.u32 %v2708_v27, 16 }
  0x47   : > { %v2817_v45 = vpack.c.b16 %v778_v30, %v777_v59  ;;  %v625_v54 = vsel %vm2680_vm11, %v620_v7, %v624_v24  ;;  %v511_v35 = vsel %vm2464_vm5, %v498_v15, 0 }
  0x48   : > { %v2842_v13 = vunpack.c.l.b16 %v625_v54  ;;  %v638_v40 = vrot.slane %v636_v11, 5 }
  0x49   : > { %1439 = vmatpush.bf16.msrb.mxu1 %v2191_v47  ;;  %1526 = vmatpush.bf16.msrb.mxu0 %v2215_v31  ;;  %v549_v47 = vpack.c.b16 %v2616_v20, %v2616_v20  ;;  %v2809_v31 = vpack.c.b16 %v2619_v21, %v2619_v21  ;;  %v633_v20 = vor.u32 %v632_v48, %v629_v4  ;;  %v2248_v4 = vld [vmem:[%s3027_s3 + $0x208] sm:$0xff] }
  0x4a   : > { %1584 = vmatpush.bf16.msrb.mxu2 %v2231_v38  ;;  %v2869_v38 = vunpack.c.l.b16 %v511_v35 }
  0x4b   : > { %v641_v55 = vshrl.u32 %v549_v47, 16  ;;  %v644_v56 = vshll.u32 %v549_v47, 16  ;;  %v1887_v14 = vrot.slane %v549_v47, 9  ;;  %v1888_v25 = vrot.slane %v2809_v31, 9  ;;  %v2224_v47 = vld [vmem:[%s3027_s3 + $0x148] sm:$0xff] }
  0x4c   : > { %1440 = vmatmul.bf16.vlgmr.msrb.gmra.mxu1 %v765_v10  ;;  %1527 = vmatmul.bf16.vlgmr.msrb.gmra.mxu0 %v798_v12  ;;  %v2251_v10 = vld [vmem:[%s3027_s3 + $0x220] sm:$0xff]  ;;  %v760_v12 = vunpack.c.l.b16 %v611_v53  ;;  %v2883_v41 = vpack.c.b16 %v2869_v38, %v2869_v38  ;;  %v655_v53 = vshrl.u32 %v2809_v31, 16  ;;  %v658_v54 = vshll.u32 %v2809_v31, 16 }
  0x4d   : > { %1548 = vmatpush.bf16.msra.mxu1 %v2230_v50  ;;  %1635 = vmatpush.bf16.msra.mxu0 %v2752_v32  ;;  %v2805_v50 = vpack.c.b16 %v534_v19, %v534_v19  ;;  %v643_v16 = vrot.slane %v641_v55, 4  ;;  %v646_v19 = vrot.slane %v644_v56, 5  ;;  %v705_v55 = vunpack.c.h.b16 %v511_v35 }
  0x4e   : > { %2286 = vmatpush.bf16.msra.mxu2 %v2752_v32  ;;  %v2240_v32 = vld [vmem:[%s3027_s3 + $0x1c8] sm:$0xff]  ;;  %v799_v5 = vpack.c.b16 %v2842_v13, %v760_v12  ;;  %v712_v62 = vshll.u32 %v2883_v41, 16  ;;  %v792_v48 = vpack.c.b16 %v2869_v38, %v2619_v21 }
  0x4f   : > { %1479 = vmatmul.bf16.gmra.mxu2 %v2817_v45  ;;  %v697_v63 = vrot.slane %v2805_v50, 5  ;;  %1612 = vmatpush.bf16.msrb.mxu3 %v2240_v32  ;;  %v647_v58 = vor.u32 %v646_v19, %v643_v16  ;;  %v650_v7 = vshll.u32 %v2805_v50, 16  ;;  %v2239_v50 = vld [vmem:[%s3027_s3 + $0x1c0] sm:$0xff]  ;;  %v2906_v31 = vpack.c.b16 %v705_v55, %v705_v55 }
  0x51   : > { %1549 = vmatpush.bf16.msra.mxu1 %v2229_v9  ;;  %1636 = vmatpush.bf16.msra.mxu0 %v2253_v17  ;;  %v2226_v9 = vld [vmem:[%s3027_s3 + $0x158] sm:$0xff]  ;;  %v2850_v23 = vsel %vm2547_vm8, %v1887_v14, %v697_v63  ;;  %v648_v42 = vrot.slane %v647_v58, 4  ;;  %v709_v14 = vshrl.u32 %v2883_v41, 16  ;;  %v2249_v63 = vld [vmem:[%s3027_s3 + $0x210] sm:$0xff]  ;;  %v366_v58 = vmul.f32 0.0, %v2760_v0 }
  0x52   : > { %2287 = vmatpush.bf16.msra.mxu2 %v2253_v17  ;;  %v2861_v17 = vpack.c.b16 %v760_v12, %v2757_v61  ;;  %1508 = vmatmul.bf16.gmra.mxu3 %v791_v22  ;;  %v779_v27 = vunpack.c.l.b16 %v2850_v23  ;;  %v634_v61 = vrot.slane %v633_v20, 4  ;;  %v714_v12 = vrot.slane %v712_v62, 5 }
  0x53   : > { %1613 = vmatpush.bf16.msrb.mxu3 %v2239_v50  ;;  %v711_v32 = vrot.slane %v709_v14, 4  ;;  %v664_v22 = vshll.u32 %v2811_v44, 16 }
  0x54   : > { %v639_v26 = vsel %vm2680_vm11, %v634_v61, %v638_v40  ;;  %v376_v61 = vpack.c.bf16 %v366_v58, %v366_v58  ;;  %v808_v40 = vpack.c.b16 %v777_v59, %v776_v28 }
  0x55   : > { %1550 = vmatpush.bf16.msra.mxu1 %v2228_v57  ;;  %1637 = vmatpush.bf16.msra.mxu0 %v2252_v37  ;;  %v2854_v57 = vsel %vm2547_vm8, %v1888_v25, %v701_v1  ;;  %v762_v25 = vunpack.c.l.b16 %v639_v26  ;;  %v715_v11 = vor.u32 %v714_v12, %v711_v32  ;;  %v666_v21 = vrot.slane %v664_v22, 5 }
  0x56   : > { %2288 = vmatpush.bf16.msra.mxu2 %v2252_v37  ;;  %v780_v24 = vunpack.c.l.b16 %v2854_v57  ;;  %v2250_v37 = vld [vmem:[%s3027_s3 + $0x218] sm:$0xff]  ;;  %v396_v50 = vunpack.c.l.b16 %v376_v61 }
  0x57   : > { %v767_v15 = vpack.c.b16 %v762_v25, %v2842_v13  ;;  %v716_v35 = vrot.slane %v715_v11, 4 }
  0x58   : > { %v2889_v51 = vpack.c.b16 %v780_v24, %v779_v27 }
  0x59   : > { %1551 = vmatpush.bf16.msra.mxu1 %v2227_v49  ;;  %1638 = vmatpush.bf16.msra.mxu0 %v2251_v10  ;;  %v652_v49 = vrot.slane %v650_v7, 5 }
  0x5a   : > { %2289 = vmatpush.bf16.msra.mxu2 %v2251_v10  ;;  %v660_v10 = vrot.slane %v658_v54, 5 }
  0x5b   : > { %v653_v56 = vsel %vm2680_vm11, %v648_v42, %v652_v49  ;;  %v406_v42 = vpack.c.b16 %v396_v50, %v396_v50 }
  0x5c   : > { %1445 = vmatmul.bf16.gmra.mxu1 %v2861_v17  ;;  %1532 = vmatmul.bf16.gmra.mxu0 %v799_v5  ;;  %v763_v1 = vunpack.c.l.b16 %v653_v56  ;;  %v2247_v5 = vld [vmem:[%s3027_s3 + $0x200] sm:$0xff] }
  0x5d   : > { %1552 = vmatpush.bf16.msra.mxu1 %v2226_v9  ;;  %1639 = vmatpush.bf16.msra.mxu0 %v2250_v37  ;;  %v657_v9 = vrot.slane %v655_v53, 4  ;;  %v474_v53 = vshll.u32 %v406_v42, 16 }
  0x5e   : > { %2290 = vmatpush.bf16.msra.mxu2 %v2250_v37  ;;  %v800_v16 = vpack.c.b16 %v763_v1, %v762_v25 }
  0x5f   : > { %1484 = vmatmul.bf16.gmra.mxu2 %v2889_v51  ;;  %v661_v19 = vor.u32 %v660_v10, %v657_v9  ;;  %v1889_v10 = vrot.slane %v2883_v41, 9 }
  0x61   : > { %1553 = vmatpush.bf16.msra.mxu1 %v2225_v6  ;;  %1640 = vmatpush.bf16.msra.mxu0 %v2249_v63  ;;  %v718_v6 = vshll.u32 %v2906_v31, 16  ;;  %v662_v20 = vrot.slane %v661_v19, 4 }
  0x62   : > { %2291 = vmatpush.bf16.msra.mxu2 %v2249_v63  ;;  %1513 = vmatmul.bf16.gmra.mxu3 %v792_v48 }
  0x63   : > { %v720_v13 = vrot.slane %v718_v6, 5  ;;  %v667_v44 = vsel %vm2680_vm11, %v662_v20, %v666_v21  ;;  %v2318_v6 = vld [vmem:[%s3028_s4] ss:$0 sm:$0xff] }
  0x65   : > { %1554 = vmatpush.bf16.msra.mxu1 %v2224_v47  ;;  %1641 = vmatpush.bf16.msra.mxu0 %v2248_v4  ;;  %v721_v7 = vsel %vm2680_vm11, %v716_v35, %v720_v13  ;;  %v764_v47 = vunpack.c.l.b16 %v667_v44 }
  0x66   : > { %2292 = vmatpush.bf16.msra.mxu2 %v2248_v4  ;;  %v797_v37 = vunpack.c.l.b16 %v721_v7 }
  0x67   : > { %v768_v0 = vpack.c.b16 %v764_v47, %v763_v1 }
  0x68   : > { %v801_v49 = vpack.c.b16 %v797_v37, %v764_v47 }
  0x69   : > { %1555 = vmatpush.bf16.msra.mxu1 %v2223_v52  ;;  %1642 = vmatpush.bf16.msra.mxu0 %v2247_v5  ;;  %v471_v52 = vshrl.u32 %v406_v42, 16 }
  0x6a   : > { %2293 = vmatpush.bf16.msra.mxu2 %v2247_v5 }
  0x6b   : > { %v473_v26 = vrot.slane %v471_v52, 7 }
  0x6c   : > { %1450 = vmatmul.bf16.gmra.mxu1 %v767_v15  ;;  %1537 = vmatmul.bf16.gmra.mxu0 %v800_v16 }
  0x6d   : > { %v476_v54 = vor.u32 %v474_v53, %v473_v26 }
  0x6f   : > { %1585 = vmatmul.bf16.vlgmr.msrb.gmra.mxu2 %v2669_v60  ;;  %v499_v60 = vsel %vm2458_vm4, 0, %v476_v54 }
  0x70   : > { %v512_v18 = vsel %vm2464_vm5, %v499_v60, 0 }
  0x71   : > { %v727_v28 = vunpack.c.l.b16 %v512_v18  ;;  %v728_v59 = vunpack.c.h.b16 %v512_v18 }
  0x72   : > { %1614 = vmatmul.bf16.vlgmr.msrb.gmra.mxu3 %v2861_v17 }
  0x73   : > { %v729_v2 = vpack.c.b16 %v727_v28, %v727_v28  ;;  %v730_v56 = vpack.c.b16 %v728_v59, %v728_v59 }
  0x75   : > { %v732_v17 = vshrl.u32 %v729_v2, 16  ;;  %v735_v55 = vshll.u32 %v729_v2, 16  ;;  %v741_v62 = vshll.u32 %v730_v56, 16  ;;  %v1890_v1 = vrot.slane %v729_v2, 9 }
  0x76   : > { %v747_v9 = vrot.slane %v730_v56, 5 }
  0x77   : > { %v734_v39 = vrot.slane %v732_v17, 4  ;;  %v737_v14 = vrot.slane %v735_v55, 5  ;;  %v743_v63 = vrot.slane %v741_v62, 5 }
  0x78   : > { %v748_v3 = vsel %vm2547_vm8, %v1890_v1, %v747_v9 }
  0x79   : > { %v820_v48 = vunpack.c.l.b16 %v748_v3 }
  0x7c   : > { %1455 = vmatmul.bf16.gmra.mxu1 %v768_v0  ;;  %1542 = vmatmul.bf16.gmra.mxu0 %v801_v49 }
  0x7f   : > { %1590 = vmatmul.bf16.gmra.mxu2 %v2536_v29  ;;  %v738_v29 = vor.u32 %v737_v14, %v734_v39 }
  0x81   : > { %v739_v46 = vrot.slane %v738_v29, 4 }
  0x82   : > { %1619 = vmatmul.bf16.gmra.mxu3 %v767_v15 }
  0x8c   : > { %1556 = vmatmul.bf16.vlgmr.msra.gmra.mxu1 %v2718_v34  ;;  %1643 = vmatmul.bf16.vlgmr.msra.gmra.mxu0 %v2723_v36  ;;  %v815_v34 = vpack.c.b16 %v727_v28, %v2869_v38  ;;  %v744_v36 = vsel %vm2680_vm11, %v739_v46, %v743_v63 }
  0x8d   : > { %v817_v25 = vunpack.c.l.b16 %v744_v36 }
  0x8f   : > { %1595 = vmatmul.bf16.gmra.mxu2 %v2649_v43  ;;  %v724_v43 = vrot.slane %v2906_v31, 5  ;;  %v818_v32 = vpack.c.b16 %v817_v25, %v797_v37 }
  0x91   : > { %v725_v38 = vsel %vm2547_vm8, %v1889_v10, %v724_v43 }
  0x92   : > { %1624 = vmatmul.bf16.gmra.mxu3 %v768_v0  ;;  %v806_v31 = vunpack.c.l.b16 %v725_v38 }
  0x94   : > { %v821_v41 = vpack.c.b16 %v820_v48, %v806_v31 }
  0x9c   : > { %1561 = vmatmul.bf16.gmra.mxu1 %v808_v40  ;;  %1648 = vmatmul.bf16.gmra.mxu0 %v2817_v45  ;;  %v809_v45 = vpack.c.b16 %v779_v27, %v778_v30  ;;  %v810_v30 = vpack.c.b16 %v806_v31, %v780_v24 }
  0x9f   : > { %1600 = vmatmul.bf16.gmra.mxu2 %v815_v34 }
  0xa2   : > { %1629 = vmatmul.bf16.gmra.mxu3 %v818_v32 }
  0xa9   : > { %v1422_v12 = vpop.f32.mrf.mxu1  ;;  %v1412_v4 = vpop.f32.mrf.mxu0 }
  0xaa   : > { %v1413_v20 = vadd.f32 %v2318_v6, %v1412_v4  ;;  %v1423_v29 = vadd.f32 %v2318_v6, %v1422_v12 }
  0xac   : > { %1566 = vmatmul.bf16.gmra.mxu1 %v809_v45  ;;  %1653 = vmatmul.bf16.gmra.mxu0 %v2889_v51 }
  0xaf   : > { %1658 = vmatmul.bf16.vlgmr.msra.gmra.mxu2 %v821_v41 }
  0xb1   : > { %v1424_v15 = vpop.f32.mrf.mxu1  ;;  %v1414_v8 = vpop.f32.mrf.mxu0 }
  0xb2   : > { %v1470_v23 = vpop.f32.mrf.mxu2  ;;  %v1415_v7 = vadd.f32 %v2318_v6, %v1414_v8  ;;  %v1425_v9 = vadd.f32 %v2318_v6, %v1424_v15 }
  0xb5   : > { %v1499_v19 = vpop.f32.mrf.mxu3 }
  0xb9   : > { %v1427_v27 = vpop.f32.mrf.mxu1  ;;  %v1417_v16 = vpop.f32.mrf.mxu0 }
  0xba   : > { %v1472_v33 = vpop.f32.mrf.mxu2  ;;  %v1418_v49 = vadd.f32 %v2318_v6, %v1417_v16  ;;  %v1428_v12 = vadd.f32 %v2318_v6, %v1427_v27 }
  0xbc   : > { %1571 = vmatmul.bf16.gmra.mxu1 %v810_v30 }
  0xbd   : > { %v2958_v5 = vpop.f32.mrf.mxu3 }
  0xc1   : > { %v1429_v22 = vpop.f32.mrf.mxu1  ;;  %v1419_v11 = vpop.f32.mrf.mxu0 }
  0xc2   : > { %v1475_v51 = vpop.f32.mrf.mxu2  ;;  %v1420_v2 = vadd.f32 %v2318_v6, %v1419_v11  ;;  %v1430_v16 = vadd.f32 %v2318_v6, %v1429_v22 }
  0xc5   : > { %v1504_v44 = vpop.f32.mrf.mxu3 }
  0xc9   : > { %v1441_v21 = vpop.f32.mrf.mxu1  ;;  %v1528_v35 = vpop.f32.mrf.mxu0 }
  0xca   : > { %v1442_v13 = vadd.f32 %v1441_v21, %v1413_v20  ;;  %v1477_v24 = vpop.f32.mrf.mxu2 }
  0xcc   : > { %v1471_v57 = vadd.f32 %v1470_v23, %v1442_v13 }
  0xcd   : > { %v2960_v0 = vpop.f32.mrf.mxu3 }
  0xce   : > { %v1500_v58 = vadd.f32 %v1499_v19, %v1471_v57 }
  0xd0   : > { %v1529_v61 = vadd.f32 %v1528_v35, %v1500_v58 }
  0xd1   : > { %v1443_v40 = vpop.f32.mrf.mxu1  ;;  %v1530_v47 = vpop.f32.mrf.mxu0 }
  0xd2   : > { %v1444_v37 = vadd.f32 %v1443_v40, %v1415_v7  ;;  %v1480_v42 = vpop.f32.mrf.mxu2 }
  0xd4   : > { %v1473_v50 = vadd.f32 %v1472_v33, %v1444_v37 }
  0xd5   : > { %v1509_v28 = vpop.f32.mrf.mxu3 }
  0xd6   : > { %v1502_v57 = vadd.f32 %v2958_v5, %v1473_v50 }
  0xd9   : > { %v1446_v52 = vpop.f32.mrf.mxu1  ;;  %v1533_v26 = vpop.f32.mrf.mxu0 }
  0xda   : > { %v1447_v53 = vadd.f32 %v1446_v52, %v1418_v49  ;;  %v1482_v60 = vpop.f32.mrf.mxu2 }
  0xdc   : > { %v1476_v54 = vadd.f32 %v1475_v51, %v1447_v53 }
  0xdd   : > { %v2964_v62 = vpop.f32.mrf.mxu3 }
  0xde   : > { %v1505_v18 = vadd.f32 %v1504_v44, %v1476_v54  ;;  %v1531_v44 = vadd.f32 %v1530_v47, %v1502_v57 }
  0xe0   : > { %v1534_v59 = vadd.f32 %v1533_v26, %v1505_v18 }
  0xe1   : > { %v1448_v17 = vpop.f32.mrf.mxu1  ;;  %v2962_v55 = vpop.f32.mrf.mxu0 }
  0xe2   : > { %v1449_v56 = vadd.f32 %v1448_v17, %v1420_v2  ;;  %v1485_v14 = vpop.f32.mrf.mxu2 }
  0xe4   : > { %v1478_v39 = vadd.f32 %v1477_v24, %v1449_v56 }
  0xe5   : > { %v2966_v1 = vpop.f32.mrf.mxu3 }
  0xe9   : > { %v1451_v46 = vpop.f32.mrf.mxu1  ;;  %v1538_v63 = vpop.f32.mrf.mxu0 }
  0xea   : > { %v1452_v34 = vadd.f32 %v1451_v46, %v1423_v29  ;;  %v1487_v25 = vpop.f32.mrf.mxu2 }
  0xec   : > { %v1481_v36 = vadd.f32 %v1480_v42, %v1452_v34 }
  0xed   : > { %v2974_v31 = vpop.f32.mrf.mxu3 }
  0xee   : > { %v1510_v43 = vadd.f32 %v1509_v28, %v1481_v36  ;;  %v1507_v28 = vadd.f32 %v2960_v0, %v1478_v39 }
  0xf0   : > { %v2968_v10 = vadd.f32 %v1538_v63, %v1510_v43  ;;  %v1536_v46 = vadd.f32 %v2962_v55, %v1507_v28 }
  0xf1   : > { %v1453_v32 = vpop.f32.mrf.mxu1  ;;  %v2970_v45 = vpop.f32.mrf.mxu0 }
  0xf2   : > { %v1454_v38 = vadd.f32 %v1453_v32, %v1425_v9  ;;  %v1586_v4 = vpop.f32.mrf.mxu2 }
  0xf4   : > { %v2972_v3 = vadd.f32 %v1482_v60, %v1454_v38 }
  0xf5   : > { %v1615_v15 = vpop.f32.mrf.mxu3 }
  0xf9   : > { %v1456_v48 = vpop.f32.mrf.mxu1  ;;  %v2976_v41 = vpop.f32.mrf.mxu0 }
  0xfa   : > { %v1457_v8 = vadd.f32 %v1456_v48, %v1428_v12  ;;  %v1588_v30 = vpop.f32.mrf.mxu2 }
  0xfc   : > { %v2978_v23 = vadd.f32 %v1485_v14, %v1457_v8 }
  0xfd   : > { %v1617_v21 = vpop.f32.mrf.mxu3 }
 0x101   : > { %v1458_v33 = vpop.f32.mrf.mxu1  ;;  %v2980_v19 = vpop.f32.mrf.mxu0 }
 0x102   : > { %v1459_v11 = vadd.f32 %v1458_v33, %v1430_v16  ;;  %v1591_v20 = vpop.f32.mrf.mxu2  ;;  %v1512_v16 = vadd.f32 %v2964_v62, %v2972_v3 }
 0x104   : > { %v2982_v51 = vadd.f32 %v1487_v25, %v1459_v11 }
 0x105   : > { %v1620_v37 = vpop.f32.mrf.mxu3 }
 0x109   : > { %v1557_v35 = vpop.f32.mrf.mxu1  ;;  %v1644_v27 = vpop.f32.mrf.mxu0 }
 0x10a   : > { %v1558_v13 = vadd.f32 %v1557_v35, %v1529_v61  ;;  %v1593_v58 = vpop.f32.mrf.mxu2 }
 0x10c   : > { %v1587_v24 = vadd.f32 %v1586_v4, %v1558_v13 }
 0x10d   : > { %v1622_v56 = vpop.f32.mrf.mxu3 }
 0x10e   : > { %v1616_v7 = vadd.f32 %v1615_v15, %v1587_v24 }
 0x110   : > { %v1645_v49 = vadd.f32 %v1644_v27, %v1616_v7 }
 0x111   : > { %v1559_v40 = vpop.f32.mrf.mxu1  ;;  %v1646_v22 = vpop.f32.mrf.mxu0 }
 0x112   : > { %v1560_v6 = vadd.f32 %v1559_v40, %v1531_v44  ;;  %v1596_v52 = vpop.f32.mrf.mxu2  ;;  %v1694_v54 = vmul.f32 %v1645_v49, %v1645_v49 }
 0x114   : > { %v1589_v42 = vadd.f32 %v1588_v30, %v1560_v6 }
 0x115   : > { %v1625_v4 = vpop.f32.mrf.mxu3 }
 0x116   : > { %v1618_v26 = vadd.f32 %v1617_v21, %v1589_v42  ;;  %v1541_v21 = vadd.f32 %v2970_v45, %v1512_v16 }
 0x118   : > { %v1647_v53 = vadd.f32 %v1646_v22, %v1618_v26 }
 0x119   : > { %v1562_v5 = vpop.f32.mrf.mxu1  ;;  %v1649_v61 = vpop.f32.mrf.mxu0 }
 0x11a   : > { %v2258_v47 = vpack.c.bf16 %v1647_v53, %v1645_v49  ;;  %v1680_v50 = vadd.f32 %v1647_v53, %v1645_v49  ;;  %v1695_v60 = vmul.f32 %v1647_v53, %v1647_v53  ;;  %v1563_v18 = vadd.f32 %v1562_v5, %v1534_v59  ;;  %v1598_v29 = vpop.f32.mrf.mxu2 }
 0x11b   : > { %v1517_v53 = vadd.f32 %v2974_v31, %v2982_v51 }
 0x11c   : > { %2259 = vst [vmem:[%s2989_s13] sm:$0xff] %v2258_v47   ;;  %v1702_v2 = vadd.f32 %v1695_v60, %v1694_v54  ;;  %v1592_v17 = vadd.f32 %v1591_v20, %v1563_v18 }
 0x11d   : > { %v1627_v27 = vpop.f32.mrf.mxu3 }
 0x11e   : > { %v1621_v14 = vadd.f32 %v1620_v37, %v1592_v17 }
 0x120   : > { %v1650_v63 = vadd.f32 %v1649_v61, %v1621_v14  ;;  %v1546_v61 = vadd.f32 %v2980_v19, %v1517_v53 }
 0x121   : > { %v1564_v34 = vpop.f32.mrf.mxu1  ;;  %v1651_v36 = vpop.f32.mrf.mxu0 }
 0x122   : > { %v1681_v25 = vadd.f32 %v1680_v50, %v1650_v63  ;;  %v1696_v43 = vmul.f32 %v1650_v63, %v1650_v63  ;;  %v1565_v9 = vadd.f32 %v1564_v34, %v1536_v46  ;;  %v1601_v39 = vpop.f32.mrf.mxu2 }
 0x124   : > { %v1703_v32 = vadd.f32 %v1702_v2, %v1696_v43  ;;  %v1594_v38 = vadd.f32 %v1593_v58, %v1565_v9 }
 0x125   : > { %v1630_v26 = vpop.f32.mrf.mxu3 }
 0x126   : > { %v1623_v59 = vadd.f32 %v1622_v56, %v1594_v38 }
 0x128   : > { %v1652_v0 = vadd.f32 %v1651_v36, %v1623_v59 }
 0x129   : > { %v1567_v12 = vpop.f32.mrf.mxu1  ;;  %v1654_v55 = vpop.f32.mrf.mxu0 }
 0x12a   : > { %v2263_v48 = vpack.c.bf16 %v1652_v0, %v1650_v63  ;;  %v1682_v8 = vadd.f32 %v1681_v25, %v1652_v0  ;;  %v1697_v30 = vmul.f32 %v1652_v0, %v1652_v0  ;;  %v1568_v15 = vadd.f32 %v1567_v12, %v2968_v10  ;;  %v1603_v44 = vpop.f32.mrf.mxu2 }
 0x12b   : > { %v1515_v10 = vadd.f32 %v2966_v1, %v2978_v23 }
 0x12c   : > { %2275 = vst [vmem:[%s2989_s13 + $0x8] sm:$0xff] %v2263_v48   ;;  %v1704_v33 = vadd.f32 %v1703_v32, %v1697_v30  ;;  %v1597_v11 = vadd.f32 %v1596_v52, %v1568_v15 }
 0x12d   : > { %v1544_v22 = vadd.f32 %v2976_v41, %v1515_v10  ;;  %v1632_v17 = vpop.f32.mrf.mxu3 }
 0x12e   : > { %v1626_v20 = vadd.f32 %v1625_v4, %v1597_v11 }
 0x130   : > { %v1655_v35 = vadd.f32 %v1654_v55, %v1626_v20 }
 0x131   : > { %v1569_v13 = vpop.f32.mrf.mxu1  ;;  %v1656_v62 = vpop.f32.mrf.mxu0 }
 0x132   : > { %v1683_v57 = vadd.f32 %v1682_v8, %v1655_v35  ;;  %v1698_v24 = vmul.f32 %v1655_v35, %v1655_v35  ;;  %v1570_v58 = vadd.f32 %v1569_v13, %v1541_v21  ;;  %v1659_v1 = vpop.f32.mrf.mxu2 }
 0x134   : > { %v1705_v7 = vadd.f32 %v1704_v33, %v1698_v24  ;;  %v1599_v40 = vadd.f32 %v1598_v29, %v1570_v58 }
 0x136   : > { %v1628_v3 = vadd.f32 %v1627_v27, %v1599_v40 }
 0x138   : > { %v1657_v6 = vadd.f32 %v1656_v62, %v1628_v3 }
 0x139   : > { %v1572_v37 = vpop.f32.mrf.mxu1 }
 0x13a   : > { %v2268_v45 = vpack.c.bf16 %v1657_v6, %v1655_v35  ;;  %v1684_v42 = vadd.f32 %v1683_v57, %v1657_v6  ;;  %v1699_v49 = vmul.f32 %v1657_v6, %v1657_v6  ;;  %v1573_v52 = vadd.f32 %v1572_v37, %v1544_v22  ;;  %v1661_v14 = vpop.f32.mrf.mxu2 }
 0x13c   : > { %2276 = vst [vmem:[%s2989_s13 + $0x10] sm:$0xff] %v2268_v45   ;;  %v1706_v54 = vadd.f32 %v1705_v7, %v1699_v49  ;;  %v1602_v5 = vadd.f32 %v1601_v39, %v1573_v52 }
 0x13e   : > { %v1631_v23 = vadd.f32 %v1630_v26, %v1602_v5 }
 0x140   : > { %v1660_v47 = vadd.f32 %v1659_v1, %v1631_v23 }
 0x141   : > { %v1574_v41 = vpop.f32.mrf.mxu1 }
 0x142   : > { %v1685_v50 = vadd.f32 %v1684_v42, %v1660_v47  ;;  %v1700_v60 = vmul.f32 %v1660_v47, %v1660_v47  ;;  %v1575_v18 = vadd.f32 %v1574_v41, %v1546_v61 }
 0x144   : > { %v1707_v28 = vadd.f32 %v1706_v54, %v1700_v60  ;;  %v1604_v2 = vadd.f32 %v1603_v44, %v1575_v18 }
 0x146   : > { %v1633_v56 = vadd.f32 %v1632_v17, %v1604_v2 }
 0x148   : > { %v1662_v31 = vadd.f32 %v1661_v14, %v1633_v56 }
 0x14a   : > { %v2273_v51 = vpack.c.bf16 %v1662_v31, %v1660_v47  ;;  %v1686_v29 = vadd.f32 %v1685_v50, %v1662_v31  ;;  %v1701_v46 = vmul.f32 %v1662_v31, %v1662_v31 }
 0x14c   : > { %2277 = vst [vmem:[%s2989_s13 + $0x18] sm:$0xff] %v2273_v51   ;;  %v1687_v63 = vrot.slane %v1686_v29, 4  ;;  %v1708_v34 = vadd.f32 %v1707_v28, %v1701_v46 }
 0x14e   : > { %v1688_v19 = vadd.f32 %v1687_v63, %v1686_v29  ;;  %v1709_v36 = vrot.slane %v1708_v34, 4 }
 0x150   : > { %v1689_v25 = vrot.slane %v1688_v19, 2  ;;  %v1710_v43 = vadd.f32 %v1709_v36, %v1708_v34 }
 0x152   : > { %v1690_v9 = vadd.f32 %v1689_v25, %v1688_v19  ;;  %v1711_v32 = vrot.slane %v1710_v43, 2 }
 0x154   : > { %v1691_v38 = vrot.slane %v1690_v9, 1  ;;  %v1712_v59 = vadd.f32 %v1711_v32, %v1710_v43 }
 0x156   : > { %v1692_v4 = vadd.f32 %v1691_v38, %v1690_v9  ;;  %v1713_v0 = vrot.slane %v1712_v59, 1 }
 0x158   : > { %1693 = vst [vmem:[%s328_s15] sm:$0x1] %v1692_v4  ;;  %v1714_v39 = vadd.f32 %v1713_v0, %v1712_v59 }
 0x15a   : > { %1715 = vst [vmem:[%s334_s19] sm:$0x1] %v1714_v39 }
 0x15b PF: > { %s18_s2 = sadd.s32 1, %s2341_s2   ;;  %s3040_s24 = smov %s2337_s1 }
 0x15c   : > { %p15_p5 = scmp.ge.s32.totalorder %s18_s2, 4   ;;  %s3041_s1 = smov %s3043_s25 }
 0x15e   :  { %17 = sbr.rel (!%p15_p5) target bundleno = 2 (0x2), region = 96 }

// kernel: transformer_block3d_forward.4
= control target key start
LH: loop header
LB: loop body
LE: loop exit
PB: predicated region body
PF: predicated region fallthrough
CT: control target
= control target key end

     0   :  { %s2886_s24 = smov 0   ;;  %s2888_s25 = smov 0   ;;  %s3977_s0 = inlined_call_operand.vmem [shape: bf16[2,8,8,128], index: 0, kind: input, shape index: {}]   ;;  %s3978_s1 = inlined_call_operand.vmem [shape: f32[1,128], index: 1, kind: input, shape index: {}]   ;;  %s3979_s2 = inlined_call_operand.vmem [shape: f32[1,128], index: 2, kind: input, shape index: {}]   ;;  %s3980_s3 = inlined_call_operand.vmem [shape: bf16[1152,128], index: 3, kind: input, shape index: {}]   ;;  %s3981_s4 = inlined_call_operand.vmem [shape: f32[1,128], index: 4, kind: input, shape index: {}]   ;;  %s3982_s5 = inlined_call_operand.vmem [shape: bf16[2,8,8,128], index: 5, kind: output, shape index: {0}]   ;;  %s3983_s6 = inlined_call_operand.vmem [shape: f32[2,1,1,128], index: 6, kind: output, shape index: {1}]   ;;  %s3984_s7 = inlined_call_operand.vmem [shape: f32[2,1,1,128], index: 7, kind: output, shape index: {2}]  }
   0x1   :  { %s2890_s26 = smov 0  }
   0x2 LB: > { %s30_s27 = sadd.s32 1, %s2839_s25  ;;  %p2313_p0 = scmp.ge.s32.totalorder %s2843_s26, 1  ;;  %s2843_s26 = sphi %s2890_s26, %s18_s26   ;;  %s2839_s25 = sphi %s2888_s25, %s4022_s25   ;;  %s2835_s24 = sphi %s2886_s24, %s4021_s24  }
   0x3   : > { %p32_p1 = scmp.ge.s32.totalorder %s30_s27, 2  ;;  %p260_p2 = scmp.lt.s32.totalorder %s2843_s26, 3 }
   0x5   : > { %s4024_s27 = smov (%p32_p1, %s30_s27), 0  ;;  %p261_p3 = pnand %p2313_p0, %p260_p2 }
   0x6   : > { %p308_p4 = scmp.lt.s32.totalorder (!%p261_p3), %s2835_s24, 1 }
   0x7   : > { %264 = sbr.rel (%p261_p3) target bundleno = 443 (0x1bb), region = 40 }
   0xc   : > { %v2628_v0 = vld [vmem:[%s3980_s3 + $0x38] sm:$0xff]  ;;  %v2627_v2 = vld [vmem:[%s3980_s3 + $0x30] sm:$0xff]  ;;  %s4026_s24 = smov (!%p308_p4, %s2835_s24), 1  ;;  %v2626_v5 = vld [vmem:[%s3980_s3 + $0x28] sm:$0xff] }
   0xd   : > { %v2644_v1 = vld [vmem:[%s3980_s3 + $0xb8] sm:$0xff]  ;;  %2735 = vmatpush.bf16.msra.mxu1 %v2628_v0  ;;  %1841 = vmatpush.bf16.msra.mxu0 %v2628_v0  ;;  %v2643_v3 = vld [vmem:[%s3980_s3 + $0xb0] sm:$0xff]  ;;  %s2619_s17 = sshll.u32 %s4026_s24, 5  ;;  %v2642_v6 = vld [vmem:[%s3980_s3 + $0xa8] sm:$0xff]  ;;  %s328_s9 = scalar_lea.vmem %s3983_s6, %s4026_s24 }
   0xe   : > { %1899 = vmatpush.bf16.msra.mxu2 %v2644_v1  ;;  %v2652_v4 = vld [vmem:[%s3980_s3 + $0xf8] sm:$0xff]  ;;  %v2651_v7 = vld [vmem:[%s3980_s3 + $0xf0] sm:$0xff]  ;;  %s2936_s28 = scalar_lea.vmem %s3977_s0, %s2619_s17  ;;  %v2945_v10 = vld [vmem:[%s3978_s1] ss:$0 sm:$0xff]  ;;  %s3946_s30 = scalar_lea.vmem %s3982_s5, %s2619_s17 }
   0xf   : > { %1928 = vmatpush.bf16.msra.mxu3 %v2652_v4  ;;  %v2939_v8 = vld [vmem:[%s2936_s28 + $0x8] sm:$0xff]   ;;  %v2730_v9 = vld [vmem:[%s2936_s28 + $0x10] sm:$0xff]   ;;  %v2951_v13 = vld [vmem:[%s3979_s2] ss:$0 sm:$0xff]  ;;  %s334_s12 = scalar_lea.vmem %s3984_s7, %s4026_s24 }
  0x10   : > { %v2700_v11 = vunpack.c.h.bf16 %v2939_v8  ;;  %v2703_v12 = vunpack.c.l.bf16 %v2730_v9  ;;  %v2694_v14 = vld [vmem:[%s2936_s28] sm:$0xff]   ;;  %v2650_v17 = vld [vmem:[%s3980_s3 + $0xe8] sm:$0xff]  ;;  %v2704_v30 = vunpack.c.h.bf16 %v2730_v9  ;;  %v2978_v31 = vld [vmem:[%s2936_s28 + $0x18] sm:$0xff]   ;;  %v2699_v48 = vunpack.c.l.bf16 %v2939_v8 }
  0x11   : > { %2736 = vmatpush.bf16.msra.mxu1 %v2627_v2  ;;  %1842 = vmatpush.bf16.msra.mxu0 %v2627_v2  ;;  %v2695_v15 = vunpack.c.l.bf16 %v2694_v14  ;;  %v702_v16 = vld [vmem:[%s2936_s28] sm:$0xf]  ;;  %v2624_v32 = vld [vmem:[%s3980_s3 + $0x18] sm:$0xff]  ;;  %v2696_v35 = vunpack.c.h.bf16 %v2694_v14  ;;  %v2707_v41 = vunpack.c.l.bf16 %v2978_v31  ;;  %v2623_v45 = vld [vmem:[%s3980_s3 + $0x10] sm:$0xff] }
  0x12   : > { %1900 = vmatpush.bf16.msra.mxu2 %v2643_v3  ;;  %v360_v18 = vmul.f32 %v2945_v10, %v2700_v11  ;;  %v361_v19 = vmul.f32 %v2945_v10, %v2703_v12  ;;  %v703_v20 = vunpack.c.l.bf16 %v702_v16  ;;  %v2625_v21 = vld [vmem:[%s3980_s3 + $0x20] sm:$0xff]  ;;  %v2640_v36 = vld [vmem:[%s3980_s3 + $0x98] sm:$0xff]  ;;  %v362_v44 = vmul.f32 %v2945_v10, %v2704_v30  ;;  %v2639_v50 = vld [vmem:[%s3980_s3 + $0x90] sm:$0xff] }
  0x13   : > { %1929 = vmatpush.bf16.msra.mxu3 %v2651_v7  ;;  %v357_v22 = vmul.f32 %v2945_v10, %v2695_v15  ;;  %v2641_v23 = vld [vmem:[%s3980_s3 + $0xa0] sm:$0xff]  ;;  %v358_v49 = vmul.f32 %v2945_v10, %v2696_v35  ;;  %v363_v56 = vmul.f32 %v2945_v10, %v2707_v41  ;;  %v2622_v59 = vld [vmem:[%s3980_s3 + $0x8] sm:$0xff]  ;;  %v3028_v61 = vmul.f32 %v2945_v10, %v2699_v48 }
  0x14   : > { %v372_v24 = vadd.f32 %v2951_v13, %v360_v18  ;;  %v373_v25 = vadd.f32 %v2951_v13, %v361_v19  ;;  %v704_v26 = vmul.f32 %v2945_v10, %v703_v20  ;;  %v3020_v58 = vadd.f32 %v2951_v13, %v362_v44  ;;  %v2621_v11 = vld [vmem:[%s3980_s3] sm:$0xff] }
  0x15   : > { %2737 = vmatpush.bf16.msra.mxu1 %v2626_v5  ;;  %1843 = vmatpush.bf16.msra.mxu0 %v2626_v5  ;;  %v2971_v27 = vadd.f32 %v2951_v13, %v357_v22  ;;  %v3031_v62 = vadd.f32 %v2951_v13, %v358_v49  ;;  %v3041_v5 = vadd.f32 %v2951_v13, %v363_v56 }
  0x16   : > { %1901 = vmatpush.bf16.msra.mxu2 %v2642_v6  ;;  %v2973_v28 = vmul.f32 0.70710677, %v372_v24  ;;  %v2975_v29 = vmul.f32 0.70710677, %v373_v25  ;;  %v2987_v34 = vadd.f32 %v2951_v13, %v704_v26  ;;  %v3035_v3 = vmul.f32 0.5, %v372_v24 }
  0x17   : > { %1930 = vmatpush.bf16.msra.mxu3 %v2650_v17  ;;  %v2984_v33 = vmul.f32 0.70710677, %v2971_v27  ;;  %v3037_v4 = vmul.f32 0.5, %v373_v25  ;;  %v3046_v9 = vmul.f32 0.70710677, %v3020_v58 }
  0x18   : > { %v412_v37 = vand.u32 2147483647, %v2973_v28  ;;  %v413_v38 = vand.u32 2147483647, %v2975_v29  ;;  %v2996_v40 = vmul.f32 0.70710677, %v2987_v34 }
  0x19   : > { %2738 = vmatpush.bf16.msra.mxu1 %v2625_v21  ;;  %1844 = vmatpush.bf16.msra.mxu0 %v2625_v21  ;;  %v409_v39 = vand.u32 2147483647, %v2984_v33  ;;  %vm396_vm6 = vcmp.ge.f32.partialorder %v2973_v28, 0.0  ;;  %vm397_vm9 = vcmp.ge.f32.partialorder %v2975_v29, 0.0 }
  0x1a   : > { %1902 = vmatpush.bf16.msra.mxu2 %v2641_v23  ;;  %v420_v42 = vmul.f32 0.3275911, %v412_v37  ;;  %v421_v43 = vmul.f32 0.3275911, %v413_v38  ;;  %v3004_v47 = vand.u32 2147483647, %v2996_v40 }
  0x1b   : > { %v417_v46 = vmul.f32 0.3275911, %v409_v39  ;;  %v628_v53 = vsub.f32 0.0, %v412_v37  ;;  %v629_v54 = vsub.f32 0.0, %v413_v38  ;;  %v625_v57 = vsub.f32 0.0, %v409_v39 }
  0x1c   : > { %v3011_v51 = vadd.f32 1.0, %v420_v42  ;;  %v3013_v52 = vadd.f32 1.0, %v421_v43  ;;  %v711_v60 = vmul.f32 0.3275911, %v3004_v47  ;;  %v737_v14 = vsub.f32 0.0, %v3004_v47 }
  0x1d   : > { %2739 = vmatpush.bf16.msra.mxu1 %v2624_v32  ;;  %1845 = vmatpush.bf16.msra.mxu0 %v2624_v32  ;;  %v3015_v55 = vadd.f32 1.0, %v417_v46  ;;  %v636_v1 = vmul.f32 %v628_v53, %v412_v37  ;;  %v637_v2 = vmul.f32 %v629_v54, %v413_v38  ;;  %v633_v8 = vmul.f32 %v625_v57, %v409_v39 }
  0x1e   : > { %1903 = vmatpush.bf16.msra.mxu2 %v2640_v36  ;;  %2779 = vrcp.f32 %v3011_v51  ;;  %v487_v63 = vand.u32 2147483647, %v3011_v51  ;;  %v489_v0 = vand.u32 2147483648, %v3011_v51  ;;  %v502_v6 = vand.u32 2147483647, %v3013_v52 }
  0x1f   : > { %2781 = vrcp.f32 %v3013_v52  ;;  %v504_v7 = vand.u32 2147483648, %v3013_v52  ;;  %vm483_vm0 = vweird.f32 %v3011_v51  ;;  %vm498_vm1 = vweird.f32 %v3013_v52 }
  0x20   : > { %2783 = vrcp.f32 %v3015_v55  ;;  %v3053_v12 = vadd.f32 1.0, %v711_v60  ;;  %vm3056_vm2 = vcmp.eq.f32.partialorder %v487_v63, 8.507059e+37  ;;  %v490_v17 = vor.u32 1.1754944e-38, %v489_v0 }
  0x21   : > { %2740 = vmatpush.bf16.msra.mxu1 %v2623_v45  ;;  %1846 = vmatpush.bf16.msra.mxu0 %v2623_v45  ;;  %v3060_v18 = vmul.f32 1.442695, %v636_v1  ;;  %v3062_v19 = vmul.f32 1.442695, %v637_v2  ;;  %v442_v22 = vand.u32 2147483647, %v3015_v55  ;;  %vm438_vm5 = vweird.f32 %v3015_v55 }
  0x22   : > { %1904 = vmatpush.bf16.msra.mxu2 %v2639_v50  ;;  %2785 = vrcp.f32 %v3053_v12  ;;  %v3068_v23 = vmul.f32 0.70710677, %v3041_v5  ;;  %vm3071_vm3 = vcmp.eq.f32.partialorder %v502_v6, 8.507059e+37  ;;  %v505_v26 = vor.u32 1.1754944e-38, %v504_v7 }
  0x23   : > { %v444_v30 = vand.u32 2147483648, %v3015_v55  ;;  %v3078_v36 = vand.u32 2147483647, %v3046_v9  ;;  %v641_v39 = vmul.f32 1.442695, %v633_v8  ;;  %vm3082_vm8 = vcmp.eq.f32.partialorder %v442_v22, 8.507059e+37 }
  0x24   : > { %v2780_v15 = vpop.eup %2779  ;;  %v738_v43 = vmul.f32 %v737_v14, %v3004_v47  ;;  %v3088_v44 = vand.u32 2147483647, %v3068_v23  ;;  %vm718_vm13 = vweird.f32 %v3053_v12  ;;  %v724_v60 = vand.u32 2147483648, %v3053_v12 }
  0x25   : > { %2741 = vmatpush.bf16.msra.mxu1 %v2622_v59  ;;  %1847 = vmatpush.bf16.msra.mxu0 %v2622_v59  ;;  %v2782_v20 = vpop.eup %2781  ;;  %v479_v21 = vmul.f32 %v2780_v15, %v3011_v51  ;;  %vm484_vm4 = vweird.f32 %v2780_v15  ;;  %v445_v49 = vor.u32 1.1754944e-38, %v444_v30  ;;  %v722_v51 = vand.u32 2147483647, %v3053_v12 }
  0x26   : > { %v494_v24 = vmul.f32 %v2782_v20, %v3013_v52  ;;  %v2784_v32 = vpop.eup %2783  ;;  %vm499_vm7 = vweird.f32 %v2782_v20  ;;  %vm3093_vm10 = vmor %vm483_vm0, %vm484_vm4  ;;  %v422_v54 = vmul.f32 0.3275911, %v3078_v36  ;;  %v423_v0 = vmul.f32 0.3275911, %v3088_v44 }
  0x27   : > { %v480_v35 = vsub.f32 1.0, %v479_v21  ;;  %v434_v38 = vmul.f32 %v2784_v32, %v3015_v55  ;;  %vm439_vm11 = vweird.f32 %v2784_v32  ;;  %vm3100_vm12 = vmor %vm498_vm1, %vm499_vm7  ;;  %vm3137_vm0 = vcmp.eq.f32.partialorder %v722_v51, 8.507059e+37 }
  0x28   : > { %v495_v37 = vsub.f32 1.0, %v494_v24  ;;  %v2786_v50 = vpop.eup %2785  ;;  %vm3113_vm14 = vmor %vm438_vm5, %vm439_vm11  ;;  %v3118_v1 = vadd.f32 1.0, %v422_v54  ;;  %v3131_v14 = vadd.f32 1.0, %v423_v0  ;;  %v725_v25 = vor.u32 1.1754944e-38, %v724_v60 }
  0x29   : > { %2742 = vmatpush.bf16.msra.mxu1 %v2621_v11  ;;  %1848 = vmatpush.bf16.msra.mxu0 %v2621_v11  ;;  %v481_v41 = vmul.f32 %v2780_v15, %v480_v35  ;;  %v435_v48 = vsub.f32 1.0, %v434_v38  ;;  %v714_v59 = vmul.f32 %v2786_v50, %v3053_v12  ;;  %vm719_vm15 = vweird.f32 %v2786_v50 }
  0x2a   : > { %v496_v46 = vmul.f32 %v2782_v20, %v495_v37  ;;  %2787 = vrcp.f32 %v3118_v1  ;;  %vm3148_vm1 = vmor %vm718_vm13, %vm719_vm15  ;;  %v2845_v37 = vmov -1.0   ;;  %v630_v29 = vsub.f32 0.0, %v3078_v36 }
  0x2b   : > { %v482_v53 = vadd.f32 %v2780_v15, %v481_v41  ;;  %v436_v57 = vmul.f32 %v2784_v32, %v435_v48  ;;  %v715_v8 = vsub.f32 1.0, %v714_v59  ;;  %2789 = vrcp.f32 %v3131_v14 }
  0x2c   : > { %v497_v56 = vadd.f32 %v2782_v20, %v496_v46  ;;  %v3157_v38 = vsel %vm396_vm6, 1.0, %v2845_v37  ;;  %2791 = vpow2.f32 %v3060_v18  ;;  %v3171_v28 = vsel %vm397_vm9, 1.0, %v2845_v37 }
  0x2d   : > { %v486_v63 = vsel %vm3093_vm10, %v2780_v15, %v482_v53  ;;  %v437_v7 = vadd.f32 %v2784_v32, %v436_v57  ;;  %2793 = vpow2.f32 %v3062_v19  ;;  %v517_v54 = vand.u32 2147483647, %v3118_v1 }
  0x2e   : > { %v3122_v2 = vsel %vm3056_vm2, %v490_v17, %v486_v63  ;;  %v501_v6 = vsel %vm3100_vm12, %v2782_v20, %v497_v56  ;;  %v716_v17 = vmul.f32 %v2786_v50, %v715_v8  ;;  %vm393_vm2 = vcmp.ge.f32.partialorder %v2984_v33, 0.0 }
  0x2f   : > { %v3128_v55 = vsel %vm3071_vm3, %v505_v26, %v501_v6  ;;  %v556_v11 = vmul.f32 1.0614054, %v3122_v2  ;;  %v441_v16 = vsel %vm3113_vm14, %v2784_v32, %v437_v7  ;;  %v739_v26 = vmul.f32 1.442695, %v738_v43 }
  0x30   : > { %v557_v15 = vmul.f32 1.0614054, %v3128_v55  ;;  %v3143_v22 = vsel %vm3082_vm8, %v445_v49, %v441_v16  ;;  %v717_v35 = vadd.f32 %v2786_v50, %v716_v17  ;;  %v3166_v45 = vpop.eup %2787  ;;  %2795 = vpow2.f32 %v641_v39 }
  0x31   : > { %v564_v21 = vadd.f32 -1.4531521, %v556_v11  ;;  %v553_v32 = vmul.f32 1.0614054, %v3143_v22  ;;  %v3178_v19 = vsel %vm393_vm2, 1.0, %v2845_v37  ;;  %2797 = vpow2.f32 %v739_v26  ;;  %v3185_v39 = vpop.eup %2789 }
  0x32   : > { %v565_v30 = vadd.f32 -1.4531521, %v557_v15  ;;  %v721_v43 = vsel %vm3148_vm1, %v2786_v50, %v717_v35  ;;  %vm513_vm3 = vweird.f32 %v3118_v1  ;;  %v509_v51 = vmul.f32 %v3166_v45, %v3118_v1  ;;  %v2792_v56 = vpop.eup %2791 }
  0x33   : > { %v572_v12 = vmul.f32 %v564_v21, %v3122_v2  ;;  %v561_v42 = vadd.f32 -1.4531521, %v553_v32  ;;  %v3175_v33 = vsel %vm3137_vm0, %v725_v25, %v721_v43  ;;  %v519_v60 = vand.u32 2147483648, %v3118_v1  ;;  %v2794_v52 = vpop.eup %2793 }
  0x34   : > { %v573_v41 = vmul.f32 %v565_v30, %v3128_v55  ;;  %v728_v50 = vmul.f32 1.0614054, %v3175_v33  ;;  %v524_v63 = vmul.f32 %v3185_v39, %v3131_v14  ;;  %v510_v7 = vsub.f32 1.0, %v509_v51  ;;  %v2636_v30 = vld [vmem:[%s3980_s3 + $0x78] sm:$0xff] }
  0x35   : > { %v580_v46 = vadd.f32 1.4214138, %v572_v12  ;;  %v569_v48 = vmul.f32 %v561_v42, %v3143_v22  ;;  %vm528_vm4 = vweird.f32 %v3131_v14  ;;  %vm708_vm5 = vcmp.ge.f32.partialorder %v2996_v40, 0.0  ;;  %v2649_v42 = vld [vmem:[%s3980_s3 + $0xe0] sm:$0xff]  ;;  %1870 = vmatpush.bf16.msrb.mxu1 %v2636_v30 }
  0x36   : > { %v581_v18 = vadd.f32 1.4214138, %v573_v41  ;;  %v729_v59 = vadd.f32 -1.4531521, %v728_v50  ;;  %v2796_v8 = vpop.eup %2795  ;;  %vm514_vm6 = vweird.f32 %v3166_v45  ;;  %v525_v16 = vsub.f32 1.0, %v524_v63  ;;  %v2638_v41 = vld [vmem:[%s3980_s3 + $0x88] sm:$0xff]  ;;  %1931 = vmatpush.bf16.msra.mxu3 %v2649_v42 }
  0x37   : > { %v588_v49 = vmul.f32 %v580_v46, %v3122_v2  ;;  %v577_v47 = vadd.f32 1.4214138, %v569_v48  ;;  %v3200_v17 = vpop.eup %2797  ;;  %v532_v24 = vand.u32 2147483647, %v3131_v14  ;;  %v534_v25 = vand.u32 2147483648, %v3131_v14  ;;  %vm3221_vm8 = vmor %vm513_vm3, %vm514_vm6  ;;  %v2635_v50 = vld [vmem:[%s3980_s3 + $0x70] sm:$0xff]  ;;  %1905 = vmatpush.bf16.msra.mxu2 %v2638_v41 }
  0x38   : > { %v589_v53 = vmul.f32 %v581_v18, %v3128_v55  ;;  %v730_v15 = vmul.f32 %v729_v59, %v3175_v33  ;;  %v511_v35 = vmul.f32 %v3166_v45, %v510_v7  ;;  %vm529_vm7 = vweird.f32 %v3185_v39 }
  0x39   : > { %v596_v57 = vadd.f32 -0.28449672, %v588_v49  ;;  %v585_v6 = vmul.f32 %v577_v47, %v3143_v22  ;;  %v520_v18 = vor.u32 1.1754944e-38, %v519_v60  ;;  %v526_v48 = vmul.f32 %v3185_v39, %v525_v16  ;;  %vm3237_vm10 = vmor %vm528_vm4, %vm529_vm7  ;;  %1871 = vmatpush.bf16.msrb.mxu1 %v2635_v50 }
  0x3a   : > { %v597_v0 = vadd.f32 -0.28449672, %v589_v53  ;;  %v731_v32 = vadd.f32 1.4214138, %v730_v15  ;;  %v512_v47 = vadd.f32 %v3166_v45, %v511_v35  ;;  %vm518_vm9 = vcmp.eq.f32.partialorder %v517_v54, 8.507059e+37 }
  0x3b   : > { %v604_v11 = vmul.f32 %v596_v57, %v3122_v2  ;;  %v593_v21 = vadd.f32 -0.28449672, %v585_v6  ;;  %vm3241_vm11 = vcmp.eq.f32.partialorder %v532_v24, 8.507059e+37  ;;  %v535_v59 = vor.u32 1.1754944e-38, %v534_v25 }
  0x3c   : > { %v605_v20 = vmul.f32 %v597_v0, %v3128_v55  ;;  %v732_v53 = vmul.f32 %v731_v32, %v3175_v33  ;;  %v527_v63 = vadd.f32 %v3185_v39, %v526_v48  ;;  %v631_v7 = vsub.f32 0.0, %v3088_v44 }
  0x3d   : > { %v612_v26 = vadd.f32 0.2548296, %v604_v11  ;;  %v601_v43 = vmul.f32 %v593_v21, %v3143_v22  ;;  %v377_v30 = vmul.f32 0.5, %v2971_v27  ;;  %vm925_vm12 = vcmask 1040384  }
  0x3e   : > { %v613_v12 = vadd.f32 0.2548296, %v605_v20  ;;  %v733_v54 = vadd.f32 -0.28449672, %v732_v53  ;;  %vm926_vm13 = vsmask.f32 256 }
  0x3f   : > { %v620_v49 = vmul.f32 %v612_v26, %v3122_v2  ;;  %v609_v51 = vadd.f32 0.2548296, %v601_v43  ;;  %vm938_vm14 = vcmask 1044480   ;;  %v3294_v53 = vmul.f32 0.70710677, %v3031_v62  ;;  %vm3325_vm0 = vmand %vm925_vm12, %vm926_vm13 }
  0x40   : > { %v621_v1 = vmul.f32 %v613_v12, %v3128_v55  ;;  %v516_v55 = vsel %vm3221_vm8, %v3166_v45, %v512_v47  ;;  %v734_v15 = vmul.f32 %v733_v54, %v3175_v33  ;;  %v706_v12 = vmul.f32 0.5, %v2987_v34  ;;  %v2637_v34 = vld [vmem:[%s3980_s3 + $0x80] sm:$0xff] }
  0x41   : > { %v660_v60 = vmul.f32 %v2792_v56, %v620_v49  ;;  %v617_v14 = vmul.f32 %v609_v51, %v3143_v22  ;;  %v3250_v6 = vsel %vm518_vm9, %v520_v18, %v516_v55  ;;  %v531_v56 = vsel %vm3237_vm10, %v3185_v39, %v527_v63  ;;  %1906 = vmatpush.bf16.msra.mxu2 %v2637_v34 }
  0x42   : > { %v661_v0 = vmul.f32 %v2794_v52, %v621_v1  ;;  %v558_v16 = vmul.f32 1.0614054, %v3250_v6  ;;  %v3260_v52 = vsel %vm3241_vm11, %v535_v59, %v531_v56  ;;  %v638_v22 = vmul.f32 %v630_v29, %v3078_v36 }
  0x43   : > { %v668_v11 = vsub.f32 1.0, %v660_v60  ;;  %v657_v20 = vmul.f32 %v2796_v8, %v617_v14  ;;  %v735_v24 = vadd.f32 0.2548296, %v734_v15  ;;  %v559_v25 = vmul.f32 1.0614054, %v3260_v52  ;;  %v2633_v15 = vld [vmem:[%s3980_s3 + $0x60] sm:$0xff] }
  0x44   : > { %v669_v45 = vsub.f32 1.0, %v661_v0  ;;  %v566_v26 = vadd.f32 -1.4531521, %v558_v16  ;;  %v709_v8 = vsel %vm708_vm5, 1.0, %v2845_v37  ;;  %v3298_v59 = vand.u32 2147483647, %v3294_v53 }
  0x45   : > { %v676_v21 = vmul.f32 %v668_v11, %v3157_v38  ;;  %v665_v32 = vsub.f32 1.0, %v657_v20  ;;  %v736_v36 = vmul.f32 %v735_v24, %v3175_v33  ;;  %v639_v38 = vmul.f32 %v631_v7, %v3088_v44  ;;  %v2648_v44 = vld [vmem:[%s3980_s3 + $0xd8] sm:$0xff]  ;;  %v2647_v7 = vld [vmem:[%s3980_s3 + $0xd0] sm:$0xff] }
  0x46   : > { %v677_v39 = vmul.f32 %v669_v45, %v3171_v28  ;;  %v567_v42 = vadd.f32 -1.4531521, %v559_v25  ;;  %v574_v28 = vmul.f32 %v566_v26, %v3250_v6  ;;  %v2660_v33 = vld [vmem:[%s3980_s3 + $0x138] sm:$0xff]  ;;  %1932 = vmatpush.bf16.msra.mxu3 %v2648_v44  ;;  %vm939_vm15 = vsmask.f32 4352  ;;  %v2659_v11 = vld [vmem:[%s3980_s3 + $0x130] sm:$0xff] }
  0x47   : > { %v684_v35 = vadd.f32 1.0, %v676_v21  ;;  %v673_v41 = vmul.f32 %v665_v32, %v3178_v19  ;;  %v741_v40 = vmul.f32 %v3200_v17, %v736_v36  ;;  %v651_v19 = vmul.f32 1.442695, %v638_v22  ;;  %v2634_v17 = vld [vmem:[%s3980_s3 + $0x68] sm:$0xff]  ;;  %1957 = vmatpush.bf16.msrb.mxu0 %v2660_v33  ;;  %vm3331_vm1 = vmand %vm938_vm14, %vm939_vm15 }
  0x48   : > { %v685_v29 = vadd.f32 1.0, %v677_v39  ;;  %v575_v46 = vmul.f32 %v567_v42, %v3260_v52  ;;  %v582_v18 = vadd.f32 1.4214138, %v574_v28  ;;  %v653_v50 = vmul.f32 1.442695, %v639_v38  ;;  %1872 = vmatpush.bf16.msrb.mxu1 %v2634_v17  ;;  %v2646_v25 = vld [vmem:[%s3980_s3 + $0xc8] sm:$0xff] }
  0x49   : > { %v692_v27 = vmul.f32 %v684_v35, %v3035_v3  ;;  %v681_v3 = vadd.f32 1.0, %v673_v41  ;;  %v742_v49 = vsub.f32 1.0, %v741_v40  ;;  %2799 = vpow2.f32 %v651_v19  ;;  %v2658_v26 = vld [vmem:[%s3980_s3 + $0x128] sm:$0xff] }
  0x4a   : > { %v693_v43 = vmul.f32 %v685_v29, %v3037_v4  ;;  %v583_v4 = vadd.f32 1.4214138, %v575_v46  ;;  %v590_v51 = vmul.f32 %v582_v18, %v3250_v6  ;;  %2801 = vpow2.f32 %v653_v50  ;;  %1933 = vmatpush.bf16.msra.mxu3 %v2647_v7 }
  0x4b   : > { %v809_v48 = vpack.c.bf16 %v692_v27, %v692_v27  ;;  %v689_v1 = vmul.f32 %v681_v3, %v377_v30  ;;  %v743_v57 = vmul.f32 %v742_v49, %v709_v8  ;;  %1958 = vmatpush.bf16.msrb.mxu0 %v2659_v11  ;;  %v418_v39 = vmul.f32 0.3275911, %v3298_v59 }
  0x4c   : > { %v810_v47 = vpack.c.bf16 %v693_v43, %v693_v43  ;;  %v591_v55 = vmul.f32 %v583_v4, %v3260_v52  ;;  %v598_v63 = vadd.f32 -0.28449672, %v590_v51  ;;  %1873 = vmatpush.bf16.msrb.mxu1 %v2633_v15  ;;  %v3321_v41 = vadd.f32 %v2951_v13, %v3028_v61  ;;  %v2645_v51 = vld [vmem:[%s3980_s3 + $0xc0] sm:$0xff] }
  0x4d   : > { %v829_v2 = vunpack.c.l.b16 %v809_v48  ;;  %v806_v54 = vpack.c.bf16 %v689_v1, %v689_v1  ;;  %v744_v14 = vadd.f32 1.0, %v743_v57  ;;  %v3336_v3 = vadd.f32 1.0, %v418_v39 }
  0x4e   : > { %v830_v60 = vunpack.c.l.b16 %v810_v47  ;;  %v599_v45 = vadd.f32 -0.28449672, %v591_v55  ;;  %v606_v20 = vmul.f32 %v598_v63, %v3250_v6  ;;  %1934 = vmatpush.bf16.msra.mxu3 %v2646_v25  ;;  %vm398_vm2 = vcmp.ge.f32.partialorder %v3046_v9, 0.0  ;;  %v2632_v47 = vld [vmem:[%s3980_s3 + $0x58] sm:$0xff]  ;;  %v2631_v63 = vld [vmem:[%s3980_s3 + $0x50] sm:$0xff] }
  0x4f   : > { %v839_v0 = vpack.c.b16 %v829_v2, %v829_v2  ;;  %v826_v16 = vunpack.c.l.b16 %v806_v54  ;;  %v745_v24 = vmul.f32 %v744_v14, %v706_v12  ;;  %v2800_v36 = vpop.eup %2799  ;;  %1959 = vmatpush.bf16.msrb.mxu0 %v2658_v26  ;;  %2803 = vrcp.f32 %v3336_v3  ;;  %v2657_v2 = vld [vmem:[%s3980_s3 + $0x120] sm:$0xff] }
  0x50   : > { %v840_v56 = vpack.c.b16 %v830_v60, %v830_v60  ;;  %v607_v35 = vmul.f32 %v599_v45, %v3260_v52  ;;  %v614_v29 = vadd.f32 0.2548296, %v606_v20  ;;  %v2802_v44 = vpop.eup %2801  ;;  %vm399_vm3 = vcmp.ge.f32.partialorder %v3068_v23, 0.0  ;;  %1874 = vmatpush.bf16.msrb.mxu1 %v2632_v47 }
  0x51   : > { %v874_v22 = vshrl.u32 %v839_v0, 16  ;;  %v877_v21 = vshll.u32 %v839_v0, 16  ;;  %v836_v8 = vpack.c.b16 %v826_v16, %v826_v16  ;;  %v799_v38 = vmul.f32 0.0, %v745_v24 }
  0x52   : > { %v881_v30 = vshrl.u32 %v840_v56, 16  ;;  %v884_v32 = vshll.u32 %v840_v56, 16  ;;  %v615_v34 = vadd.f32 0.2548296, %v607_v35  ;;  %v622_v43 = vmul.f32 %v614_v29, %v3250_v6  ;;  %1935 = vmatpush.bf16.msra.mxu3 %v2645_v51 }
  0x53   : > { %v876_v12 = vrot.slane %v874_v22, 7  ;;  %v853_v27 = vshrl.u32 %v836_v8, 16  ;;  %v856_v40 = vshll.u32 %v836_v8, 16  ;;  %v805_v61 = vpack.c.bf16 %v799_v38, %v799_v38  ;;  %1960 = vmatpush.bf16.msrb.mxu0 %v2657_v2 }
  0x54   : > { %v883_v42 = vrot.slane %v881_v30, 7  ;;  %v623_v18 = vmul.f32 %v615_v34, %v3260_v52  ;;  %v662_v50 = vmul.f32 %v2800_v36, %v622_v43  ;;  %v2676_v52 = vld [vmem:[%s3980_s3 + $0x1b8] sm:$0xff]  ;;  %v3378_v11 = vmul.f32 0.70710677, %v3321_v41  ;;  %1875 = vmatpush.bf16.msrb.mxu1 %v2631_v63 }
  0x55   : > { %v879_v33 = vor.u32 %v877_v21, %v876_v12  ;;  %v855_v46 = vrot.slane %v853_v27, 7  ;;  %v825_v49 = vunpack.c.l.b16 %v805_v61  ;;  %2015 = vmatpush.bf16.msrb.mxu2 %v2676_v52  ;;  %v406_v16 = vsel %vm398_vm2, 1.0, %v2845_v37  ;;  %v3393_v24 = vpop.eup %2803 }
  0x56   : > { %v886_v17 = vor.u32 %v884_v32, %v883_v42  ;;  %v663_v55 = vmul.f32 %v2802_v44, %v623_v18  ;;  %v670_v7 = vsub.f32 1.0, %v662_v50  ;;  %v382_v22 = vmul.f32 0.5, %v3020_v58 }
  0x57   : > { %v932_v48 = vsel %vm3325_vm0, 0, %v879_v33  ;;  %v858_v4 = vor.u32 %v856_v40, %v855_v46  ;;  %v835_v54 = vpack.c.b16 %v825_v49, %v825_v49  ;;  %v407_v21 = vsel %vm399_vm3, 1.0, %v2845_v37 }
  0x58   : > { %v933_v6 = vsel %vm3325_vm0, 0, %v886_v17  ;;  %v3350_v1 = vsel %vm3331_vm1, %v932_v48, 0  ;;  %v671_v39 = vsub.f32 1.0, %v663_v55  ;;  %v383_v30 = vmul.f32 0.5, %v3041_v5 }
  0x59   : > { %v3364_v57 = vsel %vm3331_vm1, %v933_v6, 0  ;;  %v3367_v60 = vunpack.c.l.b16 %v3350_v1  ;;  %v929_v14 = vsel %vm3325_vm0, 0, %v858_v4  ;;  %v846_v15 = vshrl.u32 %v835_v54, 16 }
  0x5a   : > { %v3373_v0 = vunpack.c.l.b16 %v3364_v57  ;;  %v849_v56 = vshll.u32 %v835_v54, 16  ;;  %v942_v20 = vsel %vm3331_vm1, %v929_v14, 0  ;;  %v678_v32 = vmul.f32 %v670_v7, %v406_v16 }
  0x5b   : > { %v848_v25 = vrot.slane %v846_v15, 7  ;;  %v3395_v26 = vunpack.c.l.b16 %v942_v20  ;;  %v962_v9 = vunpack.c.h.b16 %v942_v20  ;;  %v3400_v8 = vand.u32 2147483647, %v3378_v11 }
  0x5c   : > { %v3385_v45 = vpack.c.b16 %v3373_v0, %v3367_v60  ;;  %v449_v58 = vmul.f32 %v3393_v24, %v3336_v3  ;;  %v679_v12 = vmul.f32 %v671_v39, %v407_v21  ;;  %vm1106_vm4 = vcmask 1042432  }
  0x5d   : > { %v851_v23 = vor.u32 %v849_v56, %v848_v25  ;;  %v3406_v35 = vpack.c.b16 %v3395_v26, %v3395_v26  ;;  %v3408_v36 = vpack.c.b16 %v962_v9, %v962_v9  ;;  %vm1107_vm5 = vcmask 1046532  }
  0x5e   : > { %1859 = vmatmul.bf16.vlgmr.msra.gmra.mxu1 %v3385_v45  ;;  %v686_v38 = vadd.f32 1.0, %v678_v32  ;;  %v450_v29 = vsub.f32 1.0, %v449_v58  ;;  %v687_v34 = vadd.f32 1.0, %v679_v12  ;;  %vm3417_vm6 = vmor %vm1106_vm4, %vm1107_vm5  ;;  %v419_v46 = vmul.f32 0.3275911, %v3400_v8 }
  0x5f   : > { %v928_v5 = vsel %vm3325_vm0, 0, %v851_v23  ;;  %v2320_v42 = vrot.slane %v3406_v35, 9  ;;  %v1115_v27 = vrot.slane %v3408_v36, 5  ;;  %vm453_vm7 = vweird.f32 %v3336_v3 }
  0x60   : > { %v941_v40 = vsel %vm3331_vm1, %v928_v5, 0  ;;  %v694_v44 = vmul.f32 %v686_v38, %v382_v22  ;;  %v451_v33 = vmul.f32 %v3393_v24, %v450_v29  ;;  %v695_v18 = vmul.f32 %v687_v34, %v383_v30 }
  0x61   : > { %v959_v61 = vunpack.c.l.b16 %v941_v40  ;;  %v960_v43 = vunpack.c.h.b16 %v941_v40  ;;  %vm454_vm8 = vweird.f32 %v3393_v24  ;;  %v3432_v4 = vsel %vm3417_vm6, %v2320_v42, %v1115_v27 }
  0x62   : > { %v811_v48 = vpack.c.bf16 %v694_v44, %v694_v44  ;;  %v452_v49 = vadd.f32 %v3393_v24, %v451_v33  ;;  %v812_v52 = vpack.c.bf16 %v695_v18, %v695_v18  ;;  %vm3434_vm9 = vmor %vm453_vm7, %vm454_vm8  ;;  %v457_v54 = vand.u32 2147483647, %v3336_v3 }
  0x63   : > { %v3424_v50 = vpack.c.b16 %v959_v61, %v959_v61  ;;  %v3426_v47 = vpack.c.b16 %v960_v43, %v960_v43  ;;  %v1187_v6 = vpack.c.b16 %v3395_v26, %v959_v61  ;;  %v427_v63 = vadd.f32 1.0, %v419_v46 }
  0x64   : > { %v831_v51 = vunpack.c.l.b16 %v811_v48  ;;  %v459_v14 = vand.u32 2147483648, %v3336_v3  ;;  %v832_v15 = vunpack.c.l.b16 %v812_v52  ;;  %v1212_v16 = vunpack.c.l.b16 %v3432_v4 }
  0x65   : > { %v1111_v55 = vrot.slane %v3426_v47, 5  ;;  %1849 = vmatmul.bf16.vlgmr.msra.gmra.mxu0 %v1187_v6  ;;  %v2319_v7 = vrot.slane %v3424_v50, 9  ;;  %v456_v20 = vsel %vm3434_vm9, %v3393_v24, %v452_v49  ;;  %vm458_vm10 = vcmp.eq.f32.partialorder %v457_v54, 8.507059e+37 }
  0x66   : > { %v841_v56 = vpack.c.b16 %v831_v51, %v831_v51  ;;  %v842_v21 = vpack.c.b16 %v832_v15, %v832_v15  ;;  %v460_v30 = vor.u32 1.1754944e-38, %v459_v14  ;;  %2805 = vrcp.f32 %v427_v63 }
  0x67   : > { %v1112_v22 = vsel %vm3417_vm6, %v2319_v7, %v1111_v55  ;;  %v626_v38 = vsub.f32 0.0, %v3298_v59  ;;  %vm468_vm11 = vweird.f32 %v427_v63  ;;  %v472_v49 = vand.u32 2147483647, %v427_v63 }
  0x68   : > { %v888_v25 = vshrl.u32 %v841_v56, 16  ;;  %v891_v9 = vshll.u32 %v841_v56, 16  ;;  %v1211_v39 = vunpack.c.l.b16 %v1112_v22  ;;  %v895_v32 = vshrl.u32 %v842_v21, 16 }
  0x69   : > { %v898_v58 = vshll.u32 %v842_v21, 16  ;;  %v461_v12 = vsel %vm458_vm10, %v460_v30, %v456_v20  ;;  %v634_v34 = vmul.f32 %v626_v38, %v3298_v59  ;;  %v474_v6 = vand.u32 2147483648, %v427_v63 }
  0x6a   : > { %v890_v3 = vrot.slane %v888_v25, 7  ;;  %v1219_v23 = vpack.c.b16 %v1212_v16, %v1211_v39  ;;  %v897_v29 = vrot.slane %v895_v32, 7  ;;  %v554_v5 = vmul.f32 1.0614054, %v461_v12 }
  0x6b   : > { %v643_v52 = vmul.f32 1.442695, %v634_v34  ;;  %v2708_v54 = vunpack.c.h.bf16 %v2978_v31  ;;  %v475_v56 = vor.u32 1.1754944e-38, %v474_v6  ;;  %vm473_vm14 = vcmp.eq.f32.partialorder %v472_v49, 8.507059e+37 }
  0x6c   : > { %v893_v24 = vor.u32 %v891_v9, %v890_v3  ;;  %1907 = vmatmul.bf16.vlgmr.msra.gmra.mxu2 %v1219_v23  ;;  %v900_v42 = vor.u32 %v898_v58, %v897_v29  ;;  %v562_v40 = vadd.f32 -1.4531521, %v554_v5  ;;  %v2806_v44 = vpop.eup %2805  ;;  %v627_v31 = vsub.f32 0.0, %v3400_v8 }
  0x6d   : > { %v464_v46 = vmul.f32 %v2806_v44, %v427_v63  ;;  %vm469_vm12 = vweird.f32 %v2806_v44  ;;  %v364_v15 = vmul.f32 %v2945_v10, %v2708_v54  ;;  %2807 = vpow2.f32 %v643_v52 }
  0x6e   : > { %v934_v27 = vsel %vm3325_vm0, 0, %v893_v24  ;;  %v935_v61 = vsel %vm3325_vm0, 0, %v900_v42  ;;  %v570_v48 = vmul.f32 %v562_v40, %v461_v12  ;;  %vm470_vm13 = vmor %vm468_vm11, %vm469_vm12  ;;  %v635_v58 = vmul.f32 %v627_v31, %v3400_v8 }
  0x6f   : > { %v3456_v33 = vsel %vm3331_vm1, %v934_v27, 0  ;;  %v3465_v18 = vsel %vm3331_vm1, %v935_v61, 0  ;;  %v465_v51 = vsub.f32 1.0, %v464_v46  ;;  %v3479_v21 = vadd.f32 %v2951_v13, %v364_v15 }
  0x70   : > { %v3461_v43 = vunpack.c.l.b16 %v3456_v33  ;;  %v3468_v59 = vunpack.c.l.b16 %v3465_v18  ;;  %v578_v2 = vadd.f32 1.4214138, %v570_v48  ;;  %vm394_vm15 = vcmp.ge.f32.partialorder %v3294_v53, 0.0 }
  0x71   : > { %v466_v14 = vmul.f32 %v2806_v44, %v465_v51  ;;  %v3483_v39 = vmul.f32 0.70710677, %v3479_v21  ;;  %v402_v42 = vsel %vm394_vm15, 1.0, %v2845_v37  ;;  %v645_v27 = vmul.f32 1.442695, %v635_v58 }
  0x72   : > { %v3473_v55 = vpack.c.b16 %v3468_v59, %v3461_v43  ;;  %v586_v7 = vmul.f32 %v578_v2, %v461_v12  ;;  %v995_v8 = vshrl.u32 %v3424_v50, 16  ;;  %v998_v53 = vshll.u32 %v3424_v50, 16  ;;  %v2675_v50 = vld [vmem:[%s3980_s3 + $0x1b0] sm:$0xff] }
  0x73   : > { %v467_v20 = vadd.f32 %v2806_v44, %v466_v14  ;;  %v3486_v63 = vand.u32 2147483647, %v3483_v39  ;;  %v2808_v32 = vpop.eup %2807  ;;  %vm395_vm2 = vcmp.ge.f32.partialorder %v3378_v11, 0.0  ;;  %v3497_v6 = vmul.f32 0.5, %v3321_v41  ;;  %v2656_v11 = vld [vmem:[%s3980_s3 + $0x118] sm:$0xff]  ;;  %v2630_v41 = vld [vmem:[%s3980_s3 + $0x48] sm:$0xff]  ;;  %2016 = vmatpush.bf16.msrb.mxu2 %v2675_v50 }
  0x74   : > { %1864 = vmatmul.bf16.gmra.mxu1 %v3473_v55  ;;  %v594_v22 = vadd.f32 -0.28449672, %v586_v7  ;;  %v997_v2 = vrot.slane %v995_v8, 4  ;;  %v403_v54 = vsel %vm395_vm2, 1.0, %v2845_v37  ;;  %v1000_v7 = vrot.slane %v998_v53, 5  ;;  %1961 = vmatpush.bf16.msrb.mxu0 %v2656_v11  ;;  %v2684_v8 = vld [vmem:[%s3980_s3 + $0x1f8] sm:$0xff] }
  0x75   : > { %v471_v25 = vsel %vm470_vm13, %v2806_v44, %v467_v20  ;;  %v424_v38 = vmul.f32 0.3275911, %v3486_v63  ;;  %v378_v44 = vmul.f32 0.5, %v3031_v62  ;;  %v1004_v62 = vshll.u32 %v3426_v47, 16  ;;  %1876 = vmatpush.bf16.msrb.mxu1 %v2630_v41  ;;  %2044 = vmatpush.bf16.msrb.mxu3 %v2684_v8 }
  0x76   : > { %v602_v9 = vmul.f32 %v594_v22, %v461_v12  ;;  %v476_v10 = vsel %vm473_vm14, %v475_v56, %v471_v25  ;;  %v1009_v47 = vshrl.u32 %v3406_v35, 16  ;;  %v1012_v22 = vshll.u32 %v3406_v35, 16  ;;  %v2673_v35 = vld [vmem:[%s3980_s3 + $0x1a0] sm:$0xff] }
  0x77   : > { %v555_v30 = vmul.f32 1.0614054, %v476_v10  ;;  %v432_v5 = vadd.f32 1.0, %v424_v38  ;;  %v1018_v38 = vshll.u32 %v3408_v36, 16  ;;  %v2655_v36 = vld [vmem:[%s3980_s3 + $0x110] sm:$0xff]  ;;  %vm400_vm11 = vcmp.ge.f32.partialorder %v3483_v39, 0.0 }
  0x78   : > { %v610_v3 = vadd.f32 0.2548296, %v602_v9  ;;  %vm991_vm8 = vsmask.f32 3328  ;;  %vm992_vm9 = vsmask.f32 7440  ;;  %1962 = vmatpush.bf16.msrb.mxu0 %v2655_v36 }
  0x79   : > { %v563_v13 = vadd.f32 -1.4531521, %v555_v30  ;;  %2809 = vrcp.f32 %v432_v5  ;;  %v549_v25 = vand.u32 2147483648, %v432_v5  ;;  %vm543_vm3 = vweird.f32 %v432_v5  ;;  %vm3538_vm10 = vmor %vm991_vm8, %vm992_vm9 }
  0x7a   : > { %v618_v23 = vmul.f32 %v610_v3, %v461_v12  ;;  %2811 = vpow2.f32 %v645_v27  ;;  %v1011_v3 = vrot.slane %v1009_v47, 4 }
  0x7b   : > { %v571_v24 = vmul.f32 %v563_v13, %v476_v10  ;;  %v547_v13 = vand.u32 2147483647, %v432_v5 }
  0x7c   : > { %v658_v29 = vmul.f32 %v2808_v32, %v618_v23  ;;  %v1014_v32 = vrot.slane %v1012_v22, 5  ;;  %v1006_v23 = vrot.slane %v1004_v62, 5  ;;  %v2654_v62 = vld [vmem:[%s3980_s3 + $0x108] sm:$0xff] }
  0x7d   : > { %v579_v40 = vadd.f32 1.4214138, %v571_v24  ;;  %vm3517_vm7 = vcmp.eq.f32.partialorder %v547_v13, 8.507059e+37  ;;  %1963 = vmatpush.bf16.msrb.mxu0 %v2654_v62 }
  0x7e   : > { %v666_v34 = vsub.f32 1.0, %v658_v29 }
  0x7f   : > { %v587_v61 = vmul.f32 %v579_v40, %v476_v10  ;;  %v2810_v49 = vpop.eup %2809  ;;  %v550_v40 = vor.u32 1.1754944e-38, %v549_v25  ;;  %v968_v25 = vunpack.c.h.b16 %v3350_v1 }
  0x80   : > { %v674_v46 = vmul.f32 %v666_v34, %v402_v42  ;;  %v539_v14 = vmul.f32 %v2810_v49, %v432_v5  ;;  %v2812_v20 = vpop.eup %2811  ;;  %vm544_vm4 = vweird.f32 %v2810_v49  ;;  %v1015_v42 = vor.u32 %v1014_v32, %v1011_v3  ;;  %v2629_v5 = vld [vmem:[%s3980_s3 + $0x40] sm:$0xff] }
  0x81   : > { %v595_v12 = vadd.f32 -0.28449672, %v587_v61  ;;  %vm3513_vm5 = vmor %vm543_vm3, %vm544_vm4  ;;  %1877 = vmatpush.bf16.msrb.mxu1 %v2629_v5  ;;  %v2653_v3 = vld [vmem:[%s3980_s3 + $0x100] sm:$0xff]  ;;  %v974_v5 = vunpack.c.h.b16 %v3465_v18 }
  0x82   : > { %v682_v48 = vadd.f32 1.0, %v674_v46  ;;  %v540_v31 = vsub.f32 1.0, %v539_v14  ;;  %1964 = vmatpush.bf16.msrb.mxu0 %v2653_v3 }
  0x83   : > { %v603_v52 = vmul.f32 %v595_v12, %v476_v10 }
  0x84   : > { %v690_v51 = vmul.f32 %v682_v48, %v378_v44  ;;  %v541_v58 = vmul.f32 %v2810_v49, %v540_v31 }
  0x85   : > { %v611_v15 = vadd.f32 0.2548296, %v603_v52 }
  0x86   : > { %v807_v56 = vpack.c.bf16 %v690_v51, %v690_v51  ;;  %v542_v27 = vadd.f32 %v2810_v49, %v541_v58  ;;  %v1016_v51 = vrot.slane %v1015_v42, 4  ;;  %v3586_v42 = vpack.c.b16 %v3373_v0, %v3373_v0 }
  0x87   : > { %v619_v9 = vmul.f32 %v611_v15, %v476_v10  ;;  %v1001_v10 = vor.u32 %v1000_v7, %v997_v2  ;;  %v2668_v2 = vld [vmem:[%s3980_s3 + $0x178] sm:$0xff]  ;;  %v1020_v7 = vrot.slane %v1018_v38, 5 }
  0x88   : > { %v827_v30 = vunpack.c.l.b16 %v807_v56  ;;  %v546_v12 = vsel %vm3513_vm5, %v2810_v49, %v542_v27  ;;  %v2674_v49 = vld [vmem:[%s3980_s3 + $0x1a8] sm:$0xff]  ;;  %1986 = vmatpush.bf16.msra.mxu1 %v2668_v2  ;;  %v632_v27 = vsub.f32 0.0, %v3486_v63 }
  0x89   : > { %v659_v24 = vmul.f32 %v2812_v20, %v619_v9  ;;  %v1002_v53 = vrot.slane %v1001_v10, 4  ;;  %v1021_v50 = vsel %vm3538_vm10, %v1016_v51, %v1020_v7  ;;  %2017 = vmatpush.bf16.msrb.mxu2 %v2674_v49  ;;  %v970_v9 = vunpack.c.h.b16 %v3364_v57 }
  0x8a   : > { %v837_v29 = vpack.c.b16 %v827_v30, %v827_v30  ;;  %v3557_v31 = vunpack.c.l.b16 %v1021_v50  ;;  %v3582_v10 = vpack.c.b16 %v968_v25, %v968_v25  ;;  %v640_v2 = vmul.f32 %v632_v27, %v3486_v63  ;;  %v2666_v50 = vld [vmem:[%s3980_s3 + $0x168] sm:$0xff]  ;;  %v2672_v63 = vld [vmem:[%s3980_s3 + $0x198] sm:$0xff] }
  0x8b   : > { %v667_v34 = vsub.f32 1.0, %v659_v24  ;;  %v1007_v11 = vsel %vm3538_vm10, %v1002_v53, %v1006_v23  ;;  %v983_v23 = vpack.c.b16 %v3367_v60, %v3367_v60  ;;  %v2683_v24 = vld [vmem:[%s3980_s3 + $0x1f0] sm:$0xff] }
  0x8c   : > { %v860_v44 = vshrl.u32 %v837_v29, 16  ;;  %v863_v61 = vshll.u32 %v837_v29, 16  ;;  %v1195_v20 = vunpack.c.l.b16 %v1007_v11  ;;  %v2667_v29 = vld [vmem:[%s3980_s3 + $0x170] sm:$0xff]  ;;  %2045 = vmatpush.bf16.msrb.mxu3 %v2683_v24  ;;  %v1127_v51 = vrot.slane %v3582_v10, 5  ;;  %v2318_v24 = vld [vmem:[%s2936_s28 + $0x1c] sm:$0xf] }
  0x8d   : > { %v675_v48 = vmul.f32 %v667_v34, %v403_v54  ;;  %v3547_v54 = vsel %vm3517_vm7, %v550_v40, %v546_v12  ;;  %v3591_v40 = vpack.c.b16 %v970_v9, %v970_v9  ;;  %1987 = vmatpush.bf16.msra.mxu1 %v2667_v29  ;;  %2018 = vmatpush.bf16.msrb.mxu2 %v2673_v35  ;;  %v3618_v9 = vld [vmem:[%s3980_s3 + $0x238] sm:$0xff] }
  0x8e   : > { %v862_v52 = vrot.slane %v860_v44, 7  ;;  %v560_v41 = vmul.f32 1.0614054, %v3547_v54  ;;  %2073 = vmatpush.bf16.msra.mxu0 %v3618_v9 }
  0x8f   : > { %v683_v15 = vadd.f32 1.0, %v675_v48  ;;  %v3598_v48 = vpack.c.b16 %v3461_v43, %v3461_v43  ;;  %v1131_v7 = vrot.slane %v3591_v40, 5 }
  0x90   : > { %v865_v56 = vor.u32 %v863_v61, %v862_v52  ;;  %v568_v13 = vadd.f32 -1.4531521, %v560_v41  ;;  %v972_v61 = vunpack.c.h.b16 %v3456_v33  ;;  %v2323_v52 = vrot.slane %v983_v23, 9  ;;  %v2682_v41 = vld [vmem:[%s3980_s3 + $0x1e8] sm:$0xff] }
  0x91   : > { %v691_v47 = vmul.f32 %v683_v15, %v3497_v6  ;;  %v1203_v6 = vpack.c.b16 %v3557_v31, %v1195_v20  ;;  %v2324_v33 = vrot.slane %v3586_v42, 9  ;;  %v1051_v20 = vshrl.u32 %v983_v23, 16  ;;  %2046 = vmatpush.bf16.msrb.mxu3 %v2682_v41  ;;  %1988 = vmatpush.bf16.msra.mxu1 %v2666_v50  ;;  %v2681_v50 = vld [vmem:[%s3980_s3 + $0x1e0] sm:$0xff] }
  0x92   : > { %v930_v22 = vsel %vm3325_vm0, 0, %v865_v56  ;;  %v576_v44 = vmul.f32 %v568_v13, %v3547_v54  ;;  %v3604_v15 = vpack.c.b16 %v972_v61, %v972_v61  ;;  %v655_v13 = vmul.f32 1.442695, %v640_v2  ;;  %2019 = vmatpush.bf16.msrb.mxu2 %v2672_v63  ;;  %v2671_v63 = vld [vmem:[%s3980_s3 + $0x190] sm:$0xff] }
  0x93   : > { %v943_v30 = vsel %vm3331_vm1, %v930_v22, 0  ;;  %v808_v32 = vpack.c.bf16 %v691_v47, %v691_v47  ;;  %1878 = vmatmul.bf16.vlgmr.msrb.gmra.mxu1 %v1203_v6 }
  0x94   : > { %v3566_v58 = vunpack.c.l.b16 %v943_v30  ;;  %v964_v38 = vunpack.c.h.b16 %v943_v30  ;;  %v584_v49 = vadd.f32 1.4214138, %v576_v44  ;;  %v1054_v30 = vshll.u32 %v983_v23, 16 }
  0x95   : > { %v828_v1 = vunpack.c.l.b16 %v808_v32  ;;  %v1053_v32 = vrot.slane %v1051_v20, 4  ;;  %2813 = vpow2.f32 %v655_v13  ;;  %v2325_v20 = vrot.slane %v3598_v48, 9  ;;  %2047 = vmatpush.bf16.msrb.mxu3 %v2681_v50 }
  0x96   : > { %v1227_v57 = vpack.c.b16 %v3566_v58, %v3395_v26  ;;  %v979_v26 = vpack.c.b16 %v3566_v58, %v3566_v58  ;;  %v980_v12 = vpack.c.b16 %v964_v38, %v964_v38  ;;  %v592_v6 = vmul.f32 %v584_v49, %v3547_v54  ;;  %2020 = vmatpush.bf16.msrb.mxu2 %v2671_v63 }
  0x97   : > { %v838_v34 = vpack.c.b16 %v828_v1, %v828_v1  ;;  %v3625_v38 = vsel %vm3417_vm6, %v2323_v52, %v1127_v51  ;;  %v1056_v23 = vrot.slane %v1054_v30, 5  ;;  %v1088_v50 = vshll.u32 %v3604_v15, 16 }
  0x98   : > { %1936 = vmatmul.bf16.vlgmr.msra.gmra.mxu3 %v1227_v57  ;;  %v1023_v46 = vshrl.u32 %v979_v26, 16  ;;  %v1026_v36 = vshll.u32 %v979_v26, 16  ;;  %v2321_v22 = vrot.slane %v979_v26, 9  ;;  %v1119_v25 = vrot.slane %v980_v12, 5 }
  0x99   : > { %v867_v8 = vshrl.u32 %v838_v34, 16  ;;  %v870_v53 = vshll.u32 %v838_v34, 16  ;;  %v1032_v3 = vshll.u32 %v980_v12, 16  ;;  %v3629_v57 = vsel %vm3417_vm6, %v2324_v33, %v1131_v7 }
  0x9a   : > { %v1025_v56 = vrot.slane %v1023_v46, 4  ;;  %v1028_v11 = vrot.slane %v1026_v36, 5  ;;  %v1060_v26 = vshll.u32 %v3582_v10, 16  ;;  %v600_v27 = vadd.f32 -0.28449672, %v592_v6 }
  0x9b   : > { %v869_v62 = vrot.slane %v867_v8, 7  ;;  %v3638_v61 = vsel %vm3417_vm6, %v2321_v22, %v1119_v25  ;;  %v1057_v46 = vor.u32 %v1056_v23, %v1053_v32  ;;  %v1034_v36 = vrot.slane %v1032_v3, 5  ;;  %v2819_v32 = vld [vmem:[%s3978_s1] ss:$0 sm:$0xff]  ;;  %v2814_v13 = vpop.eup %2813 }
  0x9c   : > { %v1029_v35 = vor.u32 %v1028_v11, %v1025_v56  ;;  %v608_v8 = vmul.f32 %v600_v27, %v3547_v54  ;;  %v1213_v2 = vunpack.c.l.b16 %v3638_v61  ;;  %v1062_v7 = vrot.slane %v1060_v26, 5 }
  0x9d   : > { %v872_v47 = vor.u32 %v870_v53, %v869_v62  ;;  %v752_v53 = vunpack.c.l.bf16 %v2318_v24  ;;  %v1058_v33 = vrot.slane %v1057_v46, 4  ;;  %v1065_v27 = vshrl.u32 %v3586_v42, 16 }
  0x9e   : > { %v1030_v62 = vrot.slane %v1029_v35, 4  ;;  %v616_v22 = vadd.f32 0.2548296, %v608_v8  ;;  %v1074_v46 = vshll.u32 %v3591_v40, 16 }
  0x9f   : > { %v931_v1 = vsel %vm3325_vm0, 0, %v872_v47  ;;  %v1135_v47 = vrot.slane %v3604_v15, 5  ;;  %v753_v6 = vmul.f32 %v2819_v32, %v752_v53  ;;  %v1063_v26 = vsel %vm3538_vm10, %v1058_v33, %v1062_v7  ;;  %v2664_v33 = vld [vmem:[%s3980_s3 + $0x158] sm:$0xff] }
  0xa0   : > { %v944_v29 = vsel %vm3331_vm1, %v931_v1, 0  ;;  %v1035_v23 = vsel %vm3538_vm10, %v1030_v62, %v1034_v36  ;;  %v624_v36 = vmul.f32 %v616_v22, %v3547_v54  ;;  %v1067_v8 = vrot.slane %v1065_v27, 4  ;;  %v2680_v54 = vld [vmem:[%s3980_s3 + $0x1d8] sm:$0xff] }
  0xa1   : > { %v965_v34 = vunpack.c.l.b16 %v944_v29  ;;  %v966_v44 = vunpack.c.h.b16 %v944_v29  ;;  %v3670_v24 = vsel %vm3417_vm6, %v2325_v20, %v1135_v47  ;;  %v408_v53 = vsel %vm400_vm11, 1.0, %v2845_v37  ;;  %2048 = vmatpush.bf16.msrb.mxu3 %v2680_v54  ;;  %v3719_v20 = vld [vmem:[%s3980_s3 + $0x228] sm:$0xff] }
  0xa2   : > { %v3692_v62 = vunpack.c.l.b16 %v1063_v26  ;;  %v664_v7 = vmul.f32 %v2814_v13, %v624_v36  ;;  %v1076_v63 = vrot.slane %v1074_v46, 5  ;;  %v384_v22 = vmul.f32 0.5, %v3479_v21 }
  0xa3   : > { %v981_v12 = vpack.c.b16 %v965_v34, %v965_v34  ;;  %v982_v52 = vpack.c.b16 %v966_v44, %v966_v44  ;;  %v3642_v51 = vpack.c.b16 %v965_v34, %v3566_v58  ;;  %v1228_v10 = vpack.c.b16 %v3367_v60, %v965_v34  ;;  %v2665_v58 = vld [vmem:[%s3980_s3 + $0x160] sm:$0xff] }
  0xa4   : > { %1989 = vmatpush.bf16.msra.mxu1 %v2665_v58  ;;  %v1068_v44 = vshll.u32 %v3586_v42, 16  ;;  %v3697_v42 = vld [vmem:[%s3980_s3 + $0x230] sm:$0xff]  ;;  %v672_v47 = vsub.f32 1.0, %v664_v7  ;;  %v1215_v21 = vunpack.c.l.b16 %v3625_v38  ;;  %v1216_v27 = vunpack.c.l.b16 %v3629_v57 }
  0xa5   : > { %1854 = vmatmul.bf16.gmra.mxu0 %v3642_v51  ;;  %v2322_v49 = vrot.slane %v981_v12, 9  ;;  %v1123_v56 = vrot.slane %v982_v52, 5  ;;  %v1037_v11 = vshrl.u32 %v981_v12, 16  ;;  %v1040_v41 = vshll.u32 %v981_v12, 16  ;;  %v2820_v12 = vld [vmem:[%s3979_s2] ss:$0 sm:$0xff] }
  0xa6   : > { %v1046_v60 = vshll.u32 %v982_v52, 16  ;;  %v3689_v52 = vadd.f32 %v2820_v12, %v753_v6  ;;  %v1070_v40 = vrot.slane %v1068_v44, 5  ;;  %2074 = vmatpush.bf16.msra.mxu0 %v3697_v42  ;;  %v680_v13 = vmul.f32 %v672_v47, %v408_v53 }
  0xa7   : > { %v3660_v25 = vsel %vm3417_vm6, %v2322_v49, %v1123_v56  ;;  %v1039_v30 = vrot.slane %v1037_v11, 4  ;;  %v1042_v3 = vrot.slane %v1040_v41, 5  ;;  %v2670_v56 = vld [vmem:[%s3980_s3 + $0x188] sm:$0xff]  ;;  %v1079_v11 = vshrl.u32 %v3598_v48, 16 }
  0xa8   : > { %1941 = vmatmul.bf16.gmra.mxu3 %v1228_v10  ;;  %v1214_v1 = vunpack.c.l.b16 %v3660_v25  ;;  %v1048_v35 = vrot.slane %v1046_v60, 5  ;;  %v1197_v10 = vunpack.c.l.b16 %v1035_v23  ;;  %v1082_v41 = vshll.u32 %v3598_v48, 16  ;;  %1990 = vmatpush.bf16.msra.mxu1 %v2664_v33 }
  0xa9   : > { %v1043_v29 = vor.u32 %v1042_v3, %v1039_v30  ;;  %v1071_v60 = vor.u32 %v1070_v40, %v1067_v8  ;;  %2021 = vmatpush.bf16.msrb.mxu2 %v2670_v56  ;;  %v1081_v48 = vrot.slane %v1079_v11, 4  ;;  %v3723_v15 = vmul.f32 0.70710677, %v3689_v52  ;;  %v2663_v40 = vld [vmem:[%s3980_s3 + $0x150] sm:$0xff] }
  0xaa   : > { %v3680_v34 = vpack.c.b16 %v1214_v1, %v1213_v2  ;;  %v1084_v30 = vrot.slane %v1082_v41, 5  ;;  %v1236_v23 = vpack.c.b16 %v1197_v10, %v3557_v31  ;;  %2075 = vmatpush.bf16.msra.mxu0 %v3719_v20  ;;  %v688_v46 = vadd.f32 1.0, %v680_v13  ;;  %v2689_v13 = vld [vmem:[%s3980_s3 + $0x220] sm:$0xff] }
  0xab   : > { %v1044_v39 = vrot.slane %v1043_v29, 4  ;;  %v1072_v6 = vrot.slane %v1071_v60, 4  ;;  %v3732_v26 = vand.u32 2147483647, %v3723_v15  ;;  %v1229_v31 = vpack.c.b16 %v3461_v43, %v3373_v0  ;;  %v2669_v0 = vld [vmem:[%s3980_s3 + $0x180] sm:$0xff]  ;;  %v2679_v43 = vld [vmem:[%s3980_s3 + $0x1d0] sm:$0xff] }
  0xac   : > { %1912 = vmatmul.bf16.gmra.mxu2 %v3680_v34  ;;  %v1085_v29 = vor.u32 %v1084_v30, %v1081_v48  ;;  %v989_v53 = vpack.c.b16 %v3468_v59, %v3468_v59  ;;  %v696_v12 = vmul.f32 %v688_v46, %v384_v22  ;;  %v990_v41 = vpack.c.b16 %v974_v5, %v974_v5 }
  0xad   : > { %v1049_v49 = vsel %vm3538_vm10, %v1044_v39, %v1048_v35  ;;  %v1090_v35 = vrot.slane %v1088_v50, 5  ;;  %v1077_v44 = vsel %vm3538_vm10, %v1072_v6, %v1076_v63  ;;  %v760_v8 = vmul.f32 0.3275911, %v3732_v26  ;;  %2022 = vmatpush.bf16.msrb.mxu2 %v2669_v0  ;;  %2049 = vmatpush.bf16.msrb.mxu3 %v2679_v43 }
  0xae   : > { %v3713_v58 = vunpack.c.l.b16 %v1049_v49  ;;  %v3742_v36 = vunpack.c.l.b16 %v1077_v44  ;;  %v1086_v39 = vrot.slane %v1085_v29, 4  ;;  %v813_v7 = vpack.c.bf16 %v696_v12, %v696_v12  ;;  %1991 = vmatpush.bf16.msra.mxu1 %v2663_v40  ;;  %2076 = vmatpush.bf16.msra.mxu0 %v2689_v13  ;;  %v2688_v12 = vld [vmem:[%s3980_s3 + $0x218] sm:$0xff] }
  0xaf   : > { %v761_v33 = vadd.f32 1.0, %v760_v8  ;;  %v1093_v56 = vshrl.u32 %v989_v53, 16  ;;  %v1096_v11 = vshll.u32 %v989_v53, 16  ;;  %v3771_v50 = vpack.c.b16 %v1216_v27, %v1215_v21 }
  0xb0   : > { %v3726_v3 = vpack.c.b16 %v3713_v58, %v1197_v10  ;;  %v1237_v32 = vpack.c.b16 %v3692_v62, %v3713_v58  ;;  %v3749_v10 = vpack.c.b16 %v3742_v36, %v3692_v62  ;;  %v1091_v54 = vsel %vm3538_vm10, %v1086_v39, %v1090_v35 }
  0xb1   : > { %v3762_v49 = vunpack.c.l.b16 %v1091_v54  ;;  %2815 = vrcp.f32 %v761_v33  ;;  %v833_v60 = vunpack.c.l.b16 %v813_v7  ;;  %v1095_v47 = vrot.slane %v1093_v56, 4  ;;  %2743 = vmatpush.bf16.msra.mxu2 %v3618_v9 }
  0xb2   : > { %1883 = vmatmul.bf16.gmra.mxu1 %v3726_v3  ;;  %v1098_v22 = vrot.slane %v1096_v11, 5  ;;  %v1102_v48 = vshll.u32 %v990_v41, 16  ;;  %v2326_v46 = vrot.slane %v989_v53, 9  ;;  %v1139_v9 = vrot.slane %v990_v41, 5  ;;  %v2677_v53 = vld [vmem:[%s3980_s3 + $0x1c0] sm:$0xff]  ;;  %2077 = vmatpush.bf16.msra.mxu0 %v2688_v12 }
  0xb3   : > { %v1238_v63 = vpack.c.b16 %v3762_v49, %v3742_v36  ;;  %v843_v18 = vpack.c.b16 %v833_v60, %v833_v60  ;;  %vm767_vm12 = vweird.f32 %v761_v33  ;;  %v771_v7 = vand.u32 2147483647, %v761_v33 }
  0xb4   : > { %v1099_v5 = vor.u32 %v1098_v22, %v1095_v47  ;;  %v1104_v35 = vrot.slane %v1102_v48, 5  ;;  %v3799_v56 = vsel %vm3417_vm6, %v2326_v46, %v1139_v9  ;;  %v1217_v47 = vunpack.c.l.b16 %v3670_v24  ;;  %v2687_v9 = vld [vmem:[%s3980_s3 + $0x210] sm:$0xff] }
  0xb5   : > { %1965 = vmatmul.bf16.vlgmr.msrb.gmra.mxu0 %v1236_v23  ;;  %v902_v30 = vshrl.u32 %v843_v18, 16  ;;  %v905_v6 = vshll.u32 %v843_v18, 16  ;;  %v2678_v23 = vld [vmem:[%s3980_s3 + $0x1c8] sm:$0xff]  ;;  %2744 = vmatpush.bf16.msra.mxu2 %v3697_v42  ;;  %v773_v42 = vand.u32 2147483648, %v761_v33  ;;  %vm772_vm15 = vcmp.eq.f32.partialorder %v771_v7, 8.507059e+37  ;;  %v2685_v7 = vld [vmem:[%s3980_s3 + $0x200] sm:$0xff] }
  0xb6   : > { %v1100_v29 = vrot.slane %v1099_v5, 4  ;;  %2050 = vmatpush.bf16.msrb.mxu3 %v2678_v23  ;;  %v1218_v5 = vunpack.c.l.b16 %v3799_v56  ;;  %2078 = vmatpush.bf16.msra.mxu0 %v2687_v9  ;;  %vm757_vm2 = vcmp.ge.f32.partialorder %v3723_v15, 0.0  ;;  %v1246_v36 = vpack.c.b16 %v1215_v21, %v1214_v1 }
  0xb7   : > { %v2816_v44 = vpop.eup %2815  ;;  %v904_v39 = vrot.slane %v902_v30, 7  ;;  %v774_v18 = vor.u32 1.1754944e-38, %v773_v42  ;;  %v2661_v30 = vld [vmem:[%s3980_s3 + $0x140] sm:$0xff]  ;;  %v1245_v15 = vpack.c.b16 %v1213_v2, %v1212_v16 }
  0xb8   : > { %1946 = vmatmul.bf16.gmra.mxu3 %v1229_v31  ;;  %v2662_v31 = vld [vmem:[%s3980_s3 + $0x148] sm:$0xff]  ;;  %v1105_v8 = vsel %vm3538_vm10, %v1100_v29, %v1104_v35  ;;  %v763_v54 = vmul.f32 %v2816_v44, %v761_v33  ;;  %vm768_vm13 = vweird.f32 %v2816_v44  ;;  %v786_v29 = vsub.f32 0.0, %v3732_v26 }
  0xb9   : > { %v3792_v0 = vunpack.c.l.b16 %v1105_v8  ;;  %1992 = vmatpush.bf16.msra.mxu1 %v2662_v31  ;;  %v907_v43 = vor.u32 %v905_v6, %v904_v39  ;;  %2745 = vmatpush.bf16.msra.mxu2 %v3719_v20  ;;  %vm769_vm14 = vmor %vm767_vm12, %vm768_vm13  ;;  %v3833_v62 = vpack.c.b16 %v1218_v5, %v1217_v47 }
  0xba   : > { %v764_v40 = vsub.f32 1.0, %v763_v54  ;;  %2051 = vmatpush.bf16.msrb.mxu3 %v2677_v53  ;;  %v2686_v54 = vld [vmem:[%s3980_s3 + $0x208] sm:$0xff] }
  0xbb   : > { %v3803_v11 = vpack.c.b16 %v3792_v0, %v3762_v49  ;;  %v936_v41 = vsel %vm3325_vm0, 0, %v907_v43  ;;  %2079 = vmatpush.bf16.msra.mxu0 %v2686_v54  ;;  %v758_v49 = vsel %vm757_vm2, 1.0, %v2845_v37 }
  0xbc   : > { %1917 = vmatmul.bf16.gmra.mxu2 %v3771_v50  ;;  %v765_v60 = vmul.f32 %v2816_v44, %v764_v40  ;;  %v949_v22 = vsel %vm3331_vm1, %v936_v41, 0 }
  0xbd   : > { %v3814_v48 = vunpack.c.l.b16 %v949_v22  ;;  %2746 = vmatpush.bf16.msra.mxu2 %v2689_v13  ;;  %1993 = vmatpush.bf16.msra.mxu1 %v2661_v30 }
  0xbe   : > { %v766_v20 = vadd.f32 %v2816_v44, %v765_v60 }
  0xbf   : > { %v3824_v33 = vpack.c.b16 %v3814_v48, %v3814_v48  ;;  %v1230_v6 = vpack.c.b16 %v3814_v48, %v3468_v59  ;;  %v787_v59 = vmul.f32 %v786_v29, %v3732_v26  ;;  %2080 = vmatpush.bf16.msra.mxu0 %v2685_v7 }
  0xc0   : > { %v770_v23 = vsel %vm769_vm14, %v2816_v44, %v766_v20 }
  0xc1   : > { %v775_v35 = vsel %vm772_vm15, %v774_v18, %v770_v23  ;;  %2747 = vmatpush.bf16.msra.mxu2 %v2688_v12  ;;  %v1147_v13 = vshrl.u32 %v3824_v33, 16  ;;  %v1150_v46 = vshll.u32 %v3824_v33, 16  ;;  %v788_v53 = vmul.f32 1.442695, %v787_v59 }
  0xc2   : > { %1888 = vmatmul.bf16.gmra.mxu1 %v3749_v10  ;;  %v777_v58 = vmul.f32 1.0614054, %v775_v35 }
  0xc3   : > { %v1149_v8 = vrot.slane %v1147_v13, 4  ;;  %v1152_v12 = vrot.slane %v1150_v46, 5  ;;  %2817 = vpow2.f32 %v788_v53 }
  0xc4   : > { %v778_v44 = vadd.f32 -1.4531521, %v777_v58 }
  0xc5   : > { %1970 = vmatmul.bf16.gmra.mxu0 %v1237_v32  ;;  %v1143_v32 = vunpack.c.h.b16 %v949_v22  ;;  %2748 = vmatpush.bf16.msra.mxu2 %v2687_v9  ;;  %v1153_v43 = vor.u32 %v1152_v12, %v1149_v8 }
  0xc6   : > { %v779_v31 = vmul.f32 %v778_v44, %v775_v35 }
  0xc7   : > { %v3842_v39 = vpack.c.b16 %v1143_v32, %v1143_v32  ;;  %v1154_v22 = vrot.slane %v1153_v43, 4 }
  0xc8   : > { %1951 = vmatmul.bf16.gmra.mxu3 %v1230_v6  ;;  %v780_v26 = vadd.f32 1.4214138, %v779_v31 }
  0xc9   : > { %v1156_v40 = vshll.u32 %v3842_v39, 16  ;;  %2749 = vmatpush.bf16.msra.mxu2 %v2686_v54  ;;  %v2818_v30 = vpop.eup %2817 }
  0xca   : > { %v781_v42 = vmul.f32 %v780_v26, %v775_v35 }
  0xcb   : > { %v1158_v18 = vrot.slane %v1156_v40, 5  ;;  %v1162_v40 = vrot.slane %v3842_v39, 5 }
  0xcc   : > { %1922 = vmatmul.bf16.gmra.mxu2 %v3833_v62  ;;  %v782_v41 = vadd.f32 -0.28449672, %v781_v42 }
  0xcd   : > { %2750 = vmatpush.bf16.msra.mxu2 %v2685_v7  ;;  %v1159_v23 = vsel %vm3538_vm10, %v1154_v22, %v1158_v18 }
  0xce   : > { %v783_v60 = vmul.f32 %v782_v41, %v775_v35 }
  0xd0   : > { %v784_v20 = vadd.f32 0.2548296, %v783_v60 }
  0xd2   : > { %1893 = vmatmul.bf16.gmra.mxu1 %v3803_v11  ;;  %v785_v6 = vmul.f32 %v784_v20, %v775_v35 }
  0xd4   : > { %v790_v29 = vmul.f32 %v2818_v30, %v785_v6 }
  0xd5   : > { %1975 = vmatmul.bf16.gmra.mxu0 %v1238_v63  ;;  %v1235_v63 = vunpack.c.l.b16 %v1159_v23 }
  0xd6   : > { %v791_v58 = vsub.f32 1.0, %v790_v29 }
  0xd7   : > { %v1239_v32 = vpack.c.b16 %v1235_v63, %v3792_v0 }
  0xd8   : > { %2052 = vmatmul.bf16.vlgmr.msrb.gmra.mxu3 %v3726_v3  ;;  %v755_v3 = vmul.f32 0.5, %v3689_v52  ;;  %v792_v35 = vmul.f32 %v791_v58, %v758_v49 }
  0xdb   : > { %v3873_v4 = vpop.f32.mrf.mxu1 }
  0xdc   : > { %2023 = vmatmul.bf16.vlgmr.msrb.gmra.mxu2 %v3642_v51  ;;  %v793_v51 = vadd.f32 1.0, %v792_v35 }
  0xde   : > { %v794_v25 = vmul.f32 %v793_v51, %v755_v3 }
  0xe0   : > { %v804_v38 = vmul.f32 0.0, %v794_v25 }
  0xe2   : > { %1994 = vmatmul.bf16.vlgmr.msra.gmra.mxu1 %v1245_v15  ;;  %v814_v1 = vpack.c.bf16 %v804_v38, %v804_v38  ;;  %v1850_v41 = vpop.f32.mrf.mxu0 }
  0xe3   : > { %v3879_v46 = vpop.f32.mrf.mxu1 }
  0xe4   : > { %v834_v37 = vunpack.c.l.b16 %v814_v1 }
  0xe5   : > { %1980 = vmatmul.bf16.gmra.mxu0 %v1239_v32 }
  0xe6   : > { %v844_v21 = vpack.c.b16 %v834_v37, %v834_v37 }
  0xe8   : > { %2057 = vmatmul.bf16.gmra.mxu3 %v3749_v10  ;;  %v909_v16 = vshrl.u32 %v844_v21, 16  ;;  %v912_v61 = vshll.u32 %v844_v21, 16 }
  0xea   : > { %v911_v2 = vrot.slane %v909_v16, 7 }
  0xec   : > { %2028 = vmatmul.bf16.gmra.mxu2 %v3385_v45  ;;  %v914_v52 = vor.u32 %v912_v61, %v911_v2 }
  0xee   : > { %v937_v0 = vsel %vm3325_vm0, 0, %v914_v52 }
  0xef   : > { %v950_v13 = vsel %vm3331_vm1, %v937_v0, 0  ;;  %v1908_v60 = vpop.f32.mrf.mxu2 }
  0xf0   : > { %v1165_v10 = vunpack.c.l.b16 %v950_v13  ;;  %v1166_v59 = vunpack.c.h.b16 %v950_v13 }
  0xf1   : > { %v3888_v53 = vpop.f32.mrf.mxu1 }
  0xf2   : > { %1999 = vmatmul.bf16.gmra.mxu1 %v1246_v36  ;;  %v1167_v45 = vpack.c.b16 %v1165_v10, %v1165_v10  ;;  %v1168_v44 = vpack.c.b16 %v1166_v59, %v1166_v59  ;;  %v1253_v57 = vpack.c.b16 %v1165_v10, %v3814_v48 }
  0xf4   : > { %v1170_v9 = vshrl.u32 %v1167_v45, 16  ;;  %v1173_v31 = vshll.u32 %v1167_v45, 16  ;;  %v1179_v8 = vshll.u32 %v1168_v44, 16  ;;  %v1185_v7 = vrot.slane %v1168_v44, 5 }
  0xf5   : > { %2081 = vmatmul.bf16.vlgmr.msra.gmra.mxu0 %v3680_v34  ;;  %v1247_v34 = vpack.c.b16 %v1217_v47, %v1216_v27  ;;  %v2328_v47 = vrot.slane %v1167_v45, 9 }
  0xf6   : > { %v1172_v12 = vrot.slane %v1170_v9, 4  ;;  %v1175_v54 = vrot.slane %v1173_v31, 5  ;;  %v1181_v19 = vrot.slane %v1179_v8, 5 }
  0xf8   : > { %2062 = vmatmul.bf16.gmra.mxu3 %v3803_v11  ;;  %v1176_v28 = vor.u32 %v1175_v54, %v1172_v12 }
  0xf9   : > { %v3896_v24 = vpop.f32.mrf.mxu1 }
  0xfa   : > { %v1177_v26 = vrot.slane %v1176_v28, 4 }
  0xfc   : > { %2033 = vmatmul.bf16.gmra.mxu2 %v3473_v55  ;;  %v1182_v11 = vsel %vm3538_vm10, %v1177_v26, %v1181_v19  ;;  %v2327_v55 = vrot.slane %v3824_v33, 9  ;;  %v1186_v33 = vsel %vm3417_vm6, %v2328_v47, %v1185_v7 }
  0xfd   : > { %v1255_v42 = vunpack.c.l.b16 %v1182_v11  ;;  %v1258_v20 = vunpack.c.l.b16 %v1186_v33 }
  0xfe   : > { %v1163_v27 = vsel %vm3417_vm6, %v2327_v55, %v1162_v40 }
  0xff   : > { %v1256_v43 = vpack.c.b16 %v1255_v42, %v1235_v63  ;;  %v1244_v14 = vunpack.c.l.b16 %v1163_v27  ;;  %v1910_v63 = vpop.f32.mrf.mxu2 }
 0x101   : > { %v1248_v39 = vpack.c.b16 %v1244_v14, %v1218_v5  ;;  %v1259_v56 = vpack.c.b16 %v1258_v20, %v1244_v14  ;;  %v1852_v5 = vpop.f32.mrf.mxu0 }
 0x102   : > { %2004 = vmatmul.bf16.gmra.mxu1 %v1247_v34 }
 0x105   : > { %2086 = vmatmul.bf16.gmra.mxu0 %v3771_v50  ;;  %v3905_v50 = vld [vmem:[%s3981_s4] ss:$0 sm:$0xff] }
 0x106   : > { %v1851_v48 = vadd.f32 %v3905_v50, %v1850_v41  ;;  %v1853_v6 = vadd.f32 %v3905_v50, %v1852_v5  ;;  %v1861_v45 = vadd.f32 %v3905_v50, %v3873_v4  ;;  %v1863_v34 = vadd.f32 %v3905_v50, %v3879_v46 }
 0x107   : > { %v1866_v4 = vadd.f32 %v3905_v50, %v3888_v53  ;;  %v1868_v46 = vadd.f32 %v3905_v50, %v3896_v24 }
 0x108   : > { %2067 = vmatmul.bf16.gmra.mxu3 %v1256_v43 }
 0x10c   : > { %2038 = vmatmul.bf16.gmra.mxu2 %v1253_v57 }
 0x110   : > { %v1879_v22 = vpop.f32.mrf.mxu1 }
 0x111   : > { %v1880_v18 = vadd.f32 %v1879_v22, %v1851_v48 }
 0x112   : > { %2009 = vmatmul.bf16.gmra.mxu1 %v1248_v39 }
 0x113   : > { %v1909_v30 = vadd.f32 %v1908_v60, %v1880_v18 }
 0x115   : > { %2091 = vmatmul.bf16.gmra.mxu0 %v3833_v62 }
 0x118   : > { %v1881_v29 = vpop.f32.mrf.mxu1 }
 0x119   : > { %v1882_v49 = vadd.f32 %v1881_v29, %v1853_v6 }
 0x11b   : > { %v1937_v23 = vpop.f32.mrf.mxu3  ;;  %v1911_v17 = vadd.f32 %v1910_v63, %v1882_v49 }
 0x11c   : > { %v1938_v36 = vadd.f32 %v1937_v23, %v1909_v30  ;;  %2096 = vmatmul.bf16.vlgmr.msra.gmra.mxu2 %v1259_v56 }
 0x122   : > { %v1855_v58 = vpop.f32.mrf.mxu0 }
 0x123   : > { %v1939_v15 = vpop.f32.mrf.mxu3  ;;  %v1856_v32 = vadd.f32 %v3905_v50, %v1855_v58 }
 0x124   : > { %v1940_v29 = vadd.f32 %v1939_v15, %v1911_v17 }
 0x12a   : > { %v1857_v3 = vpop.f32.mrf.mxu0 }
 0x12b   : > { %v1942_v35 = vpop.f32.mrf.mxu3  ;;  %v1858_v61 = vadd.f32 %v3905_v50, %v1857_v3 }
 0x12f   : > { %v1913_v51 = vpop.f32.mrf.mxu2  ;;  %v1884_v62 = vpop.f32.mrf.mxu1 }
 0x130   : > { %v1885_v25 = vadd.f32 %v1884_v62, %v1856_v32 }
 0x132   : > { %v1966_v38 = vpop.f32.mrf.mxu0  ;;  %v1914_v1 = vadd.f32 %v1913_v51, %v1885_v25 }
 0x133   : > { %v3913_v37 = vpop.f32.mrf.mxu3  ;;  %v1967_v21 = vadd.f32 %v1966_v38, %v1938_v36 }
 0x134   : > { %v1943_v16 = vadd.f32 %v1942_v35, %v1914_v1 }
 0x137   : > { %v1915_v2 = vpop.f32.mrf.mxu2  ;;  %v1886_v52 = vpop.f32.mrf.mxu1 }
 0x138   : > { %v1887_v0 = vadd.f32 %v1886_v52, %v1858_v61 }
 0x13a   : > { %v1968_v13 = vpop.f32.mrf.mxu0  ;;  %v1916_v10 = vadd.f32 %v1915_v2, %v1887_v0 }
 0x13b   : > { %v1947_v59 = vpop.f32.mrf.mxu3  ;;  %v1969_v49 = vadd.f32 %v1968_v13, %v1940_v29 }
 0x13c   : > { %v1945_v61 = vadd.f32 %v3913_v37, %v1916_v10 }
 0x13f   : > { %v1918_v44 = vpop.f32.mrf.mxu2  ;;  %v1889_v9 = vpop.f32.mrf.mxu1 }
 0x140   : > { %v1890_v31 = vadd.f32 %v1889_v9, %v1861_v45 }
 0x142   : > { %v1971_v8 = vpop.f32.mrf.mxu0  ;;  %v1919_v12 = vadd.f32 %v1918_v44, %v1890_v31 }
 0x143   : > { %v3918_v54 = vpop.f32.mrf.mxu3  ;;  %v1972_v28 = vadd.f32 %v1971_v8, %v1943_v16 }
 0x144   : > { %v1948_v19 = vadd.f32 %v1947_v59, %v1919_v12 }
 0x147   : > { %v1920_v26 = vpop.f32.mrf.mxu2  ;;  %v1891_v11 = vpop.f32.mrf.mxu1 }
 0x148   : > { %v1892_v42 = vadd.f32 %v1891_v11, %v1863_v34 }
 0x14a   : > { %v1973_v43 = vpop.f32.mrf.mxu0  ;;  %v3922_v40 = vadd.f32 %v1920_v26, %v1892_v42 }
 0x14b   : > { %v3924_v55 = vpop.f32.mrf.mxu3  ;;  %v1974_v0 = vadd.f32 %v1973_v43, %v1945_v61 }
 0x14f   : > { %v1923_v57 = vpop.f32.mrf.mxu2  ;;  %v1894_v27 = vpop.f32.mrf.mxu1 }
 0x150   : > { %v1895_v14 = vadd.f32 %v1894_v27, %v1866_v4 }
 0x152   : > { %v1976_v47 = vpop.f32.mrf.mxu0  ;;  %v3928_v7 = vadd.f32 %v1923_v57, %v1895_v14  ;;  %v1950_v14 = vadd.f32 %v3918_v54, %v3922_v40 }
 0x153   : > { %v1977_v41 = vadd.f32 %v1976_v47, %v1948_v19  ;;  %v3930_v39 = vpop.f32.mrf.mxu3 }
 0x157   : > { %v1925_v48 = vpop.f32.mrf.mxu2  ;;  %v1896_v33 = vpop.f32.mrf.mxu1 }
 0x158   : > { %v1897_v60 = vadd.f32 %v1896_v33, %v1868_v46 }
 0x15a   : > { %v1978_v22 = vpop.f32.mrf.mxu0  ;;  %v3934_v18 = vadd.f32 %v1925_v48, %v1897_v60 }
 0x15b   : > { %v2053_v20 = vpop.f32.mrf.mxu3  ;;  %v1979_v33 = vadd.f32 %v1978_v22, %v1950_v14 }
 0x15f   : > { %v2024_v53 = vpop.f32.mrf.mxu2  ;;  %v1995_v30 = vpop.f32.mrf.mxu1 }
 0x160   : > { %v1996_v63 = vadd.f32 %v1995_v30, %v1967_v21  ;;  %v1953_v30 = vadd.f32 %v3924_v55, %v3928_v7 }
 0x162   : > { %v3936_v56 = vpop.f32.mrf.mxu0  ;;  %v2025_v35 = vadd.f32 %v2024_v53, %v1996_v63 }
 0x163   : > { %v2055_v5 = vpop.f32.mrf.mxu3  ;;  %v1982_v63 = vadd.f32 %v3936_v56, %v1953_v30 }
 0x164   : > { %v2054_v62 = vadd.f32 %v2053_v20, %v2025_v35 }
 0x167   : > { %v2026_v6 = vpop.f32.mrf.mxu2  ;;  %v1997_v23 = vpop.f32.mrf.mxu1 }
 0x168   : > { %v1998_v50 = vadd.f32 %v1997_v23, %v1969_v49 }
 0x16a   : > { %v3938_v36 = vpop.f32.mrf.mxu0  ;;  %v2027_v51 = vadd.f32 %v2026_v6, %v1998_v50 }
 0x16b   : > { %v2058_v3 = vpop.f32.mrf.mxu3 }
 0x16c   : > { %v2056_v38 = vadd.f32 %v2055_v5, %v2027_v51 }
 0x16f   : > { %v2029_v24 = vpop.f32.mrf.mxu2  ;;  %v2000_v58 = vpop.f32.mrf.mxu1 }
 0x170   : > { %v2001_v1 = vadd.f32 %v2000_v58, %v1972_v28 }
 0x172   : > { %v2082_v32 = vpop.f32.mrf.mxu0  ;;  %v2030_v21 = vadd.f32 %v2029_v24, %v2001_v1 }
 0x173   : > { %v2083_v17 = vadd.f32 %v2082_v32, %v2054_v62  ;;  %v2060_v2 = vpop.f32.mrf.mxu3 }
 0x174   : > { %v2059_v10 = vadd.f32 %v2058_v3, %v2030_v21  ;;  %v1955_v3 = vadd.f32 %v3930_v39, %v3934_v18 }
 0x175   : > { %v2132_v13 = vmul.f32 %v2083_v17, %v2083_v17 }
 0x177   : > { %v2031_v25 = vpop.f32.mrf.mxu2  ;;  %v2002_v16 = vpop.f32.mrf.mxu1 }
 0x178   : > { %v2003_v31 = vadd.f32 %v2002_v16, %v1974_v0 }
 0x17a   : > { %v2084_v15 = vpop.f32.mrf.mxu0  ;;  %v2032_v19 = vadd.f32 %v2031_v25, %v2003_v31  ;;  %v1984_v25 = vadd.f32 %v3938_v36, %v1955_v3 }
 0x17b   : > { %v2085_v52 = vadd.f32 %v2084_v15, %v2056_v38  ;;  %v2063_v34 = vpop.f32.mrf.mxu3 }
 0x17c   : > { %v2061_v4 = vadd.f32 %v2060_v2, %v2032_v19 }
 0x17d   : > { %v2712_v59 = vpack.c.bf16 %v2085_v52, %v2083_v17  ;;  %v2118_v45 = vadd.f32 %v2085_v52, %v2083_v17  ;;  %v2133_v44 = vmul.f32 %v2085_v52, %v2085_v52 }
 0x17f   : > { %2713 = vst [vmem:[%s3946_s30] sm:$0xff] %v2712_v59   ;;  %v2140_v9 = vadd.f32 %v2133_v44, %v2132_v13  ;;  %v2034_v37 = vpop.f32.mrf.mxu2  ;;  %v2005_v8 = vpop.f32.mrf.mxu1 }
 0x180   : > { %v2006_v57 = vadd.f32 %v2005_v8, %v1977_v41 }
 0x182   : > { %v2087_v12 = vpop.f32.mrf.mxu0  ;;  %v2035_v48 = vadd.f32 %v2034_v37, %v2006_v57 }
 0x183   : > { %v2088_v28 = vadd.f32 %v2087_v12, %v2059_v10  ;;  %v2065_v5 = vpop.f32.mrf.mxu3 }
 0x184   : > { %v2064_v29 = vadd.f32 %v2063_v34, %v2035_v48 }
 0x185   : > { %v2119_v26 = vadd.f32 %v2118_v45, %v2088_v28  ;;  %v2134_v11 = vmul.f32 %v2088_v28, %v2088_v28 }
 0x187   : > { %v2141_v42 = vadd.f32 %v2140_v9, %v2134_v11  ;;  %v2036_v43 = vpop.f32.mrf.mxu2  ;;  %v2007_v27 = vpop.f32.mrf.mxu1 }
 0x188   : > { %v2008_v41 = vadd.f32 %v2007_v27, %v1979_v33 }
 0x18a   : > { %v2089_v47 = vpop.f32.mrf.mxu0  ;;  %v2037_v24 = vadd.f32 %v2036_v43, %v2008_v41 }
 0x18b   : > { %v2090_v46 = vadd.f32 %v2089_v47, %v2061_v4  ;;  %v2068_v51 = vpop.f32.mrf.mxu3 }
 0x18c   : > { %v2066_v35 = vadd.f32 %v2065_v5, %v2037_v24 }
 0x18d   : > { %v2717_v60 = vpack.c.bf16 %v2090_v46, %v2088_v28  ;;  %v2120_v20 = vadd.f32 %v2119_v26, %v2090_v46  ;;  %v2135_v53 = vmul.f32 %v2090_v46, %v2090_v46 }
 0x18f   : > { %2732 = vst [vmem:[%s3946_s30 + $0x8] sm:$0xff] %v2717_v60   ;;  %v2142_v6 = vadd.f32 %v2141_v42, %v2135_v53  ;;  %v2039_v23 = vpop.f32.mrf.mxu2  ;;  %v2010_v49 = vpop.f32.mrf.mxu1 }
 0x190   : > { %v2011_v50 = vadd.f32 %v2010_v49, %v1982_v63 }
 0x192   : > { %v2092_v54 = vpop.f32.mrf.mxu0  ;;  %v2040_v32 = vadd.f32 %v2039_v23, %v2011_v50 }
 0x193   : > { %v2093_v40 = vadd.f32 %v2092_v54, %v2064_v29  ;;  %v2070_v13 = vpop.f32.mrf.mxu3 }
 0x194   : > { %v2069_v1 = vadd.f32 %v2068_v51, %v2040_v32 }
 0x195   : > { %v2121_v22 = vadd.f32 %v2120_v20, %v2093_v40  ;;  %v2136_v58 = vmul.f32 %v2093_v40, %v2093_v40 }
 0x197   : > { %v2143_v55 = vadd.f32 %v2142_v6, %v2136_v58  ;;  %v2041_v7 = vpop.f32.mrf.mxu2  ;;  %v2012_v62 = vpop.f32.mrf.mxu1 }
 0x198   : > { %v2013_v16 = vadd.f32 %v2012_v62, %v1984_v25 }
 0x19a   : > { %v2094_v38 = vpop.f32.mrf.mxu0  ;;  %v2042_v18 = vadd.f32 %v2041_v7, %v2013_v16 }
 0x19b   : > { %v2095_v56 = vadd.f32 %v2094_v38, %v2066_v35 }
 0x19c   : > { %v2071_v45 = vadd.f32 %v2070_v13, %v2042_v18 }
 0x19d   : > { %v2722_v61 = vpack.c.bf16 %v2095_v56, %v2093_v40  ;;  %v2122_v17 = vadd.f32 %v2121_v22, %v2095_v56  ;;  %v2137_v15 = vmul.f32 %v2095_v56, %v2095_v56 }
 0x19f   : > { %2733 = vst [vmem:[%s3946_s30 + $0x10] sm:$0xff] %v2722_v61   ;;  %v2144_v2 = vadd.f32 %v2143_v55, %v2137_v15  ;;  %v2097_v52 = vpop.f32.mrf.mxu2 }
 0x1a0   : > { %v2098_v39 = vadd.f32 %v2097_v52, %v2069_v1 }
 0x1a2   : > { %v2123_v21 = vadd.f32 %v2122_v17, %v2098_v39  ;;  %v2138_v0 = vmul.f32 %v2098_v39, %v2098_v39 }
 0x1a4   : > { %v2145_v59 = vadd.f32 %v2144_v2, %v2138_v0 }
 0x1a7   : > { %v2099_v44 = vpop.f32.mrf.mxu2 }
 0x1a8   : > { %v2100_v36 = vadd.f32 %v2099_v44, %v2071_v45 }
 0x1aa   : > { %v2727_v9 = vpack.c.bf16 %v2100_v36, %v2098_v39  ;;  %v2124_v37 = vadd.f32 %v2123_v21, %v2100_v36  ;;  %v2139_v10 = vmul.f32 %v2100_v36, %v2100_v36 }
 0x1ac   : > { %2734 = vst [vmem:[%s3946_s30 + $0x18] sm:$0xff] %v2727_v9   ;;  %v2125_v31 = vrot.slane %v2124_v37, 4  ;;  %v2146_v8 = vadd.f32 %v2145_v59, %v2139_v10 }
 0x1ae   : > { %v2126_v12 = vadd.f32 %v2125_v31, %v2124_v37  ;;  %v2147_v28 = vrot.slane %v2146_v8, 4 }
 0x1b0   : > { %v2127_v19 = vrot.slane %v2126_v12, 2  ;;  %v2148_v34 = vadd.f32 %v2147_v28, %v2146_v8 }
 0x1b2   : > { %v2128_v26 = vadd.f32 %v2127_v19, %v2126_v12  ;;  %v2149_v11 = vrot.slane %v2148_v34, 2 }
 0x1b4   : > { %v2129_v42 = vrot.slane %v2128_v26, 1  ;;  %v2150_v43 = vadd.f32 %v2149_v11, %v2148_v34 }
 0x1b6   : > { %v2130_v4 = vadd.f32 %v2129_v42, %v2128_v26  ;;  %v2151_v57 = vrot.slane %v2150_v43, 1 }
 0x1b8   : > { %2131 = vst [vmem:[%s328_s9] sm:$0x1] %v2130_v4  ;;  %v2152_v27 = vadd.f32 %v2151_v57, %v2150_v43 }
 0x1ba   : > { %2153 = vst [vmem:[%s334_s12] sm:$0x1] %v2152_v27 }
 0x1bb PF: > { %s18_s26 = sadd.s32 1, %s2843_s26   ;;  %s4021_s24 = smov %s2839_s25 }
 0x1bc   : > { %p15_p5 = scmp.ge.s32.totalorder %s18_s26, 4   ;;  %s4022_s25 = smov %s4024_s27 }
 0x1be   :  { %17 = sbr.rel (!%p15_p5) target bundleno = 2 (0x2), region = 96 }

</bundles_post_ra>
